<compile_context>
chip_gen: v6e
topology: v6e:2x2x1
jax: 0.10.0
libtpu: 0.0.40
codegen_flags: <defaults>
</compile_context>

<pallas_src>
import functools

import jax
import jax.numpy as jnp
from jax import lax
from jax.experimental import pallas as pl
from jax.experimental.pallas import tpu as pltpu

# ----------------------------- hyper-params ---------------------------------
WORD_VOCAB = 50
WORD_EMB = 16
HIDDEN = 32            # word_hidden_dim (per LSTM direction)
ATT = 8                # att_dim
VERB_EMB = 4
CAP_EMB = 4
VERB_IN = 2            # verb_input_dim
CAP_IN = 4             # cap_input_dim
TAG_TO_ID = {"O": 0, "B-ARG0": 1, "I-ARG0": 2, "B-ARG1": 3, "I-ARG1": 4}
NTAGS = len(TAG_TO_ID)

SEM = HIDDEN - ATT     # per-direction semantic dim
S = 2 * SEM            # structured-attention output dim == decoder input dim
R = 2 * ATT            # structure-part dim (both directions concatenated)
DIN = WORD_EMB + VERB_EMB + CAP_EMB
DEC_PAD = 128          # decoder logits padded to one full lane width


def _vmem_spec():
    # Explicit full-array VMEM placement (no grid at these tiny sizes).
    return pl.BlockSpec(memory_space=pltpu.MemorySpace.VMEM)


# ----------------------------- fused Pallas kernel ---------------------------
def _bilstm_str_kernel(H, A, T,
                       words_ref, verbs_ref, caps_ref,
                       wemb_ref, vemb_ref, cemb_ref,
                       wih_ref, bih_ref, whh_ref,
                       wtp_ref, btp_ref, wtc_ref, btc_ref,
                       wbi_ref, wfi_ref, exp_ref, wfz_ref, bfz_ref,
                       wdec_ref, bdec_ref, tags_ref, mask_ref,
                       score_ref):
    """Embeddings + BiLSTM + structured attention (matrix-tree) + decoder NLL."""
    f32 = jnp.float32
    BT = words_ref.shape[0]
    B = BT // T
    SEMd = H - A           # per-direction semantic width
    Sd = 2 * SEMd          # decoder input width
    Rd = 2 * A             # structure width

    def recip(x):
        # EUP approx reciprocal (free slot) + one Newton step (~f32 exact).
        r = pl.reciprocal(x, approx=True)
        return r * (2.0 - x * r)

    # ---- embeddings: exact gathers as one-hot MXU matmuls ----
    def embed(idx_ref, emb_ref):
        V = emb_ref.shape[0]
        cls = lax.broadcasted_iota(jnp.int32, (BT, V), 1)
        oh = (cls == idx_ref[...]).astype(f32)
        return jnp.dot(oh, emb_ref[...], preferred_element_type=f32)

    x = jnp.concatenate([embed(words_ref, wemb_ref),
                         embed(verbs_ref, vemb_ref),
                         embed(caps_ref, cemb_ref)], axis=-1)            # (BT, DIN)

    # ---- BiLSTM: hoisted input projection (both directions, bias folded) ----
    gin = (jnp.dot(x, wih_ref[...], preferred_element_type=f32)
           + bih_ref[...]).reshape(B, T, 8 * H)                          # (B,T,8H)
    whh = whh_ref[...]                                                   # (2H,8H) block-diag

    def sig(z):                     # sigmoid via a single EUP tanh
        return 0.5 * (jnp.tanh(0.5 * z) + 1.0)

    def gates(pre):                 # pre: (B, 4H); gate order i, f, g, o
        return (sig(pre[:, 0:H]), sig(pre[:, H:2 * H]),
                jnp.tanh(pre[:, 2 * H:3 * H]), sig(pre[:, 3 * H:4 * H]))

    zeros = jnp.zeros((B, H), f32)
    hf, cf, hb, cb = zeros, zeros, zeros, zeros
    hf_steps = [None] * T
    hb_steps = [None] * T

    # Fully unrolled merged recurrence (T=8): one block-diag (B,2H)x(2H,8H)
    # matmul per step drives BOTH directions (fwd at t, bwd at T-1-t).
    for t in range(T):
        tb = T - 1 - t
        rec = jnp.dot(jnp.concatenate([hf, hb], axis=-1), whh,
                      preferred_element_type=f32)                        # (B, 8H)
        i_f, f_f, g_f, o_f = gates(gin[:, t, 0:4 * H] + rec[:, 0:4 * H])
        i_b, f_b, g_b, o_b = gates(gin[:, tb, 4 * H:8 * H] + rec[:, 4 * H:8 * H])
        cf = f_f * cf + i_f * g_f
        hf = o_f * jnp.tanh(cf)
        cb = f_b * cb + i_b * g_b
        hb = o_b * jnp.tanh(cb)
        hf_steps[t] = hf
        hb_steps[tb] = hb

    # assemble once (no per-step stores), already split into sem / str slabs
    hf_all = jnp.concatenate([h.reshape(B, 1, H) for h in hf_steps],
                             axis=1).reshape(BT, H)
    hb_all = jnp.concatenate([h.reshape(B, 1, H) for h in hb_steps],
                             axis=1).reshape(BT, H)
    sem = jnp.concatenate([hf_all[:, 0:SEMd], hb_all[:, 0:SEMd]], axis=-1)   # (BT, S)
    str_ = jnp.concatenate([hf_all[:, SEMd:H], hb_all[:, SEMd:H]], axis=-1)  # (BT, R)

    # ---- structured attention: shared matmuls on the whole (BT, .) slab ----
    tp = jnp.tanh(jnp.dot(str_, wtp_ref[...], preferred_element_type=f32)
                  + btp_ref[...])                                        # (BT, R)
    tc = jnp.tanh(jnp.dot(str_, wtc_ref[...], preferred_element_type=f32)
                  + btc_ref[...])                                        # (BT, R)
    u = jnp.dot(tp, wbi_ref[...], preferred_element_type=f32)            # (BT, R)

    u_b = u.reshape(B, T, Rd)
    tc_b = tc.reshape(B, T, Rd)
    str_b = str_.reshape(B, T, Rd)
    sem_b = sem.reshape(B, T, Sd)

    # edge scores fij[b,i,j] = u_i . tc_j ; root scores fi in both layouts
    fij = lax.dot_general(u_b, tc_b, (((2,), (2,)), ((0,), (0,))),
                          preferred_element_type=f32)                    # (B,T,T)
    wfi_b = jnp.broadcast_to(wfi_ref[...].reshape(1, 1, Rd), (B, 1, Rd))
    fi_row = lax.dot_general(wfi_b, str_b, (((2,), (2,)), ((0,), (0,))),
                             preferred_element_type=f32)                 # (B,1,T)
    fi_col = lax.dot_general(str_, wfi_ref[...], (((1,), (1,)), ((), ())),
                             preferred_element_type=f32).reshape(B, T, 1)

    rows = lax.broadcasted_iota(jnp.int32, (B, T, T), 1)
    cols = lax.broadcasted_iota(jnp.int32, (B, T, T), 2)
    offdiag = (rows != cols).astype(f32)
    eye = (rows == cols).astype(f32)

    # shared per-sequence max: matrix-tree marginals are invariant under a
    # common scaling of the exp-scores, so subtracting m is exact (m stays
    # coupled to BOTH fij and fi).
    m = jnp.maximum(
        jnp.max(jnp.max(fij, axis=2, keepdims=True), axis=1, keepdims=True),
        jnp.max(fi_row, axis=2, keepdims=True))                          # (B,1,1)
    aij = jnp.exp(fij - m) * offdiag                                     # (B,T,T)
    fi_e_row = jnp.exp(fi_row - m)                                       # (B,1,T)
    fi_e_col = jnp.exp(fi_col - m)                                       # (B,T,1)

    colsum = jnp.sum(aij, axis=1, keepdims=True)                         # (B,1,T)
    lap = -aij + jnp.where(rows == cols, colsum, 0.0)                    # Laplacian
    lbar = jnp.where(rows == 0, fi_e_row, lap)                           # row 0 <- roots

    # batched, unrolled Gauss-Jordan on [L_bar | I] (pivot index is uniform
    # across the batch since there is no pivoting).
    # TODO(synk): no partial pivoting (torch.inverse uses pivoted LU); fine
    # for the well-conditioned Laplacians produced here.
    ridx = lax.broadcasted_iota(jnp.int32, (B, T, 1), 1)
    aug = jnp.concatenate([lbar, eye], axis=2)                           # (B,T,2T)
    for k in range(T):
        prow = aug[:, k:k + 1, :] * recip(aug[:, k:k + 1, k:k + 1])      # (B,1,2T)
        fac = jnp.where(ridx == k, 0.0, aug[:, :, k:k + 1])              # (B,T,1)
        aug = aug - fac * prow
        aug = jnp.where(ridx == k, prow, aug)
    linv = aug[:, :, T:2 * T]                                            # (B,T,T)
    linv_t = jnp.transpose(linv, (0, 2, 1))

    diag_row = jnp.sum(linv * eye, axis=1, keepdims=True)                # (B,1,T)
    mask_c = (cols != 0).astype(f32)
    mask_r = (rows != 0).astype(f32)
    dx = mask_c * (aij * diag_row) - mask_r * (aij * linv_t)             # (B,T,T)
    dx_t = jnp.transpose(dx, (0, 2, 1))
    d0 = fi_e_col * linv[:, :, 0:1]                                      # (B,T,1) root marg.

    # attended parent / child contexts (canonical batched contractions)
    pinp = (d0 * exp_ref[...].reshape(1, 1, Sd)
            + lax.dot_general(dx_t, sem_b, (((2,), (1,)), ((0,), (0,))),
                              preferred_element_type=f32))               # (B,T,S)
    cinp = lax.dot_general(dx, sem_b, (((2,), (1,)), ((0,), (0,))),
                           preferred_element_type=f32)                   # (B,T,S)

    finp = jnp.concatenate([sem_b, pinp, cinp], axis=-1).reshape(BT, 3 * Sd)
    feat = jnp.maximum(
        jnp.dot(finp, wfz_ref[...], preferred_element_type=f32)
        + bfz_ref[...], 0.0)                                             # (BT, S)

    # ---- decoder: lane-padded hidden2tag + masked mean NLL ----
    logits = (jnp.dot(feat, wdec_ref[...], preferred_element_type=f32)
              + bdec_ref[...])                                           # (BT, 128)
    mx = jnp.max(logits, axis=-1, keepdims=True)
    lse = mx + jnp.log(jnp.sum(jnp.exp(logits - mx), axis=-1, keepdims=True))
    logp = logits - lse
    classes = lax.broadcasted_iota(jnp.int32, logits.shape, 1)
    onehot = (classes == tags_ref[...]).astype(f32)                      # (BT, 128)
    gold = jnp.sum(logp * onehot, axis=-1, keepdims=True)                # (BT, 1)
    msk = mask_ref[...]
    score_ref[...] = (jnp.sum(-gold * msk, keepdims=True)
                      * recip(jnp.sum(msk, keepdims=True)))


# ----------------------------- wrapper ---------------------------------------
def bilstm_str_forward(kp, words, tags, verbs, caps, wordslen, tagsmask):
    """Whole BiLSTM_STR forward as ONE fused Pallas call (returns scalar NLL)."""
    del wordslen  # TODO(synk): variable-length handling (see header)
    B, T = words.shape
    BT = B * T
    # NOTE: when scaling B/T, tile the O(B*T^2) attention intermediates over a
    # B grid ("parallel") and re-derive the VMEM budget (64 MiB on v7x).
    args = (
        words.reshape(BT, 1).astype(jnp.int32),
        verbs.reshape(BT, 1).astype(jnp.int32),
        caps.reshape(BT, 1).astype(jnp.int32),
        kp["word_emb"], kp["verb_emb"], kp["cap_emb"],
        kp["wih_cat"], kp["bih_cat"], kp["whh_blk"],
        kp["w_tp"], kp["b_tp"], kp["w_tc"], kp["b_tc"],
        kp["w_bi"], kp["w_fi"], kp["exparam"], kp["w_fz"], kp["b_fz"],
        kp["w_dec_pad"], kp["b_dec_pad"],
        tags.reshape(BT, 1).astype(jnp.int32),
        tagsmask.reshape(BT, 1).astype(jnp.float32),
    )
    score = pl.pallas_call(
        functools.partial(_bilstm_str_kernel, HIDDEN, ATT, T),
        out_shape=jax.ShapeDtypeStruct((1, 1), jnp.float32),
        in_specs=[_vmem_spec() for _ in args],
        out_specs=_vmem_spec(),
    )(*args)
    return score[0, 0]


# ----------------------------- params / main ---------------------------------
def _uni(key, shape, scale):
    return jax.random.uniform(key, shape, jnp.float32, -scale, scale)


def init_params(key):
    ks = jax.random.split(key, 20)
    emb_s = lambda d: (3.0 / d) ** 0.5
    return {
        "word_emb": _uni(ks[0], (WORD_VOCAB, WORD_EMB), emb_s(WORD_EMB)),
        "verb_emb": _uni(ks[1], (VERB_IN, VERB_EMB), emb_s(VERB_EMB)),
        "cap_emb": _uni(ks[2], (CAP_IN, CAP_EMB), emb_s(CAP_EMB)),
        # BiLSTM (gate order i,f,g,o; combined bias)
        "wih_f": _uni(ks[3], (DIN, 4 * HIDDEN), 0.1),
        "whh_f": _uni(ks[4], (HIDDEN, 4 * HIDDEN), 0.1),
        "b_f": _uni(ks[5], (1, 4 * HIDDEN), 0.1),
        "wih_b": _uni(ks[6], (DIN, 4 * HIDDEN), 0.1),
        "whh_b": _uni(ks[7], (HIDDEN, 4 * HIDDEN), 0.1),
        "b_b": _uni(ks[8], (1, 4 * HIDDEN), 0.1),
        # structured attention
        "w_tp": _uni(ks[9], (R, R), 0.2),
        "b_tp": _uni(ks[10], (1, R), 0.2),
        "w_tc": _uni(ks[11], (R, R), 0.2),
        "b_tc": _uni(ks[12], (1, R), 0.2),
        "w_bi": _uni(ks[13], (R, R), 0.2),
        "w_fi": _uni(ks[14], (1, R), 0.2),
        "exparam": _uni(ks[15], (1, S), 0.2),
        "w_fz": _uni(ks[16], (3 * S, S), 0.1),
        "b_fz": _uni(ks[17], (1, S), 0.1),
        # decoder
        "w_dec": _uni(ks[18], (S, NTAGS), 0.2),
        "b_dec": _uni(ks[19], (1, NTAGS), 0.2),
    }


def prep_params(p):
    """Build kernel-ready derived weights ONCE, outside the jitted forward."""
    zh = jnp.zeros((HIDDEN, 4 * HIDDEN), jnp.float32)
    return {
        "word_emb": p["word_emb"], "verb_emb": p["verb_emb"],
        "cap_emb": p["cap_emb"],
        # [W_ih_fwd | W_ih_bwd], [b_fwd | b_bwd]
        "wih_cat": jnp.concatenate([p["wih_f"], p["wih_b"]], axis=1),
        "bih_cat": jnp.concatenate([p["b_f"], p["b_b"]], axis=1),
        # block-diag recurrent weights: [hf|hb] @ blk = [hf@Whh_f | hb@Whh_b]
        "whh_blk": jnp.concatenate(
            [jnp.concatenate([p["whh_f"], zh], axis=1),
             jnp.concatenate([zh, p["whh_b"]], axis=1)], axis=0),
        "w_tp": p["w_tp"], "b_tp": p["b_tp"],
        "w_tc": p["w_tc"], "b_tc": p["b_tc"],
        "w_bi": p["w_bi"], "w_fi": p["w_fi"], "exparam": p["exparam"],
        "w_fz": p["w_fz"], "b_fz": p["b_fz"],
        # decoder padded to 128 lanes: zero weights, -1e30 bias (padded
        # classes contribute 0 to the softmax and are never the gold tag).
        "w_dec_pad": jnp.concatenate(
            [p["w_dec"], jnp.zeros((S, DEC_PAD - NTAGS), jnp.float32)], axis=1),
        "b_dec_pad": jnp.concatenate(
            [p["b_dec"], jnp.full((1, DEC_PAD - NTAGS), -1e30, jnp.float32)],
            axis=1),
    }


if __name__ == "__main__":
    B, T = 2, 8
    key = jax.random.PRNGKey(0)
    kp, kw, kv, kc, kt = jax.random.split(key, 5)

    params = prep_params(init_params(kp))
    words = jax.random.randint(kw, (B, T), 0, WORD_VOCAB, dtype=jnp.int32)
    verbs = jax.random.randint(kv, (B, T), 0, VERB_IN, dtype=jnp.int32)
    caps = jax.random.randint(kc, (B, T), 0, CAP_IN, dtype=jnp.int32)
    tags = jax.random.randint(kt, (B, T), 0, NTAGS, dtype=jnp.int32)
    wordslen = jnp.full((B,), T, dtype=jnp.int32)      # full-length sequences
    tagsmask = jnp.ones((B, T), dtype=jnp.float32)

    fwd = jax.jit(bilstm_str_forward)
    score = fwd(params, words, tags, verbs, caps, wordslen, tagsmask)
    score = jax.block_until_ready(score)
    assert bool(jnp.isfinite(score)), "non-finite score"
    print("KERNEL_OK")
</pallas_src>

<mosaic_0001>
module attributes {stable_mosaic.version = 11 : i64} {
  func.func @_bilstm_str_kernel(%arg0: memref<16x1xi32, #tpu.memory_space<vmem>>, %arg1: memref<16x1xi32, #tpu.memory_space<vmem>>, %arg2: memref<16x1xi32, #tpu.memory_space<vmem>>, %arg3: memref<50x16xf32, #tpu.memory_space<vmem>>, %arg4: memref<2x4xf32, #tpu.memory_space<vmem>>, %arg5: memref<4x4xf32, #tpu.memory_space<vmem>>, %arg6: memref<24x256xf32, #tpu.memory_space<vmem>>, %arg7: memref<1x256xf32, #tpu.memory_space<vmem>>, %arg8: memref<64x256xf32, #tpu.memory_space<vmem>>, %arg9: memref<16x16xf32, #tpu.memory_space<vmem>>, %arg10: memref<1x16xf32, #tpu.memory_space<vmem>>, %arg11: memref<16x16xf32, #tpu.memory_space<vmem>>, %arg12: memref<1x16xf32, #tpu.memory_space<vmem>>, %arg13: memref<16x16xf32, #tpu.memory_space<vmem>>, %arg14: memref<1x16xf32, #tpu.memory_space<vmem>>, %arg15: memref<1x48xf32, #tpu.memory_space<vmem>>, %arg16: memref<144x48xf32, #tpu.memory_space<vmem>>, %arg17: memref<1x48xf32, #tpu.memory_space<vmem>>, %arg18: memref<48x128xf32, #tpu.memory_space<vmem>>, %arg19: memref<1x128xf32, #tpu.memory_space<vmem>>, %arg20: memref<16x1xi32, #tpu.memory_space<vmem>>, %arg21: memref<16x1xf32, #tpu.memory_space<vmem>>, %arg22: memref<1x1xf32, #tpu.memory_space<vmem>>) attributes {dimension_semantics = [], scalar_prefetch = 0 : i64, scratch_operands = 0 : i64, tpu.core_type = #tpu.core_type<tc>} {
    %0 = tpu.iota {dimensions = array<i32: 1>} : vector<16x50xi32>
    %c0 = arith.constant 0 : index
    %c0_0 = arith.constant 0 : index
    %1 = vector.load %arg0[%c0, %c0_0] : memref<16x1xi32, #tpu.memory_space<vmem>>, vector<16x1xi32>
    %2 = vector.broadcast %1 : vector<16x1xi32> to vector<16x50xi32>
    %3 = arith.cmpi eq, %0, %2 : vector<16x50xi32>
    %4 = arith.extui %3 : vector<16x50xi1> to vector<16x50xi32>
    %5 = arith.sitofp %4 : vector<16x50xi32> to vector<16x50xf32>
    %c0_1 = arith.constant 0 : index
    %c0_2 = arith.constant 0 : index
    %6 = vector.load %arg3[%c0_1, %c0_2] : memref<50x16xf32, #tpu.memory_space<vmem>>, vector<50x16xf32>
    %cst = arith.constant dense<0.000000e+00> : vector<16x16xf32>
    %7 = tpu.matmul %5, %6, %cst {dimension_numbers = #tpu.dot_dimension_numbers<[1], [0], [0], [1], [0, 0, 1, 1], [], []>} : vector<16x50xf32>, vector<50x16xf32>, vector<16x16xf32> -> vector<16x16xf32>
    %8 = tpu.iota {dimensions = array<i32: 1>} : vector<16x2xi32>
    %c0_3 = arith.constant 0 : index
    %c0_4 = arith.constant 0 : index
    %9 = vector.load %arg1[%c0_3, %c0_4] : memref<16x1xi32, #tpu.memory_space<vmem>>, vector<16x1xi32>
    %10 = vector.broadcast %9 : vector<16x1xi32> to vector<16x2xi32>
    %11 = arith.cmpi eq, %8, %10 : vector<16x2xi32>
    %12 = arith.extui %11 : vector<16x2xi1> to vector<16x2xi32>
    %13 = arith.sitofp %12 : vector<16x2xi32> to vector<16x2xf32>
    %c0_5 = arith.constant 0 : index
    %c0_6 = arith.constant 0 : index
    %14 = vector.load %arg4[%c0_5, %c0_6] : memref<2x4xf32, #tpu.memory_space<vmem>>, vector<2x4xf32>
    %cst_7 = arith.constant dense<0.000000e+00> : vector<16x4xf32>
    %15 = tpu.matmul %13, %14, %cst_7 {dimension_numbers = #tpu.dot_dimension_numbers<[1], [0], [0], [1], [0, 0, 1, 1], [], []>} : vector<16x2xf32>, vector<2x4xf32>, vector<16x4xf32> -> vector<16x4xf32>
    %16 = tpu.iota {dimensions = array<i32: 1>} : vector<16x4xi32>
    %c0_8 = arith.constant 0 : index
    %c0_9 = arith.constant 0 : index
    %17 = vector.load %arg2[%c0_8, %c0_9] : memref<16x1xi32, #tpu.memory_space<vmem>>, vector<16x1xi32>
    %18 = vector.broadcast %17 : vector<16x1xi32> to vector<16x4xi32>
    %19 = arith.cmpi eq, %16, %18 : vector<16x4xi32>
    %20 = arith.extui %19 : vector<16x4xi1> to vector<16x4xi32>
    %21 = arith.sitofp %20 : vector<16x4xi32> to vector<16x4xf32>
    %c0_10 = arith.constant 0 : index
    %c0_11 = arith.constant 0 : index
    %22 = vector.load %arg5[%c0_10, %c0_11] : memref<4x4xf32, #tpu.memory_space<vmem>>, vector<4x4xf32>
    %cst_12 = arith.constant dense<0.000000e+00> : vector<16x4xf32>
    %23 = tpu.matmul %21, %22, %cst_12 {dimension_numbers = #tpu.dot_dimension_numbers<[1], [0], [0], [1], [0, 0, 1, 1], [], []>} : vector<16x4xf32>, vector<4x4xf32>, vector<16x4xf32> -> vector<16x4xf32>
    %24 = tpu.concatenate %7, %15, %23 in 1 : vector<16x16xf32>, vector<16x4xf32>, vector<16x4xf32> -> vector<16x24xf32>
    %c0_13 = arith.constant 0 : index
    %c0_14 = arith.constant 0 : index
    %25 = vector.load %arg6[%c0_13, %c0_14] : memref<24x256xf32, #tpu.memory_space<vmem>>, vector<24x256xf32>
    %cst_15 = arith.constant dense<0.000000e+00> : vector<16x256xf32>
    %26 = tpu.matmul %24, %25, %cst_15 {dimension_numbers = #tpu.dot_dimension_numbers<[1], [0], [0], [1], [0, 0, 1, 1], [], []>} : vector<16x24xf32>, vector<24x256xf32>, vector<16x256xf32> -> vector<16x256xf32>
    %c0_16 = arith.constant 0 : index
    %c0_17 = arith.constant 0 : index
    %27 = vector.load %arg7[%c0_16, %c0_17] : memref<1x256xf32, #tpu.memory_space<vmem>>, vector<1x256xf32>
    %28 = vector.broadcast %27 : vector<1x256xf32> to vector<16x256xf32>
    %29 = arith.addf %26, %28 : vector<16x256xf32>
    %30 = vector.shape_cast %29 : vector<16x256xf32> to vector<2x8x256xf32>
    %c0_18 = arith.constant 0 : index
    %c0_19 = arith.constant 0 : index
    %31 = vector.load %arg8[%c0_18, %c0_19] : memref<64x256xf32, #tpu.memory_space<vmem>>, vector<64x256xf32>
    %cst_20 = arith.constant 0.000000e+00 : f32
    %32 = vector.broadcast %cst_20 : f32 to vector<2x32xf32>
    %33 = tpu.concatenate %32, %32 in 1 : vector<2x32xf32>, vector<2x32xf32> -> vector<2x64xf32>
    %cst_21 = arith.constant dense<0.000000e+00> : vector<2x256xf32>
    %34 = tpu.matmul %33, %31, %cst_21 {dimension_numbers = #tpu.dot_dimension_numbers<[1], [0], [0], [1], [0, 0, 1, 1], [], []>} : vector<2x64xf32>, vector<64x256xf32>, vector<2x256xf32> -> vector<2x256xf32>
    %35 = vector.extract_strided_slice %30 {offsets = [0, 0, 0], sizes = [2, 1, 128], strides = [1, 1, 1]} : vector<2x8x256xf32> to vector<2x1x128xf32>
    %36 = vector.shape_cast %35 : vector<2x1x128xf32> to vector<2x128xf32>
    %37 = vector.extract_strided_slice %34 {offsets = [0, 0], sizes = [2, 128], strides = [1, 1]} : vector<2x256xf32> to vector<2x128xf32>
    %38 = arith.addf %36, %37 : vector<2x128xf32>
    %39 = vector.extract_strided_slice %38 {offsets = [0, 0], sizes = [2, 32], strides = [1, 1]} : vector<2x128xf32> to vector<2x32xf32>
    %cst_22 = arith.constant 5.000000e-01 : f32
    %40 = vector.broadcast %cst_22 : f32 to vector<2x32xf32>
    %41 = arith.mulf %40, %39 : vector<2x32xf32>
    %42 = math.tanh %41 : vector<2x32xf32>
    %cst_23 = arith.constant 1.000000e+00 : f32
    %43 = vector.broadcast %cst_23 : f32 to vector<2x32xf32>
    %44 = arith.addf %42, %43 : vector<2x32xf32>
    %cst_24 = arith.constant 5.000000e-01 : f32
    %45 = vector.broadcast %cst_24 : f32 to vector<2x32xf32>
    %46 = arith.mulf %45, %44 : vector<2x32xf32>
    %47 = vector.extract_strided_slice %38 {offsets = [0, 32], sizes = [2, 32], strides = [1, 1]} : vector<2x128xf32> to vector<2x32xf32>
    %cst_25 = arith.constant 5.000000e-01 : f32
    %48 = vector.broadcast %cst_25 : f32 to vector<2x32xf32>
    %49 = arith.mulf %48, %47 : vector<2x32xf32>
    %50 = math.tanh %49 : vector<2x32xf32>
    %cst_26 = arith.constant 1.000000e+00 : f32
    %51 = vector.broadcast %cst_26 : f32 to vector<2x32xf32>
    %52 = arith.addf %50, %51 : vector<2x32xf32>
    %cst_27 = arith.constant 5.000000e-01 : f32
    %53 = vector.broadcast %cst_27 : f32 to vector<2x32xf32>
    %54 = arith.mulf %53, %52 : vector<2x32xf32>
    %55 = vector.extract_strided_slice %38 {offsets = [0, 64], sizes = [2, 32], strides = [1, 1]} : vector<2x128xf32> to vector<2x32xf32>
    %56 = math.tanh %55 : vector<2x32xf32>
    %57 = vector.extract_strided_slice %38 {offsets = [0, 96], sizes = [2, 32], strides = [1, 1]} : vector<2x128xf32> to vector<2x32xf32>
    %cst_28 = arith.constant 5.000000e-01 : f32
    %58 = vector.broadcast %cst_28 : f32 to vector<2x32xf32>
    %59 = arith.mulf %58, %57 : vector<2x32xf32>
    %60 = math.tanh %59 : vector<2x32xf32>
    %cst_29 = arith.constant 1.000000e+00 : f32
    %61 = vector.broadcast %cst_29 : f32 to vector<2x32xf32>
    %62 = arith.addf %60, %61 : vector<2x32xf32>
    %cst_30 = arith.constant 5.000000e-01 : f32
    %63 = vector.broadcast %cst_30 : f32 to vector<2x32xf32>
    %64 = arith.mulf %63, %62 : vector<2x32xf32>
    %65 = vector.extract_strided_slice %30 {offsets = [0, 7, 128], sizes = [2, 1, 128], strides = [1, 1, 1]} : vector<2x8x256xf32> to vector<2x1x128xf32>
    %66 = vector.shape_cast %65 : vector<2x1x128xf32> to vector<2x128xf32>
    %67 = vector.extract_strided_slice %34 {offsets = [0, 128], sizes = [2, 128], strides = [1, 1]} : vector<2x256xf32> to vector<2x128xf32>
    %68 = arith.addf %66, %67 : vector<2x128xf32>
    %69 = vector.extract_strided_slice %68 {offsets = [0, 0], sizes = [2, 32], strides = [1, 1]} : vector<2x128xf32> to vector<2x32xf32>
    %cst_31 = arith.constant 5.000000e-01 : f32
    %70 = vector.broadcast %cst_31 : f32 to vector<2x32xf32>
    %71 = arith.mulf %70, %69 : vector<2x32xf32>
    %72 = math.tanh %71 : vector<2x32xf32>
    %cst_32 = arith.constant 1.000000e+00 : f32
    %73 = vector.broadcast %cst_32 : f32 to vector<2x32xf32>
    %74 = arith.addf %72, %73 : vector<2x32xf32>
    %cst_33 = arith.constant 5.000000e-01 : f32
    %75 = vector.broadcast %cst_33 : f32 to vector<2x32xf32>
    %76 = arith.mulf %75, %74 : vector<2x32xf32>
    %77 = vector.extract_strided_slice %68 {offsets = [0, 32], sizes = [2, 32], strides = [1, 1]} : vector<2x128xf32> to vector<2x32xf32>
    %cst_34 = arith.constant 5.000000e-01 : f32
    %78 = vector.broadcast %cst_34 : f32 to vector<2x32xf32>
    %79 = arith.mulf %78, %77 : vector<2x32xf32>
    %80 = math.tanh %79 : vector<2x32xf32>
    %cst_35 = arith.constant 1.000000e+00 : f32
    %81 = vector.broadcast %cst_35 : f32 to vector<2x32xf32>
    %82 = arith.addf %80, %81 : vector<2x32xf32>
    %cst_36 = arith.constant 5.000000e-01 : f32
    %83 = vector.broadcast %cst_36 : f32 to vector<2x32xf32>
    %84 = arith.mulf %83, %82 : vector<2x32xf32>
    %85 = vector.extract_strided_slice %68 {offsets = [0, 64], sizes = [2, 32], strides = [1, 1]} : vector<2x128xf32> to vector<2x32xf32>
    %86 = math.tanh %85 : vector<2x32xf32>
    %87 = vector.extract_strided_slice %68 {offsets = [0, 96], sizes = [2, 32], strides = [1, 1]} : vector<2x128xf32> to vector<2x32xf32>
    %cst_37 = arith.constant 5.000000e-01 : f32
    %88 = vector.broadcast %cst_37 : f32 to vector<2x32xf32>
    %89 = arith.mulf %88, %87 : vector<2x32xf32>
    %90 = math.tanh %89 : vector<2x32xf32>
    %cst_38 = arith.constant 1.000000e+00 : f32
    %91 = vector.broadcast %cst_38 : f32 to vector<2x32xf32>
    %92 = arith.addf %90, %91 : vector<2x32xf32>
    %cst_39 = arith.constant 5.000000e-01 : f32
    %93 = vector.broadcast %cst_39 : f32 to vector<2x32xf32>
    %94 = arith.mulf %93, %92 : vector<2x32xf32>
    %95 = arith.mulf %54, %32 : vector<2x32xf32>
    %96 = arith.mulf %46, %56 : vector<2x32xf32>
    %97 = arith.addf %95, %96 : vector<2x32xf32>
    %98 = math.tanh %97 : vector<2x32xf32>
    %99 = arith.mulf %64, %98 : vector<2x32xf32>
    %100 = arith.mulf %84, %32 : vector<2x32xf32>
    %101 = arith.mulf %76, %86 : vector<2x32xf32>
    %102 = arith.addf %100, %101 : vector<2x32xf32>
    %103 = math.tanh %102 : vector<2x32xf32>
    %104 = arith.mulf %94, %103 : vector<2x32xf32>
    %105 = tpu.concatenate %99, %104 in 1 : vector<2x32xf32>, vector<2x32xf32> -> vector<2x64xf32>
    %cst_40 = arith.constant dense<0.000000e+00> : vector<2x256xf32>
    %106 = tpu.matmul %105, %31, %cst_40 {dimension_numbers = #tpu.dot_dimension_numbers<[1], [0], [0], [1], [0, 0, 1, 1], [], []>} : vector<2x64xf32>, vector<64x256xf32>, vector<2x256xf32> -> vector<2x256xf32>
    %107 = vector.extract_strided_slice %30 {offsets = [0, 1, 0], sizes = [2, 1, 128], strides = [1, 1, 1]} : vector<2x8x256xf32> to vector<2x1x128xf32>
    %108 = vector.shape_cast %107 : vector<2x1x128xf32> to vector<2x128xf32>
    %109 = vector.extract_strided_slice %106 {offsets = [0, 0], sizes = [2, 128], strides = [1, 1]} : vector<2x256xf32> to vector<2x128xf32>
    %110 = arith.addf %108, %109 : vector<2x128xf32>
    %111 = vector.extract_strided_slice %110 {offsets = [0, 0], sizes = [2, 32], strides = [1, 1]} : vector<2x128xf32> to vector<2x32xf32>
    %cst_41 = arith.constant 5.000000e-01 : f32
    %112 = vector.broadcast %cst_41 : f32 to vector<2x32xf32>
    %113 = arith.mulf %112, %111 : vector<2x32xf32>
    %114 = math.tanh %113 : vector<2x32xf32>
    %cst_42 = arith.constant 1.000000e+00 : f32
    %115 = vector.broadcast %cst_42 : f32 to vector<2x32xf32>
    %116 = arith.addf %114, %115 : vector<2x32xf32>
    %cst_43 = arith.constant 5.000000e-01 : f32
    %117 = vector.broadcast %cst_43 : f32 to vector<2x32xf32>
    %118 = arith.mulf %117, %116 : vector<2x32xf32>
    %119 = vector.extract_strided_slice %110 {offsets = [0, 32], sizes = [2, 32], strides = [1, 1]} : vector<2x128xf32> to vector<2x32xf32>
    %cst_44 = arith.constant 5.000000e-01 : f32
    %120 = vector.broadcast %cst_44 : f32 to vector<2x32xf32>
    %121 = arith.mulf %120, %119 : vector<2x32xf32>
    %122 = math.tanh %121 : vector<2x32xf32>
    %cst_45 = arith.constant 1.000000e+00 : f32
    %123 = vector.broadcast %cst_45 : f32 to vector<2x32xf32>
    %124 = arith.addf %122, %123 : vector<2x32xf32>
    %cst_46 = arith.constant 5.000000e-01 : f32
    %125 = vector.broadcast %cst_46 : f32 to vector<2x32xf32>
    %126 = arith.mulf %125, %124 : vector<2x32xf32>
    %127 = vector.extract_strided_slice %110 {offsets = [0, 64], sizes = [2, 32], strides = [1, 1]} : vector<2x128xf32> to vector<2x32xf32>
    %128 = math.tanh %127 : vector<2x32xf32>
    %129 = vector.extract_strided_slice %110 {offsets = [0, 96], sizes = [2, 32], strides = [1, 1]} : vector<2x128xf32> to vector<2x32xf32>
    %cst_47 = arith.constant 5.000000e-01 : f32
    %130 = vector.broadcast %cst_47 : f32 to vector<2x32xf32>
    %131 = arith.mulf %130, %129 : vector<2x32xf32>
    %132 = math.tanh %131 : vector<2x32xf32>
    %cst_48 = arith.constant 1.000000e+00 : f32
    %133 = vector.broadcast %cst_48 : f32 to vector<2x32xf32>
    %134 = arith.addf %132, %133 : vector<2x32xf32>
    %cst_49 = arith.constant 5.000000e-01 : f32
    %135 = vector.broadcast %cst_49 : f32 to vector<2x32xf32>
    %136 = arith.mulf %135, %134 : vector<2x32xf32>
    %137 = vector.extract_strided_slice %30 {offsets = [0, 6, 128], sizes = [2, 1, 128], strides = [1, 1, 1]} : vector<2x8x256xf32> to vector<2x1x128xf32>
    %138 = vector.shape_cast %137 : vector<2x1x128xf32> to vector<2x128xf32>
    %139 = vector.extract_strided_slice %106 {offsets = [0, 128], sizes = [2, 128], strides = [1, 1]} : vector<2x256xf32> to vector<2x128xf32>
    %140 = arith.addf %138, %139 : vector<2x128xf32>
    %141 = vector.extract_strided_slice %140 {offsets = [0, 0], sizes = [2, 32], strides = [1, 1]} : vector<2x128xf32> to vector<2x32xf32>
    %cst_50 = arith.constant 5.000000e-01 : f32
    %142 = vector.broadcast %cst_50 : f32 to vector<2x32xf32>
    %143 = arith.mulf %142, %141 : vector<2x32xf32>
    %144 = math.tanh %143 : vector<2x32xf32>
    %cst_51 = arith.constant 1.000000e+00 : f32
    %145 = vector.broadcast %cst_51 : f32 to vector<2x32xf32>
    %146 = arith.addf %144, %145 : vector<2x32xf32>
    %cst_52 = arith.constant 5.000000e-01 : f32
    %147 = vector.broadcast %cst_52 : f32 to vector<2x32xf32>
    %148 = arith.mulf %147, %146 : vector<2x32xf32>
    %149 = vector.extract_strided_slice %140 {offsets = [0, 32], sizes = [2, 32], strides = [1, 1]} : vector<2x128xf32> to vector<2x32xf32>
    %cst_53 = arith.constant 5.000000e-01 : f32
    %150 = vector.broadcast %cst_53 : f32 to vector<2x32xf32>
    %151 = arith.mulf %150, %149 : vector<2x32xf32>
    %152 = math.tanh %151 : vector<2x32xf32>
    %cst_54 = arith.constant 1.000000e+00 : f32
    %153 = vector.broadcast %cst_54 : f32 to vector<2x32xf32>
    %154 = arith.addf %152, %153 : vector<2x32xf32>
    %cst_55 = arith.constant 5.000000e-01 : f32
    %155 = vector.broadcast %cst_55 : f32 to vector<2x32xf32>
    %156 = arith.mulf %155, %154 : vector<2x32xf32>
    %157 = vector.extract_strided_slice %140 {offsets = [0, 64], sizes = [2, 32], strides = [1, 1]} : vector<2x128xf32> to vector<2x32xf32>
    %158 = math.tanh %157 : vector<2x32xf32>
    %159 = vector.extract_strided_slice %140 {offsets = [0, 96], sizes = [2, 32], strides = [1, 1]} : vector<2x128xf32> to vector<2x32xf32>
    %cst_56 = arith.constant 5.000000e-01 : f32
    %160 = vector.broadcast %cst_56 : f32 to vector<2x32xf32>
    %161 = arith.mulf %160, %159 : vector<2x32xf32>
    %162 = math.tanh %161 : vector<2x32xf32>
    %cst_57 = arith.constant 1.000000e+00 : f32
    %163 = vector.broadcast %cst_57 : f32 to vector<2x32xf32>
    %164 = arith.addf %162, %163 : vector<2x32xf32>
    %cst_58 = arith.constant 5.000000e-01 : f32
    %165 = vector.broadcast %cst_58 : f32 to vector<2x32xf32>
    %166 = arith.mulf %165, %164 : vector<2x32xf32>
    %167 = arith.mulf %126, %97 : vector<2x32xf32>
    %168 = arith.mulf %118, %128 : vector<2x32xf32>
    %169 = arith.addf %167, %168 : vector<2x32xf32>
    %170 = math.tanh %169 : vector<2x32xf32>
    %171 = arith.mulf %136, %170 : vector<2x32xf32>
    %172 = arith.mulf %156, %102 : vector<2x32xf32>
    %173 = arith.mulf %148, %158 : vector<2x32xf32>
    %174 = arith.addf %172, %173 : vector<2x32xf32>
    %175 = math.tanh %174 : vector<2x32xf32>
    %176 = arith.mulf %166, %175 : vector<2x32xf32>
    %177 = tpu.concatenate %171, %176 in 1 : vector<2x32xf32>, vector<2x32xf32> -> vector<2x64xf32>
    %cst_59 = arith.constant dense<0.000000e+00> : vector<2x256xf32>
    %178 = tpu.matmul %177, %31, %cst_59 {dimension_numbers = #tpu.dot_dimension_numbers<[1], [0], [0], [1], [0, 0, 1, 1], [], []>} : vector<2x64xf32>, vector<64x256xf32>, vector<2x256xf32> -> vector<2x256xf32>
    %179 = vector.extract_strided_slice %30 {offsets = [0, 2, 0], sizes = [2, 1, 128], strides = [1, 1, 1]} : vector<2x8x256xf32> to vector<2x1x128xf32>
    %180 = vector.shape_cast %179 : vector<2x1x128xf32> to vector<2x128xf32>
    %181 = vector.extract_strided_slice %178 {offsets = [0, 0], sizes = [2, 128], strides = [1, 1]} : vector<2x256xf32> to vector<2x128xf32>
    %182 = arith.addf %180, %181 : vector<2x128xf32>
    %183 = vector.extract_strided_slice %182 {offsets = [0, 0], sizes = [2, 32], strides = [1, 1]} : vector<2x128xf32> to vector<2x32xf32>
    %cst_60 = arith.constant 5.000000e-01 : f32
    %184 = vector.broadcast %cst_60 : f32 to vector<2x32xf32>
    %185 = arith.mulf %184, %183 : vector<2x32xf32>
    %186 = math.tanh %185 : vector<2x32xf32>
    %cst_61 = arith.constant 1.000000e+00 : f32
    %187 = vector.broadcast %cst_61 : f32 to vector<2x32xf32>
    %188 = arith.addf %186, %187 : vector<2x32xf32>
    %cst_62 = arith.constant 5.000000e-01 : f32
    %189 = vector.broadcast %cst_62 : f32 to vector<2x32xf32>
    %190 = arith.mulf %189, %188 : vector<2x32xf32>
    %191 = vector.extract_strided_slice %182 {offsets = [0, 32], sizes = [2, 32], strides = [1, 1]} : vector<2x128xf32> to vector<2x32xf32>
    %cst_63 = arith.constant 5.000000e-01 : f32
    %192 = vector.broadcast %cst_63 : f32 to vector<2x32xf32>
    %193 = arith.mulf %192, %191 : vector<2x32xf32>
    %194 = math.tanh %193 : vector<2x32xf32>
    %cst_64 = arith.constant 1.000000e+00 : f32
    %195 = vector.broadcast %cst_64 : f32 to vector<2x32xf32>
    %196 = arith.addf %194, %195 : vector<2x32xf32>
    %cst_65 = arith.constant 5.000000e-01 : f32
    %197 = vector.broadcast %cst_65 : f32 to vector<2x32xf32>
    %198 = arith.mulf %197, %196 : vector<2x32xf32>
    %199 = vector.extract_strided_slice %182 {offsets = [0, 64], sizes = [2, 32], strides = [1, 1]} : vector<2x128xf32> to vector<2x32xf32>
    %200 = math.tanh %199 : vector<2x32xf32>
    %201 = vector.extract_strided_slice %182 {offsets = [0, 96], sizes = [2, 32], strides = [1, 1]} : vector<2x128xf32> to vector<2x32xf32>
    %cst_66 = arith.constant 5.000000e-01 : f32
    %202 = vector.broadcast %cst_66 : f32 to vector<2x32xf32>
    %203 = arith.mulf %202, %201 : vector<2x32xf32>
    %204 = math.tanh %203 : vector<2x32xf32>
    %cst_67 = arith.constant 1.000000e+00 : f32
    %205 = vector.broadcast %cst_67 : f32 to vector<2x32xf32>
    %206 = arith.addf %204, %205 : vector<2x32xf32>
    %cst_68 = arith.constant 5.000000e-01 : f32
    %207 = vector.broadcast %cst_68 : f32 to vector<2x32xf32>
    %208 = arith.mulf %207, %206 : vector<2x32xf32>
    %209 = vector.extract_strided_slice %30 {offsets = [0, 5, 128], sizes = [2, 1, 128], strides = [1, 1, 1]} : vector<2x8x256xf32> to vector<2x1x128xf32>
    %210 = vector.shape_cast %209 : vector<2x1x128xf32> to vector<2x128xf32>
    %211 = vector.extract_strided_slice %178 {offsets = [0, 128], sizes = [2, 128], strides = [1, 1]} : vector<2x256xf32> to vector<2x128xf32>
    %212 = arith.addf %210, %211 : vector<2x128xf32>
    %213 = vector.extract_strided_slice %212 {offsets = [0, 0], sizes = [2, 32], strides = [1, 1]} : vector<2x128xf32> to vector<2x32xf32>
    %cst_69 = arith.constant 5.000000e-01 : f32
    %214 = vector.broadcast %cst_69 : f32 to vector<2x32xf32>
    %215 = arith.mulf %214, %213 : vector<2x32xf32>
    %216 = math.tanh %215 : vector<2x32xf32>
    %cst_70 = arith.constant 1.000000e+00 : f32
    %217 = vector.broadcast %cst_70 : f32 to vector<2x32xf32>
    %218 = arith.addf %216, %217 : vector<2x32xf32>
    %cst_71 = arith.constant 5.000000e-01 : f32
    %219 = vector.broadcast %cst_71 : f32 to vector<2x32xf32>
    %220 = arith.mulf %219, %218 : vector<2x32xf32>
    %221 = vector.extract_strided_slice %212 {offsets = [0, 32], sizes = [2, 32], strides = [1, 1]} : vector<2x128xf32> to vector<2x32xf32>
    %cst_72 = arith.constant 5.000000e-01 : f32
    %222 = vector.broadcast %cst_72 : f32 to vector<2x32xf32>
    %223 = arith.mulf %222, %221 : vector<2x32xf32>
    %224 = math.tanh %223 : vector<2x32xf32>
    %cst_73 = arith.constant 1.000000e+00 : f32
    %225 = vector.broadcast %cst_73 : f32 to vector<2x32xf32>
    %226 = arith.addf %224, %225 : vector<2x32xf32>
    %cst_74 = arith.constant 5.000000e-01 : f32
    %227 = vector.broadcast %cst_74 : f32 to vector<2x32xf32>
    %228 = arith.mulf %227, %226 : vector<2x32xf32>
    %229 = vector.extract_strided_slice %212 {offsets = [0, 64], sizes = [2, 32], strides = [1, 1]} : vector<2x128xf32> to vector<2x32xf32>
    %230 = math.tanh %229 : vector<2x32xf32>
    %231 = vector.extract_strided_slice %212 {offsets = [0, 96], sizes = [2, 32], strides = [1, 1]} : vector<2x128xf32> to vector<2x32xf32>
    %cst_75 = arith.constant 5.000000e-01 : f32
    %232 = vector.broadcast %cst_75 : f32 to vector<2x32xf32>
    %233 = arith.mulf %232, %231 : vector<2x32xf32>
    %234 = math.tanh %233 : vector<2x32xf32>
    %cst_76 = arith.constant 1.000000e+00 : f32
    %235 = vector.broadcast %cst_76 : f32 to vector<2x32xf32>
    %236 = arith.addf %234, %235 : vector<2x32xf32>
    %cst_77 = arith.constant 5.000000e-01 : f32
    %237 = vector.broadcast %cst_77 : f32 to vector<2x32xf32>
    %238 = arith.mulf %237, %236 : vector<2x32xf32>
    %239 = arith.mulf %198, %169 : vector<2x32xf32>
    %240 = arith.mulf %190, %200 : vector<2x32xf32>
    %241 = arith.addf %239, %240 : vector<2x32xf32>
    %242 = math.tanh %241 : vector<2x32xf32>
    %243 = arith.mulf %208, %242 : vector<2x32xf32>
    %244 = arith.mulf %228, %174 : vector<2x32xf32>
    %245 = arith.mulf %220, %230 : vector<2x32xf32>
    %246 = arith.addf %244, %245 : vector<2x32xf32>
    %247 = math.tanh %246 : vector<2x32xf32>
    %248 = arith.mulf %238, %247 : vector<2x32xf32>
    %249 = tpu.concatenate %243, %248 in 1 : vector<2x32xf32>, vector<2x32xf32> -> vector<2x64xf32>
    %cst_78 = arith.constant dense<0.000000e+00> : vector<2x256xf32>
    %250 = tpu.matmul %249, %31, %cst_78 {dimension_numbers = #tpu.dot_dimension_numbers<[1], [0], [0], [1], [0, 0, 1, 1], [], []>} : vector<2x64xf32>, vector<64x256xf32>, vector<2x256xf32> -> vector<2x256xf32>
    %251 = vector.extract_strided_slice %30 {offsets = [0, 3, 0], sizes = [2, 1, 128], strides = [1, 1, 1]} : vector<2x8x256xf32> to vector<2x1x128xf32>
    %252 = vector.shape_cast %251 : vector<2x1x128xf32> to vector<2x128xf32>
    %253 = vector.extract_strided_slice %250 {offsets = [0, 0], sizes = [2, 128], strides = [1, 1]} : vector<2x256xf32> to vector<2x128xf32>
    %254 = arith.addf %252, %253 : vector<2x128xf32>
    %255 = vector.extract_strided_slice %254 {offsets = [0, 0], sizes = [2, 32], strides = [1, 1]} : vector<2x128xf32> to vector<2x32xf32>
    %cst_79 = arith.constant 5.000000e-01 : f32
    %256 = vector.broadcast %cst_79 : f32 to vector<2x32xf32>
    %257 = arith.mulf %256, %255 : vector<2x32xf32>
    %258 = math.tanh %257 : vector<2x32xf32>
    %cst_80 = arith.constant 1.000000e+00 : f32
    %259 = vector.broadcast %cst_80 : f32 to vector<2x32xf32>
    %260 = arith.addf %258, %259 : vector<2x32xf32>
    %cst_81 = arith.constant 5.000000e-01 : f32
    %261 = vector.broadcast %cst_81 : f32 to vector<2x32xf32>
    %262 = arith.mulf %261, %260 : vector<2x32xf32>
    %263 = vector.extract_strided_slice %254 {offsets = [0, 32], sizes = [2, 32], strides = [1, 1]} : vector<2x128xf32> to vector<2x32xf32>
    %cst_82 = arith.constant 5.000000e-01 : f32
    %264 = vector.broadcast %cst_82 : f32 to vector<2x32xf32>
    %265 = arith.mulf %264, %263 : vector<2x32xf32>
    %266 = math.tanh %265 : vector<2x32xf32>
    %cst_83 = arith.constant 1.000000e+00 : f32
    %267 = vector.broadcast %cst_83 : f32 to vector<2x32xf32>
    %268 = arith.addf %266, %267 : vector<2x32xf32>
    %cst_84 = arith.constant 5.000000e-01 : f32
    %269 = vector.broadcast %cst_84 : f32 to vector<2x32xf32>
    %270 = arith.mulf %269, %268 : vector<2x32xf32>
    %271 = vector.extract_strided_slice %254 {offsets = [0, 64], sizes = [2, 32], strides = [1, 1]} : vector<2x128xf32> to vector<2x32xf32>
    %272 = math.tanh %271 : vector<2x32xf32>
    %273 = vector.extract_strided_slice %254 {offsets = [0, 96], sizes = [2, 32], strides = [1, 1]} : vector<2x128xf32> to vector<2x32xf32>
    %cst_85 = arith.constant 5.000000e-01 : f32
    %274 = vector.broadcast %cst_85 : f32 to vector<2x32xf32>
    %275 = arith.mulf %274, %273 : vector<2x32xf32>
    %276 = math.tanh %275 : vector<2x32xf32>
    %cst_86 = arith.constant 1.000000e+00 : f32
    %277 = vector.broadcast %cst_86 : f32 to vector<2x32xf32>
    %278 = arith.addf %276, %277 : vector<2x32xf32>
    %cst_87 = arith.constant 5.000000e-01 : f32
    %279 = vector.broadcast %cst_87 : f32 to vector<2x32xf32>
    %280 = arith.mulf %279, %278 : vector<2x32xf32>
    %281 = vector.extract_strided_slice %30 {offsets = [0, 4, 128], sizes = [2, 1, 128], strides = [1, 1, 1]} : vector<2x8x256xf32> to vector<2x1x128xf32>
    %282 = vector.shape_cast %281 : vector<2x1x128xf32> to vector<2x128xf32>
    %283 = vector.extract_strided_slice %250 {offsets = [0, 128], sizes = [2, 128], strides = [1, 1]} : vector<2x256xf32> to vector<2x128xf32>
    %284 = arith.addf %282, %283 : vector<2x128xf32>
    %285 = vector.extract_strided_slice %284 {offsets = [0, 0], sizes = [2, 32], strides = [1, 1]} : vector<2x128xf32> to vector<2x32xf32>
    %cst_88 = arith.constant 5.000000e-01 : f32
    %286 = vector.broadcast %cst_88 : f32 to vector<2x32xf32>
    %287 = arith.mulf %286, %285 : vector<2x32xf32>
    %288 = math.tanh %287 : vector<2x32xf32>
    %cst_89 = arith.constant 1.000000e+00 : f32
    %289 = vector.broadcast %cst_89 : f32 to vector<2x32xf32>
    %290 = arith.addf %288, %289 : vector<2x32xf32>
    %cst_90 = arith.constant 5.000000e-01 : f32
    %291 = vector.broadcast %cst_90 : f32 to vector<2x32xf32>
    %292 = arith.mulf %291, %290 : vector<2x32xf32>
    %293 = vector.extract_strided_slice %284 {offsets = [0, 32], sizes = [2, 32], strides = [1, 1]} : vector<2x128xf32> to vector<2x32xf32>
    %cst_91 = arith.constant 5.000000e-01 : f32
    %294 = vector.broadcast %cst_91 : f32 to vector<2x32xf32>
    %295 = arith.mulf %294, %293 : vector<2x32xf32>
    %296 = math.tanh %295 : vector<2x32xf32>
    %cst_92 = arith.constant 1.000000e+00 : f32
    %297 = vector.broadcast %cst_92 : f32 to vector<2x32xf32>
    %298 = arith.addf %296, %297 : vector<2x32xf32>
    %cst_93 = arith.constant 5.000000e-01 : f32
    %299 = vector.broadcast %cst_93 : f32 to vector<2x32xf32>
    %300 = arith.mulf %299, %298 : vector<2x32xf32>
    %301 = vector.extract_strided_slice %284 {offsets = [0, 64], sizes = [2, 32], strides = [1, 1]} : vector<2x128xf32> to vector<2x32xf32>
    %302 = math.tanh %301 : vector<2x32xf32>
    %303 = vector.extract_strided_slice %284 {offsets = [0, 96], sizes = [2, 32], strides = [1, 1]} : vector<2x128xf32> to vector<2x32xf32>
    %cst_94 = arith.constant 5.000000e-01 : f32
    %304 = vector.broadcast %cst_94 : f32 to vector<2x32xf32>
    %305 = arith.mulf %304, %303 : vector<2x32xf32>
    %306 = math.tanh %305 : vector<2x32xf32>
    %cst_95 = arith.constant 1.000000e+00 : f32
    %307 = vector.broadcast %cst_95 : f32 to vector<2x32xf32>
    %308 = arith.addf %306, %307 : vector<2x32xf32>
    %cst_96 = arith.constant 5.000000e-01 : f32
    %309 = vector.broadcast %cst_96 : f32 to vector<2x32xf32>
    %310 = arith.mulf %309, %308 : vector<2x32xf32>
    %311 = arith.mulf %270, %241 : vector<2x32xf32>
    %312 = arith.mulf %262, %272 : vector<2x32xf32>
    %313 = arith.addf %311, %312 : vector<2x32xf32>
    %314 = math.tanh %313 : vector<2x32xf32>
    %315 = arith.mulf %280, %314 : vector<2x32xf32>
    %316 = arith.mulf %300, %246 : vector<2x32xf32>
    %317 = arith.mulf %292, %302 : vector<2x32xf32>
    %318 = arith.addf %316, %317 : vector<2x32xf32>
    %319 = math.tanh %318 : vector<2x32xf32>
    %320 = arith.mulf %310, %319 : vector<2x32xf32>
    %321 = tpu.concatenate %315, %320 in 1 : vector<2x32xf32>, vector<2x32xf32> -> vector<2x64xf32>
    %cst_97 = arith.constant dense<0.000000e+00> : vector<2x256xf32>
    %322 = tpu.matmul %321, %31, %cst_97 {dimension_numbers = #tpu.dot_dimension_numbers<[1], [0], [0], [1], [0, 0, 1, 1], [], []>} : vector<2x64xf32>, vector<64x256xf32>, vector<2x256xf32> -> vector<2x256xf32>
    %323 = vector.extract_strided_slice %30 {offsets = [0, 4, 0], sizes = [2, 1, 128], strides = [1, 1, 1]} : vector<2x8x256xf32> to vector<2x1x128xf32>
    %324 = vector.shape_cast %323 : vector<2x1x128xf32> to vector<2x128xf32>
    %325 = vector.extract_strided_slice %322 {offsets = [0, 0], sizes = [2, 128], strides = [1, 1]} : vector<2x256xf32> to vector<2x128xf32>
    %326 = arith.addf %324, %325 : vector<2x128xf32>
    %327 = vector.extract_strided_slice %326 {offsets = [0, 0], sizes = [2, 32], strides = [1, 1]} : vector<2x128xf32> to vector<2x32xf32>
    %cst_98 = arith.constant 5.000000e-01 : f32
    %328 = vector.broadcast %cst_98 : f32 to vector<2x32xf32>
    %329 = arith.mulf %328, %327 : vector<2x32xf32>
    %330 = math.tanh %329 : vector<2x32xf32>
    %cst_99 = arith.constant 1.000000e+00 : f32
    %331 = vector.broadcast %cst_99 : f32 to vector<2x32xf32>
    %332 = arith.addf %330, %331 : vector<2x32xf32>
    %cst_100 = arith.constant 5.000000e-01 : f32
    %333 = vector.broadcast %cst_100 : f32 to vector<2x32xf32>
    %334 = arith.mulf %333, %332 : vector<2x32xf32>
    %335 = vector.extract_strided_slice %326 {offsets = [0, 32], sizes = [2, 32], strides = [1, 1]} : vector<2x128xf32> to vector<2x32xf32>
    %cst_101 = arith.constant 5.000000e-01 : f32
    %336 = vector.broadcast %cst_101 : f32 to vector<2x32xf32>
    %337 = arith.mulf %336, %335 : vector<2x32xf32>
    %338 = math.tanh %337 : vector<2x32xf32>
    %cst_102 = arith.constant 1.000000e+00 : f32
    %339 = vector.broadcast %cst_102 : f32 to vector<2x32xf32>
    %340 = arith.addf %338, %339 : vector<2x32xf32>
    %cst_103 = arith.constant 5.000000e-01 : f32
    %341 = vector.broadcast %cst_103 : f32 to vector<2x32xf32>
    %342 = arith.mulf %341, %340 : vector<2x32xf32>
    %343 = vector.extract_strided_slice %326 {offsets = [0, 64], sizes = [2, 32], strides = [1, 1]} : vector<2x128xf32> to vector<2x32xf32>
    %344 = math.tanh %343 : vector<2x32xf32>
    %345 = vector.extract_strided_slice %326 {offsets = [0, 96], sizes = [2, 32], strides = [1, 1]} : vector<2x128xf32> to vector<2x32xf32>
    %cst_104 = arith.constant 5.000000e-01 : f32
    %346 = vector.broadcast %cst_104 : f32 to vector<2x32xf32>
    %347 = arith.mulf %346, %345 : vector<2x32xf32>
    %348 = math.tanh %347 : vector<2x32xf32>
    %cst_105 = arith.constant 1.000000e+00 : f32
    %349 = vector.broadcast %cst_105 : f32 to vector<2x32xf32>
    %350 = arith.addf %348, %349 : vector<2x32xf32>
    %cst_106 = arith.constant 5.000000e-01 : f32
    %351 = vector.broadcast %cst_106 : f32 to vector<2x32xf32>
    %352 = arith.mulf %351, %350 : vector<2x32xf32>
    %353 = vector.extract_strided_slice %30 {offsets = [0, 3, 128], sizes = [2, 1, 128], strides = [1, 1, 1]} : vector<2x8x256xf32> to vector<2x1x128xf32>
    %354 = vector.shape_cast %353 : vector<2x1x128xf32> to vector<2x128xf32>
    %355 = vector.extract_strided_slice %322 {offsets = [0, 128], sizes = [2, 128], strides = [1, 1]} : vector<2x256xf32> to vector<2x128xf32>
    %356 = arith.addf %354, %355 : vector<2x128xf32>
    %357 = vector.extract_strided_slice %356 {offsets = [0, 0], sizes = [2, 32], strides = [1, 1]} : vector<2x128xf32> to vector<2x32xf32>
    %cst_107 = arith.constant 5.000000e-01 : f32
    %358 = vector.broadcast %cst_107 : f32 to vector<2x32xf32>
    %359 = arith.mulf %358, %357 : vector<2x32xf32>
    %360 = math.tanh %359 : vector<2x32xf32>
    %cst_108 = arith.constant 1.000000e+00 : f32
    %361 = vector.broadcast %cst_108 : f32 to vector<2x32xf32>
    %362 = arith.addf %360, %361 : vector<2x32xf32>
    %cst_109 = arith.constant 5.000000e-01 : f32
    %363 = vector.broadcast %cst_109 : f32 to vector<2x32xf32>
    %364 = arith.mulf %363, %362 : vector<2x32xf32>
    %365 = vector.extract_strided_slice %356 {offsets = [0, 32], sizes = [2, 32], strides = [1, 1]} : vector<2x128xf32> to vector<2x32xf32>
    %cst_110 = arith.constant 5.000000e-01 : f32
    %366 = vector.broadcast %cst_110 : f32 to vector<2x32xf32>
    %367 = arith.mulf %366, %365 : vector<2x32xf32>
    %368 = math.tanh %367 : vector<2x32xf32>
    %cst_111 = arith.constant 1.000000e+00 : f32
    %369 = vector.broadcast %cst_111 : f32 to vector<2x32xf32>
    %370 = arith.addf %368, %369 : vector<2x32xf32>
    %cst_112 = arith.constant 5.000000e-01 : f32
    %371 = vector.broadcast %cst_112 : f32 to vector<2x32xf32>
    %372 = arith.mulf %371, %370 : vector<2x32xf32>
    %373 = vector.extract_strided_slice %356 {offsets = [0, 64], sizes = [2, 32], strides = [1, 1]} : vector<2x128xf32> to vector<2x32xf32>
    %374 = math.tanh %373 : vector<2x32xf32>
    %375 = vector.extract_strided_slice %356 {offsets = [0, 96], sizes = [2, 32], strides = [1, 1]} : vector<2x128xf32> to vector<2x32xf32>
    %cst_113 = arith.constant 5.000000e-01 : f32
    %376 = vector.broadcast %cst_113 : f32 to vector<2x32xf32>
    %377 = arith.mulf %376, %375 : vector<2x32xf32>
    %378 = math.tanh %377 : vector<2x32xf32>
    %cst_114 = arith.constant 1.000000e+00 : f32
    %379 = vector.broadcast %cst_114 : f32 to vector<2x32xf32>
    %380 = arith.addf %378, %379 : vector<2x32xf32>
    %cst_115 = arith.constant 5.000000e-01 : f32
    %381 = vector.broadcast %cst_115 : f32 to vector<2x32xf32>
    %382 = arith.mulf %381, %380 : vector<2x32xf32>
    %383 = arith.mulf %342, %313 : vector<2x32xf32>
    %384 = arith.mulf %334, %344 : vector<2x32xf32>
    %385 = arith.addf %383, %384 : vector<2x32xf32>
    %386 = math.tanh %385 : vector<2x32xf32>
    %387 = arith.mulf %352, %386 : vector<2x32xf32>
    %388 = arith.mulf %372, %318 : vector<2x32xf32>
    %389 = arith.mulf %364, %374 : vector<2x32xf32>
    %390 = arith.addf %388, %389 : vector<2x32xf32>
    %391 = math.tanh %390 : vector<2x32xf32>
    %392 = arith.mulf %382, %391 : vector<2x32xf32>
    %393 = tpu.concatenate %387, %392 in 1 : vector<2x32xf32>, vector<2x32xf32> -> vector<2x64xf32>
    %cst_116 = arith.constant dense<0.000000e+00> : vector<2x256xf32>
    %394 = tpu.matmul %393, %31, %cst_116 {dimension_numbers = #tpu.dot_dimension_numbers<[1], [0], [0], [1], [0, 0, 1, 1], [], []>} : vector<2x64xf32>, vector<64x256xf32>, vector<2x256xf32> -> vector<2x256xf32>
    %395 = vector.extract_strided_slice %30 {offsets = [0, 5, 0], sizes = [2, 1, 128], strides = [1, 1, 1]} : vector<2x8x256xf32> to vector<2x1x128xf32>
    %396 = vector.shape_cast %395 : vector<2x1x128xf32> to vector<2x128xf32>
    %397 = vector.extract_strided_slice %394 {offsets = [0, 0], sizes = [2, 128], strides = [1, 1]} : vector<2x256xf32> to vector<2x128xf32>
    %398 = arith.addf %396, %397 : vector<2x128xf32>
    %399 = vector.extract_strided_slice %398 {offsets = [0, 0], sizes = [2, 32], strides = [1, 1]} : vector<2x128xf32> to vector<2x32xf32>
    %cst_117 = arith.constant 5.000000e-01 : f32
    %400 = vector.broadcast %cst_117 : f32 to vector<2x32xf32>
    %401 = arith.mulf %400, %399 : vector<2x32xf32>
    %402 = math.tanh %401 : vector<2x32xf32>
    %cst_118 = arith.constant 1.000000e+00 : f32
    %403 = vector.broadcast %cst_118 : f32 to vector<2x32xf32>
    %404 = arith.addf %402, %403 : vector<2x32xf32>
    %cst_119 = arith.constant 5.000000e-01 : f32
    %405 = vector.broadcast %cst_119 : f32 to vector<2x32xf32>
    %406 = arith.mulf %405, %404 : vector<2x32xf32>
    %407 = vector.extract_strided_slice %398 {offsets = [0, 32], sizes = [2, 32], strides = [1, 1]} : vector<2x128xf32> to vector<2x32xf32>
    %cst_120 = arith.constant 5.000000e-01 : f32
    %408 = vector.broadcast %cst_120 : f32 to vector<2x32xf32>
    %409 = arith.mulf %408, %407 : vector<2x32xf32>
    %410 = math.tanh %409 : vector<2x32xf32>
    %cst_121 = arith.constant 1.000000e+00 : f32
    %411 = vector.broadcast %cst_121 : f32 to vector<2x32xf32>
    %412 = arith.addf %410, %411 : vector<2x32xf32>
    %cst_122 = arith.constant 5.000000e-01 : f32
    %413 = vector.broadcast %cst_122 : f32 to vector<2x32xf32>
    %414 = arith.mulf %413, %412 : vector<2x32xf32>
    %415 = vector.extract_strided_slice %398 {offsets = [0, 64], sizes = [2, 32], strides = [1, 1]} : vector<2x128xf32> to vector<2x32xf32>
    %416 = math.tanh %415 : vector<2x32xf32>
    %417 = vector.extract_strided_slice %398 {offsets = [0, 96], sizes = [2, 32], strides = [1, 1]} : vector<2x128xf32> to vector<2x32xf32>
    %cst_123 = arith.constant 5.000000e-01 : f32
    %418 = vector.broadcast %cst_123 : f32 to vector<2x32xf32>
    %419 = arith.mulf %418, %417 : vector<2x32xf32>
    %420 = math.tanh %419 : vector<2x32xf32>
    %cst_124 = arith.constant 1.000000e+00 : f32
    %421 = vector.broadcast %cst_124 : f32 to vector<2x32xf32>
    %422 = arith.addf %420, %421 : vector<2x32xf32>
    %cst_125 = arith.constant 5.000000e-01 : f32
    %423 = vector.broadcast %cst_125 : f32 to vector<2x32xf32>
    %424 = arith.mulf %423, %422 : vector<2x32xf32>
    %425 = vector.extract_strided_slice %30 {offsets = [0, 2, 128], sizes = [2, 1, 128], strides = [1, 1, 1]} : vector<2x8x256xf32> to vector<2x1x128xf32>
    %426 = vector.shape_cast %425 : vector<2x1x128xf32> to vector<2x128xf32>
    %427 = vector.extract_strided_slice %394 {offsets = [0, 128], sizes = [2, 128], strides = [1, 1]} : vector<2x256xf32> to vector<2x128xf32>
    %428 = arith.addf %426, %427 : vector<2x128xf32>
    %429 = vector.extract_strided_slice %428 {offsets = [0, 0], sizes = [2, 32], strides = [1, 1]} : vector<2x128xf32> to vector<2x32xf32>
    %cst_126 = arith.constant 5.000000e-01 : f32
    %430 = vector.broadcast %cst_126 : f32 to vector<2x32xf32>
    %431 = arith.mulf %430, %429 : vector<2x32xf32>
    %432 = math.tanh %431 : vector<2x32xf32>
    %cst_127 = arith.constant 1.000000e+00 : f32
    %433 = vector.broadcast %cst_127 : f32 to vector<2x32xf32>
    %434 = arith.addf %432, %433 : vector<2x32xf32>
    %cst_128 = arith.constant 5.000000e-01 : f32
    %435 = vector.broadcast %cst_128 : f32 to vector<2x32xf32>
    %436 = arith.mulf %435, %434 : vector<2x32xf32>
    %437 = vector.extract_strided_slice %428 {offsets = [0, 32], sizes = [2, 32], strides = [1, 1]} : vector<2x128xf32> to vector<2x32xf32>
    %cst_129 = arith.constant 5.000000e-01 : f32
    %438 = vector.broadcast %cst_129 : f32 to vector<2x32xf32>
    %439 = arith.mulf %438, %437 : vector<2x32xf32>
    %440 = math.tanh %439 : vector<2x32xf32>
    %cst_130 = arith.constant 1.000000e+00 : f32
    %441 = vector.broadcast %cst_130 : f32 to vector<2x32xf32>
    %442 = arith.addf %440, %441 : vector<2x32xf32>
    %cst_131 = arith.constant 5.000000e-01 : f32
    %443 = vector.broadcast %cst_131 : f32 to vector<2x32xf32>
    %444 = arith.mulf %443, %442 : vector<2x32xf32>
    %445 = vector.extract_strided_slice %428 {offsets = [0, 64], sizes = [2, 32], strides = [1, 1]} : vector<2x128xf32> to vector<2x32xf32>
    %446 = math.tanh %445 : vector<2x32xf32>
    %447 = vector.extract_strided_slice %428 {offsets = [0, 96], sizes = [2, 32], strides = [1, 1]} : vector<2x128xf32> to vector<2x32xf32>
    %cst_132 = arith.constant 5.000000e-01 : f32
    %448 = vector.broadcast %cst_132 : f32 to vector<2x32xf32>
    %449 = arith.mulf %448, %447 : vector<2x32xf32>
    %450 = math.tanh %449 : vector<2x32xf32>
    %cst_133 = arith.constant 1.000000e+00 : f32
    %451 = vector.broadcast %cst_133 : f32 to vector<2x32xf32>
    %452 = arith.addf %450, %451 : vector<2x32xf32>
    %cst_134 = arith.constant 5.000000e-01 : f32
    %453 = vector.broadcast %cst_134 : f32 to vector<2x32xf32>
    %454 = arith.mulf %453, %452 : vector<2x32xf32>
    %455 = arith.mulf %414, %385 : vector<2x32xf32>
    %456 = arith.mulf %406, %416 : vector<2x32xf32>
    %457 = arith.addf %455, %456 : vector<2x32xf32>
    %458 = math.tanh %457 : vector<2x32xf32>
    %459 = arith.mulf %424, %458 : vector<2x32xf32>
    %460 = arith.mulf %444, %390 : vector<2x32xf32>
    %461 = arith.mulf %436, %446 : vector<2x32xf32>
    %462 = arith.addf %460, %461 : vector<2x32xf32>
    %463 = math.tanh %462 : vector<2x32xf32>
    %464 = arith.mulf %454, %463 : vector<2x32xf32>
    %465 = tpu.concatenate %459, %464 in 1 : vector<2x32xf32>, vector<2x32xf32> -> vector<2x64xf32>
    %cst_135 = arith.constant dense<0.000000e+00> : vector<2x256xf32>
    %466 = tpu.matmul %465, %31, %cst_135 {dimension_numbers = #tpu.dot_dimension_numbers<[1], [0], [0], [1], [0, 0, 1, 1], [], []>} : vector<2x64xf32>, vector<64x256xf32>, vector<2x256xf32> -> vector<2x256xf32>
    %467 = vector.extract_strided_slice %30 {offsets = [0, 6, 0], sizes = [2, 1, 128], strides = [1, 1, 1]} : vector<2x8x256xf32> to vector<2x1x128xf32>
    %468 = vector.shape_cast %467 : vector<2x1x128xf32> to vector<2x128xf32>
    %469 = vector.extract_strided_slice %466 {offsets = [0, 0], sizes = [2, 128], strides = [1, 1]} : vector<2x256xf32> to vector<2x128xf32>
    %470 = arith.addf %468, %469 : vector<2x128xf32>
    %471 = vector.extract_strided_slice %470 {offsets = [0, 0], sizes = [2, 32], strides = [1, 1]} : vector<2x128xf32> to vector<2x32xf32>
    %cst_136 = arith.constant 5.000000e-01 : f32
    %472 = vector.broadcast %cst_136 : f32 to vector<2x32xf32>
    %473 = arith.mulf %472, %471 : vector<2x32xf32>
    %474 = math.tanh %473 : vector<2x32xf32>
    %cst_137 = arith.constant 1.000000e+00 : f32
    %475 = vector.broadcast %cst_137 : f32 to vector<2x32xf32>
    %476 = arith.addf %474, %475 : vector<2x32xf32>
    %cst_138 = arith.constant 5.000000e-01 : f32
    %477 = vector.broadcast %cst_138 : f32 to vector<2x32xf32>
    %478 = arith.mulf %477, %476 : vector<2x32xf32>
    %479 = vector.extract_strided_slice %470 {offsets = [0, 32], sizes = [2, 32], strides = [1, 1]} : vector<2x128xf32> to vector<2x32xf32>
    %cst_139 = arith.constant 5.000000e-01 : f32
    %480 = vector.broadcast %cst_139 : f32 to vector<2x32xf32>
    %481 = arith.mulf %480, %479 : vector<2x32xf32>
    %482 = math.tanh %481 : vector<2x32xf32>
    %cst_140 = arith.constant 1.000000e+00 : f32
    %483 = vector.broadcast %cst_140 : f32 to vector<2x32xf32>
    %484 = arith.addf %482, %483 : vector<2x32xf32>
    %cst_141 = arith.constant 5.000000e-01 : f32
    %485 = vector.broadcast %cst_141 : f32 to vector<2x32xf32>
    %486 = arith.mulf %485, %484 : vector<2x32xf32>
    %487 = vector.extract_strided_slice %470 {offsets = [0, 64], sizes = [2, 32], strides = [1, 1]} : vector<2x128xf32> to vector<2x32xf32>
    %488 = math.tanh %487 : vector<2x32xf32>
    %489 = vector.extract_strided_slice %470 {offsets = [0, 96], sizes = [2, 32], strides = [1, 1]} : vector<2x128xf32> to vector<2x32xf32>
    %cst_142 = arith.constant 5.000000e-01 : f32
    %490 = vector.broadcast %cst_142 : f32 to vector<2x32xf32>
    %491 = arith.mulf %490, %489 : vector<2x32xf32>
    %492 = math.tanh %491 : vector<2x32xf32>
    %cst_143 = arith.constant 1.000000e+00 : f32
    %493 = vector.broadcast %cst_143 : f32 to vector<2x32xf32>
    %494 = arith.addf %492, %493 : vector<2x32xf32>
    %cst_144 = arith.constant 5.000000e-01 : f32
    %495 = vector.broadcast %cst_144 : f32 to vector<2x32xf32>
    %496 = arith.mulf %495, %494 : vector<2x32xf32>
    %497 = vector.extract_strided_slice %30 {offsets = [0, 1, 128], sizes = [2, 1, 128], strides = [1, 1, 1]} : vector<2x8x256xf32> to vector<2x1x128xf32>
    %498 = vector.shape_cast %497 : vector<2x1x128xf32> to vector<2x128xf32>
    %499 = vector.extract_strided_slice %466 {offsets = [0, 128], sizes = [2, 128], strides = [1, 1]} : vector<2x256xf32> to vector<2x128xf32>
    %500 = arith.addf %498, %499 : vector<2x128xf32>
    %501 = vector.extract_strided_slice %500 {offsets = [0, 0], sizes = [2, 32], strides = [1, 1]} : vector<2x128xf32> to vector<2x32xf32>
    %cst_145 = arith.constant 5.000000e-01 : f32
    %502 = vector.broadcast %cst_145 : f32 to vector<2x32xf32>
    %503 = arith.mulf %502, %501 : vector<2x32xf32>
    %504 = math.tanh %503 : vector<2x32xf32>
    %cst_146 = arith.constant 1.000000e+00 : f32
    %505 = vector.broadcast %cst_146 : f32 to vector<2x32xf32>
    %506 = arith.addf %504, %505 : vector<2x32xf32>
    %cst_147 = arith.constant 5.000000e-01 : f32
    %507 = vector.broadcast %cst_147 : f32 to vector<2x32xf32>
    %508 = arith.mulf %507, %506 : vector<2x32xf32>
    %509 = vector.extract_strided_slice %500 {offsets = [0, 32], sizes = [2, 32], strides = [1, 1]} : vector<2x128xf32> to vector<2x32xf32>
    %cst_148 = arith.constant 5.000000e-01 : f32
    %510 = vector.broadcast %cst_148 : f32 to vector<2x32xf32>
    %511 = arith.mulf %510, %509 : vector<2x32xf32>
    %512 = math.tanh %511 : vector<2x32xf32>
    %cst_149 = arith.constant 1.000000e+00 : f32
    %513 = vector.broadcast %cst_149 : f32 to vector<2x32xf32>
    %514 = arith.addf %512, %513 : vector<2x32xf32>
    %cst_150 = arith.constant 5.000000e-01 : f32
    %515 = vector.broadcast %cst_150 : f32 to vector<2x32xf32>
    %516 = arith.mulf %515, %514 : vector<2x32xf32>
    %517 = vector.extract_strided_slice %500 {offsets = [0, 64], sizes = [2, 32], strides = [1, 1]} : vector<2x128xf32> to vector<2x32xf32>
    %518 = math.tanh %517 : vector<2x32xf32>
    %519 = vector.extract_strided_slice %500 {offsets = [0, 96], sizes = [2, 32], strides = [1, 1]} : vector<2x128xf32> to vector<2x32xf32>
    %cst_151 = arith.constant 5.000000e-01 : f32
    %520 = vector.broadcast %cst_151 : f32 to vector<2x32xf32>
    %521 = arith.mulf %520, %519 : vector<2x32xf32>
    %522 = math.tanh %521 : vector<2x32xf32>
    %cst_152 = arith.constant 1.000000e+00 : f32
    %523 = vector.broadcast %cst_152 : f32 to vector<2x32xf32>
    %524 = arith.addf %522, %523 : vector<2x32xf32>
    %cst_153 = arith.constant 5.000000e-01 : f32
    %525 = vector.broadcast %cst_153 : f32 to vector<2x32xf32>
    %526 = arith.mulf %525, %524 : vector<2x32xf32>
    %527 = arith.mulf %486, %457 : vector<2x32xf32>
    %528 = arith.mulf %478, %488 : vector<2x32xf32>
    %529 = arith.addf %527, %528 : vector<2x32xf32>
    %530 = math.tanh %529 : vector<2x32xf32>
    %531 = arith.mulf %496, %530 : vector<2x32xf32>
    %532 = arith.mulf %516, %462 : vector<2x32xf32>
    %533 = arith.mulf %508, %518 : vector<2x32xf32>
    %534 = arith.addf %532, %533 : vector<2x32xf32>
    %535 = math.tanh %534 : vector<2x32xf32>
    %536 = arith.mulf %526, %535 : vector<2x32xf32>
    %537 = tpu.concatenate %531, %536 in 1 : vector<2x32xf32>, vector<2x32xf32> -> vector<2x64xf32>
    %cst_154 = arith.constant dense<0.000000e+00> : vector<2x256xf32>
    %538 = tpu.matmul %537, %31, %cst_154 {dimension_numbers = #tpu.dot_dimension_numbers<[1], [0], [0], [1], [0, 0, 1, 1], [], []>} : vector<2x64xf32>, vector<64x256xf32>, vector<2x256xf32> -> vector<2x256xf32>
    %539 = vector.extract_strided_slice %30 {offsets = [0, 7, 0], sizes = [2, 1, 128], strides = [1, 1, 1]} : vector<2x8x256xf32> to vector<2x1x128xf32>
    %540 = vector.shape_cast %539 : vector<2x1x128xf32> to vector<2x128xf32>
    %541 = vector.extract_strided_slice %538 {offsets = [0, 0], sizes = [2, 128], strides = [1, 1]} : vector<2x256xf32> to vector<2x128xf32>
    %542 = arith.addf %540, %541 : vector<2x128xf32>
    %543 = vector.extract_strided_slice %542 {offsets = [0, 0], sizes = [2, 32], strides = [1, 1]} : vector<2x128xf32> to vector<2x32xf32>
    %cst_155 = arith.constant 5.000000e-01 : f32
    %544 = vector.broadcast %cst_155 : f32 to vector<2x32xf32>
    %545 = arith.mulf %544, %543 : vector<2x32xf32>
    %546 = math.tanh %545 : vector<2x32xf32>
    %cst_156 = arith.constant 1.000000e+00 : f32
    %547 = vector.broadcast %cst_156 : f32 to vector<2x32xf32>
    %548 = arith.addf %546, %547 : vector<2x32xf32>
    %cst_157 = arith.constant 5.000000e-01 : f32
    %549 = vector.broadcast %cst_157 : f32 to vector<2x32xf32>
    %550 = arith.mulf %549, %548 : vector<2x32xf32>
    %551 = vector.extract_strided_slice %542 {offsets = [0, 32], sizes = [2, 32], strides = [1, 1]} : vector<2x128xf32> to vector<2x32xf32>
    %cst_158 = arith.constant 5.000000e-01 : f32
    %552 = vector.broadcast %cst_158 : f32 to vector<2x32xf32>
    %553 = arith.mulf %552, %551 : vector<2x32xf32>
    %554 = math.tanh %553 : vector<2x32xf32>
    %cst_159 = arith.constant 1.000000e+00 : f32
    %555 = vector.broadcast %cst_159 : f32 to vector<2x32xf32>
    %556 = arith.addf %554, %555 : vector<2x32xf32>
    %cst_160 = arith.constant 5.000000e-01 : f32
    %557 = vector.broadcast %cst_160 : f32 to vector<2x32xf32>
    %558 = arith.mulf %557, %556 : vector<2x32xf32>
    %559 = vector.extract_strided_slice %542 {offsets = [0, 64], sizes = [2, 32], strides = [1, 1]} : vector<2x128xf32> to vector<2x32xf32>
    %560 = math.tanh %559 : vector<2x32xf32>
    %561 = vector.extract_strided_slice %542 {offsets = [0, 96], sizes = [2, 32], strides = [1, 1]} : vector<2x128xf32> to vector<2x32xf32>
    %cst_161 = arith.constant 5.000000e-01 : f32
    %562 = vector.broadcast %cst_161 : f32 to vector<2x32xf32>
    %563 = arith.mulf %562, %561 : vector<2x32xf32>
    %564 = math.tanh %563 : vector<2x32xf32>
    %cst_162 = arith.constant 1.000000e+00 : f32
    %565 = vector.broadcast %cst_162 : f32 to vector<2x32xf32>
    %566 = arith.addf %564, %565 : vector<2x32xf32>
    %cst_163 = arith.constant 5.000000e-01 : f32
    %567 = vector.broadcast %cst_163 : f32 to vector<2x32xf32>
    %568 = arith.mulf %567, %566 : vector<2x32xf32>
    %569 = vector.extract_strided_slice %30 {offsets = [0, 0, 128], sizes = [2, 1, 128], strides = [1, 1, 1]} : vector<2x8x256xf32> to vector<2x1x128xf32>
    %570 = vector.shape_cast %569 : vector<2x1x128xf32> to vector<2x128xf32>
    %571 = vector.extract_strided_slice %538 {offsets = [0, 128], sizes = [2, 128], strides = [1, 1]} : vector<2x256xf32> to vector<2x128xf32>
    %572 = arith.addf %570, %571 : vector<2x128xf32>
    %573 = vector.extract_strided_slice %572 {offsets = [0, 0], sizes = [2, 32], strides = [1, 1]} : vector<2x128xf32> to vector<2x32xf32>
    %cst_164 = arith.constant 5.000000e-01 : f32
    %574 = vector.broadcast %cst_164 : f32 to vector<2x32xf32>
    %575 = arith.mulf %574, %573 : vector<2x32xf32>
    %576 = math.tanh %575 : vector<2x32xf32>
    %cst_165 = arith.constant 1.000000e+00 : f32
    %577 = vector.broadcast %cst_165 : f32 to vector<2x32xf32>
    %578 = arith.addf %576, %577 : vector<2x32xf32>
    %cst_166 = arith.constant 5.000000e-01 : f32
    %579 = vector.broadcast %cst_166 : f32 to vector<2x32xf32>
    %580 = arith.mulf %579, %578 : vector<2x32xf32>
    %581 = vector.extract_strided_slice %572 {offsets = [0, 32], sizes = [2, 32], strides = [1, 1]} : vector<2x128xf32> to vector<2x32xf32>
    %cst_167 = arith.constant 5.000000e-01 : f32
    %582 = vector.broadcast %cst_167 : f32 to vector<2x32xf32>
    %583 = arith.mulf %582, %581 : vector<2x32xf32>
    %584 = math.tanh %583 : vector<2x32xf32>
    %cst_168 = arith.constant 1.000000e+00 : f32
    %585 = vector.broadcast %cst_168 : f32 to vector<2x32xf32>
    %586 = arith.addf %584, %585 : vector<2x32xf32>
    %cst_169 = arith.constant 5.000000e-01 : f32
    %587 = vector.broadcast %cst_169 : f32 to vector<2x32xf32>
    %588 = arith.mulf %587, %586 : vector<2x32xf32>
    %589 = vector.extract_strided_slice %572 {offsets = [0, 64], sizes = [2, 32], strides = [1, 1]} : vector<2x128xf32> to vector<2x32xf32>
    %590 = math.tanh %589 : vector<2x32xf32>
    %591 = vector.extract_strided_slice %572 {offsets = [0, 96], sizes = [2, 32], strides = [1, 1]} : vector<2x128xf32> to vector<2x32xf32>
    %cst_170 = arith.constant 5.000000e-01 : f32
    %592 = vector.broadcast %cst_170 : f32 to vector<2x32xf32>
    %593 = arith.mulf %592, %591 : vector<2x32xf32>
    %594 = math.tanh %593 : vector<2x32xf32>
    %cst_171 = arith.constant 1.000000e+00 : f32
    %595 = vector.broadcast %cst_171 : f32 to vector<2x32xf32>
    %596 = arith.addf %594, %595 : vector<2x32xf32>
    %cst_172 = arith.constant 5.000000e-01 : f32
    %597 = vector.broadcast %cst_172 : f32 to vector<2x32xf32>
    %598 = arith.mulf %597, %596 : vector<2x32xf32>
    %599 = arith.mulf %558, %529 : vector<2x32xf32>
    %600 = arith.mulf %550, %560 : vector<2x32xf32>
    %601 = arith.addf %599, %600 : vector<2x32xf32>
    %602 = math.tanh %601 : vector<2x32xf32>
    %603 = arith.mulf %568, %602 : vector<2x32xf32>
    %604 = arith.mulf %588, %534 : vector<2x32xf32>
    %605 = arith.mulf %580, %590 : vector<2x32xf32>
    %606 = arith.addf %604, %605 : vector<2x32xf32>
    %607 = math.tanh %606 : vector<2x32xf32>
    %608 = arith.mulf %598, %607 : vector<2x32xf32>
    %609 = vector.shape_cast %99 : vector<2x32xf32> to vector<2x1x32xf32>
    %610 = vector.shape_cast %171 : vector<2x32xf32> to vector<2x1x32xf32>
    %611 = vector.shape_cast %243 : vector<2x32xf32> to vector<2x1x32xf32>
    %612 = vector.shape_cast %315 : vector<2x32xf32> to vector<2x1x32xf32>
    %613 = vector.shape_cast %387 : vector<2x32xf32> to vector<2x1x32xf32>
    %614 = vector.shape_cast %459 : vector<2x32xf32> to vector<2x1x32xf32>
    %615 = vector.shape_cast %531 : vector<2x32xf32> to vector<2x1x32xf32>
    %616 = vector.shape_cast %603 : vector<2x32xf32> to vector<2x1x32xf32>
    %617 = tpu.concatenate %609, %610, %611, %612, %613, %614, %615, %616 in 1 : vector<2x1x32xf32>, vector<2x1x32xf32>, vector<2x1x32xf32>, vector<2x1x32xf32>, vector<2x1x32xf32>, vector<2x1x32xf32>, vector<2x1x32xf32>, vector<2x1x32xf32> -> vector<2x8x32xf32>
    %618 = vector.shape_cast %617 : vector<2x8x32xf32> to vector<16x32xf32>
    %619 = vector.shape_cast %608 : vector<2x32xf32> to vector<2x1x32xf32>
    %620 = vector.shape_cast %536 : vector<2x32xf32> to vector<2x1x32xf32>
    %621 = vector.shape_cast %464 : vector<2x32xf32> to vector<2x1x32xf32>
    %622 = vector.shape_cast %392 : vector<2x32xf32> to vector<2x1x32xf32>
    %623 = vector.shape_cast %320 : vector<2x32xf32> to vector<2x1x32xf32>
    %624 = vector.shape_cast %248 : vector<2x32xf32> to vector<2x1x32xf32>
    %625 = vector.shape_cast %176 : vector<2x32xf32> to vector<2x1x32xf32>
    %626 = vector.shape_cast %104 : vector<2x32xf32> to vector<2x1x32xf32>
    %627 = tpu.concatenate %619, %620, %621, %622, %623, %624, %625, %626 in 1 : vector<2x1x32xf32>, vector<2x1x32xf32>, vector<2x1x32xf32>, vector<2x1x32xf32>, vector<2x1x32xf32>, vector<2x1x32xf32>, vector<2x1x32xf32>, vector<2x1x32xf32> -> vector<2x8x32xf32>
    %628 = vector.shape_cast %627 : vector<2x8x32xf32> to vector<16x32xf32>
    %629 = vector.extract_strided_slice %618 {offsets = [0, 0], sizes = [16, 24], strides = [1, 1]} : vector<16x32xf32> to vector<16x24xf32>
    %630 = vector.extract_strided_slice %628 {offsets = [0, 0], sizes = [16, 24], strides = [1, 1]} : vector<16x32xf32> to vector<16x24xf32>
    %631 = tpu.concatenate %629, %630 in 1 : vector<16x24xf32>, vector<16x24xf32> -> vector<16x48xf32>
    %632 = vector.extract_strided_slice %618 {offsets = [0, 24], sizes = [16, 8], strides = [1, 1]} : vector<16x32xf32> to vector<16x8xf32>
    %633 = vector.extract_strided_slice %628 {offsets = [0, 24], sizes = [16, 8], strides = [1, 1]} : vector<16x32xf32> to vector<16x8xf32>
    %634 = tpu.concatenate %632, %633 in 1 : vector<16x8xf32>, vector<16x8xf32> -> vector<16x16xf32>
    %c0_173 = arith.constant 0 : index
    %c0_174 = arith.constant 0 : index
    %635 = vector.load %arg9[%c0_173, %c0_174] : memref<16x16xf32, #tpu.memory_space<vmem>>, vector<16x16xf32>
    %cst_175 = arith.constant dense<0.000000e+00> : vector<16x16xf32>
    %636 = tpu.matmul %634, %635, %cst_175 {dimension_numbers = #tpu.dot_dimension_numbers<[1], [0], [0], [1], [0, 0, 1, 1], [], []>} : vector<16x16xf32>, vector<16x16xf32>, vector<16x16xf32> -> vector<16x16xf32>
    %c0_176 = arith.constant 0 : index
    %c0_177 = arith.constant 0 : index
    %637 = vector.load %arg10[%c0_176, %c0_177] : memref<1x16xf32, #tpu.memory_space<vmem>>, vector<1x16xf32>
    %638 = vector.broadcast %637 : vector<1x16xf32> to vector<16x16xf32>
    %639 = arith.addf %636, %638 : vector<16x16xf32>
    %640 = math.tanh %639 : vector<16x16xf32>
    %c0_178 = arith.constant 0 : index
    %c0_179 = arith.constant 0 : index
    %641 = vector.load %arg11[%c0_178, %c0_179] : memref<16x16xf32, #tpu.memory_space<vmem>>, vector<16x16xf32>
    %cst_180 = arith.constant dense<0.000000e+00> : vector<16x16xf32>
    %642 = tpu.matmul %634, %641, %cst_180 {dimension_numbers = #tpu.dot_dimension_numbers<[1], [0], [0], [1], [0, 0, 1, 1], [], []>} : vector<16x16xf32>, vector<16x16xf32>, vector<16x16xf32> -> vector<16x16xf32>
    %c0_181 = arith.constant 0 : index
    %c0_182 = arith.constant 0 : index
    %643 = vector.load %arg12[%c0_181, %c0_182] : memref<1x16xf32, #tpu.memory_space<vmem>>, vector<1x16xf32>
    %644 = vector.broadcast %643 : vector<1x16xf32> to vector<16x16xf32>
    %645 = arith.addf %642, %644 : vector<16x16xf32>
    %646 = math.tanh %645 : vector<16x16xf32>
    %c0_183 = arith.constant 0 : index
    %c0_184 = arith.constant 0 : index
    %647 = vector.load %arg13[%c0_183, %c0_184] : memref<16x16xf32, #tpu.memory_space<vmem>>, vector<16x16xf32>
    %cst_185 = arith.constant dense<0.000000e+00> : vector<16x16xf32>
    %648 = tpu.matmul %640, %647, %cst_185 {dimension_numbers = #tpu.dot_dimension_numbers<[1], [0], [0], [1], [0, 0, 1, 1], [], []>} : vector<16x16xf32>, vector<16x16xf32>, vector<16x16xf32> -> vector<16x16xf32>
    %649 = vector.shape_cast %648 : vector<16x16xf32> to vector<2x8x16xf32>
    %650 = vector.shape_cast %646 : vector<16x16xf32> to vector<2x8x16xf32>
    %651 = vector.shape_cast %634 : vector<16x16xf32> to vector<2x8x16xf32>
    %652 = vector.shape_cast %631 : vector<16x48xf32> to vector<2x8x48xf32>
    %cst_186 = arith.constant dense<0.000000e+00> : vector<2x8x8xf32>
    %653 = tpu.matmul %649, %650, %cst_186 {dimension_numbers = #tpu.dot_dimension_numbers<[2], [2], [1], [1], [0, 0, 0, 1, 1, 1], [0], [0]>} : vector<2x8x16xf32>, vector<2x8x16xf32>, vector<2x8x8xf32> -> vector<2x8x8xf32>
    %c0_187 = arith.constant 0 : index
    %c0_188 = arith.constant 0 : index
    %654 = vector.load %arg14[%c0_187, %c0_188] : memref<1x16xf32, #tpu.memory_space<vmem>>, vector<1x16xf32>
    %655 = vector.shape_cast %654 : vector<1x16xf32> to vector<1x1x16xf32>
    %656 = vector.shape_cast %655 : vector<1x1x16xf32> to vector<1x1x16xf32>
    %657 = vector.broadcast %656 : vector<1x1x16xf32> to vector<2x1x16xf32>
    %cst_189 = arith.constant dense<0.000000e+00> : vector<2x1x8xf32>
    %658 = tpu.matmul %657, %651, %cst_189 {dimension_numbers = #tpu.dot_dimension_numbers<[2], [2], [1], [1], [0, 0, 0, 1, 1, 1], [0], [0]>} : vector<2x1x16xf32>, vector<2x8x16xf32>, vector<2x1x8xf32> -> vector<2x1x8xf32>
    %c0_190 = arith.constant 0 : index
    %c0_191 = arith.constant 0 : index
    %659 = vector.load %arg14[%c0_190, %c0_191] : memref<1x16xf32, #tpu.memory_space<vmem>>, vector<1x16xf32>
    %cst_192 = arith.constant dense<0.000000e+00> : vector<16x1xf32>
    %660 = tpu.matmul %634, %659, %cst_192 {dimension_numbers = #tpu.dot_dimension_numbers<[1], [1], [0], [0], [0, 0, 1, 0], [], []>} : vector<16x16xf32>, vector<1x16xf32>, vector<16x1xf32> -> vector<16x1xf32>
    %661 = vector.shape_cast %660 : vector<16x1xf32> to vector<2x8x1xf32>
    %662 = tpu.iota {dimensions = array<i32: 1>} : vector<2x8x8xi32>
    %663 = tpu.iota {dimensions = array<i32: 2>} : vector<2x8x8xi32>
    %664 = arith.cmpi ne, %662, %663 : vector<2x8x8xi32>
    %665 = arith.extui %664 : vector<2x8x8xi1> to vector<2x8x8xi32>
    %666 = arith.sitofp %665 : vector<2x8x8xi32> to vector<2x8x8xf32>
    %667 = arith.cmpi eq, %662, %663 : vector<2x8x8xi32>
    %668 = arith.extui %667 : vector<2x8x8xi1> to vector<2x8x8xi32>
    %669 = arith.sitofp %668 : vector<2x8x8xi32> to vector<2x8x8xf32>
    %cst_193 = arith.constant dense<0xFF800000> : vector<2x8xf32>
    %670 = vector.multi_reduction <maximumf>, %653, %cst_193 [2] : vector<2x8x8xf32> to vector<2x8xf32>
    %671 = vector.shape_cast %670 : vector<2x8xf32> to vector<2x8x1xf32>
    %cst_194 = arith.constant dense<0xFF800000> : vector<2x1xf32>
    %672 = vector.multi_reduction <maximumf>, %671, %cst_194 [1] : vector<2x8x1xf32> to vector<2x1xf32>
    %673 = vector.shape_cast %672 : vector<2x1xf32> to vector<2x1x1xf32>
    %cst_195 = arith.constant dense<0xFF800000> : vector<2x1xf32>
    %674 = vector.multi_reduction <maximumf>, %658, %cst_195 [2] : vector<2x1x8xf32> to vector<2x1xf32>
    %675 = vector.shape_cast %674 : vector<2x1xf32> to vector<2x1x1xf32>
    %676 = arith.maximumf %673, %675 : vector<2x1x1xf32>
    %677 = vector.broadcast %676 : vector<2x1x1xf32> to vector<2x8x8xf32>
    %678 = arith.subf %653, %677 : vector<2x8x8xf32>
    %679 = math.exp %678 : vector<2x8x8xf32>
    %680 = arith.mulf %679, %666 : vector<2x8x8xf32>
    %681 = vector.broadcast %676 : vector<2x1x1xf32> to vector<2x1x8xf32>
    %682 = arith.subf %658, %681 : vector<2x1x8xf32>
    %683 = math.exp %682 : vector<2x1x8xf32>
    %684 = vector.broadcast %676 : vector<2x1x1xf32> to vector<2x8x1xf32>
    %685 = arith.subf %661, %684 : vector<2x8x1xf32>
    %686 = math.exp %685 : vector<2x8x1xf32>
    %cst_196 = arith.constant dense<0.000000e+00> : vector<2x8xf32>
    %687 = vector.multi_reduction <add>, %680, %cst_196 [1] : vector<2x8x8xf32> to vector<2x8xf32>
    %688 = vector.shape_cast %687 : vector<2x8xf32> to vector<2x1x8xf32>
    %cst_197 = arith.constant 0.000000e+00 : f32
    %689 = vector.broadcast %cst_197 : f32 to vector<2x8x8xf32>
    %690 = arith.subf %689, %680 : vector<2x8x8xf32>
    %691 = arith.cmpi eq, %662, %663 : vector<2x8x8xi32>
    %cst_198 = arith.constant 0.000000e+00 : f32
    %692 = vector.shape_cast %688 : vector<2x1x8xf32> to vector<2x1x8xf32>
    %693 = vector.broadcast %692 : vector<2x1x8xf32> to vector<2x8x8xf32>
    %694 = vector.broadcast %cst_198 : f32 to vector<2x8x8xf32>
    %695 = arith.select %691, %693, %694 : vector<2x8x8xi1>, vector<2x8x8xf32>
    %696 = arith.addf %690, %695 : vector<2x8x8xf32>
    %c0_i32 = arith.constant 0 : i32
    %697 = vector.broadcast %c0_i32 : i32 to vector<2x8x8xi32>
    %698 = arith.cmpi eq, %662, %697 : vector<2x8x8xi32>
    %699 = vector.shape_cast %683 : vector<2x1x8xf32> to vector<2x1x8xf32>
    %700 = vector.broadcast %699 : vector<2x1x8xf32> to vector<2x8x8xf32>
    %701 = arith.select %698, %700, %696 : vector<2x8x8xi1>, vector<2x8x8xf32>
    %702 = tpu.iota {dimensions = array<i32: 1>} : vector<2x8x1xi32>
    %703 = tpu.concatenate %701, %669 in 2 : vector<2x8x8xf32>, vector<2x8x8xf32> -> vector<2x8x16xf32>
    %704 = vector.extract_strided_slice %703 {offsets = [0, 0, 0], sizes = [2, 1, 16], strides = [1, 1, 1]} : vector<2x8x16xf32> to vector<2x1x16xf32>
    %705 = vector.extract_strided_slice %703 {offsets = [0, 0, 0], sizes = [2, 1, 1], strides = [1, 1, 1]} : vector<2x8x16xf32> to vector<2x1x1xf32>
    %706 = tpu.reciprocal %705 {approx = true} : vector<2x1x1xf32> -> vector<2x1x1xf32>
    %707 = arith.mulf %705, %706 : vector<2x1x1xf32>
    %cst_199 = arith.constant 2.000000e+00 : f32
    %708 = vector.broadcast %cst_199 : f32 to vector<2x1x1xf32>
    %709 = arith.subf %708, %707 : vector<2x1x1xf32>
    %710 = arith.mulf %706, %709 : vector<2x1x1xf32>
    %711 = vector.broadcast %710 : vector<2x1x1xf32> to vector<2x1x16xf32>
    %712 = arith.mulf %704, %711 : vector<2x1x16xf32>
    %c0_i32_200 = arith.constant 0 : i32
    %713 = vector.broadcast %c0_i32_200 : i32 to vector<2x8x1xi32>
    %714 = arith.cmpi eq, %702, %713 : vector<2x8x1xi32>
    %715 = vector.extract_strided_slice %703 {offsets = [0, 0, 0], sizes = [2, 8, 1], strides = [1, 1, 1]} : vector<2x8x16xf32> to vector<2x8x1xf32>
    %cst_201 = arith.constant 0.000000e+00 : f32
    %716 = vector.broadcast %cst_201 : f32 to vector<2x8x1xf32>
    %717 = arith.select %714, %716, %715 : vector<2x8x1xi1>, vector<2x8x1xf32>
    %718 = vector.broadcast %717 : vector<2x8x1xf32> to vector<2x8x16xf32>
    %719 = vector.broadcast %712 : vector<2x1x16xf32> to vector<2x8x16xf32>
    %720 = arith.mulf %718, %719 : vector<2x8x16xf32>
    %721 = arith.subf %703, %720 : vector<2x8x16xf32>
    %c0_i32_202 = arith.constant 0 : i32
    %722 = vector.broadcast %c0_i32_202 : i32 to vector<2x8x1xi32>
    %723 = arith.cmpi eq, %702, %722 : vector<2x8x1xi32>
    %724 = vector.shape_cast %723 : vector<2x8x1xi1> to vector<2x8x1xi1>
    %725 = vector.broadcast %724 : vector<2x8x1xi1> to vector<2x8x16xi1>
    %726 = vector.shape_cast %712 : vector<2x1x16xf32> to vector<2x1x16xf32>
    %727 = vector.broadcast %726 : vector<2x1x16xf32> to vector<2x8x16xf32>
    %728 = arith.select %725, %727, %721 : vector<2x8x16xi1>, vector<2x8x16xf32>
    %729 = vector.extract_strided_slice %728 {offsets = [0, 1, 0], sizes = [2, 1, 16], strides = [1, 1, 1]} : vector<2x8x16xf32> to vector<2x1x16xf32>
    %730 = vector.extract_strided_slice %728 {offsets = [0, 1, 1], sizes = [2, 1, 1], strides = [1, 1, 1]} : vector<2x8x16xf32> to vector<2x1x1xf32>
    %731 = tpu.reciprocal %730 {approx = true} : vector<2x1x1xf32> -> vector<2x1x1xf32>
    %732 = arith.mulf %730, %731 : vector<2x1x1xf32>
    %cst_203 = arith.constant 2.000000e+00 : f32
    %733 = vector.broadcast %cst_203 : f32 to vector<2x1x1xf32>
    %734 = arith.subf %733, %732 : vector<2x1x1xf32>
    %735 = arith.mulf %731, %734 : vector<2x1x1xf32>
    %736 = vector.broadcast %735 : vector<2x1x1xf32> to vector<2x1x16xf32>
    %737 = arith.mulf %729, %736 : vector<2x1x16xf32>
    %c1_i32 = arith.constant 1 : i32
    %738 = vector.broadcast %c1_i32 : i32 to vector<2x8x1xi32>
    %739 = arith.cmpi eq, %702, %738 : vector<2x8x1xi32>
    %740 = vector.extract_strided_slice %728 {offsets = [0, 0, 1], sizes = [2, 8, 1], strides = [1, 1, 1]} : vector<2x8x16xf32> to vector<2x8x1xf32>
    %cst_204 = arith.constant 0.000000e+00 : f32
    %741 = vector.broadcast %cst_204 : f32 to vector<2x8x1xf32>
    %742 = arith.select %739, %741, %740 : vector<2x8x1xi1>, vector<2x8x1xf32>
    %743 = vector.broadcast %742 : vector<2x8x1xf32> to vector<2x8x16xf32>
    %744 = vector.broadcast %737 : vector<2x1x16xf32> to vector<2x8x16xf32>
    %745 = arith.mulf %743, %744 : vector<2x8x16xf32>
    %746 = arith.subf %728, %745 : vector<2x8x16xf32>
    %c1_i32_205 = arith.constant 1 : i32
    %747 = vector.broadcast %c1_i32_205 : i32 to vector<2x8x1xi32>
    %748 = arith.cmpi eq, %702, %747 : vector<2x8x1xi32>
    %749 = vector.shape_cast %748 : vector<2x8x1xi1> to vector<2x8x1xi1>
    %750 = vector.broadcast %749 : vector<2x8x1xi1> to vector<2x8x16xi1>
    %751 = vector.shape_cast %737 : vector<2x1x16xf32> to vector<2x1x16xf32>
    %752 = vector.broadcast %751 : vector<2x1x16xf32> to vector<2x8x16xf32>
    %753 = arith.select %750, %752, %746 : vector<2x8x16xi1>, vector<2x8x16xf32>
    %754 = vector.extract_strided_slice %753 {offsets = [0, 2, 0], sizes = [2, 1, 16], strides = [1, 1, 1]} : vector<2x8x16xf32> to vector<2x1x16xf32>
    %755 = vector.extract_strided_slice %753 {offsets = [0, 2, 2], sizes = [2, 1, 1], strides = [1, 1, 1]} : vector<2x8x16xf32> to vector<2x1x1xf32>
    %756 = tpu.reciprocal %755 {approx = true} : vector<2x1x1xf32> -> vector<2x1x1xf32>
    %757 = arith.mulf %755, %756 : vector<2x1x1xf32>
    %cst_206 = arith.constant 2.000000e+00 : f32
    %758 = vector.broadcast %cst_206 : f32 to vector<2x1x1xf32>
    %759 = arith.subf %758, %757 : vector<2x1x1xf32>
    %760 = arith.mulf %756, %759 : vector<2x1x1xf32>
    %761 = vector.broadcast %760 : vector<2x1x1xf32> to vector<2x1x16xf32>
    %762 = arith.mulf %754, %761 : vector<2x1x16xf32>
    %c2_i32 = arith.constant 2 : i32
    %763 = vector.broadcast %c2_i32 : i32 to vector<2x8x1xi32>
    %764 = arith.cmpi eq, %702, %763 : vector<2x8x1xi32>
    %765 = vector.extract_strided_slice %753 {offsets = [0, 0, 2], sizes = [2, 8, 1], strides = [1, 1, 1]} : vector<2x8x16xf32> to vector<2x8x1xf32>
    %cst_207 = arith.constant 0.000000e+00 : f32
    %766 = vector.broadcast %cst_207 : f32 to vector<2x8x1xf32>
    %767 = arith.select %764, %766, %765 : vector<2x8x1xi1>, vector<2x8x1xf32>
    %768 = vector.broadcast %767 : vector<2x8x1xf32> to vector<2x8x16xf32>
    %769 = vector.broadcast %762 : vector<2x1x16xf32> to vector<2x8x16xf32>
    %770 = arith.mulf %768, %769 : vector<2x8x16xf32>
    %771 = arith.subf %753, %770 : vector<2x8x16xf32>
    %c2_i32_208 = arith.constant 2 : i32
    %772 = vector.broadcast %c2_i32_208 : i32 to vector<2x8x1xi32>
    %773 = arith.cmpi eq, %702, %772 : vector<2x8x1xi32>
    %774 = vector.shape_cast %773 : vector<2x8x1xi1> to vector<2x8x1xi1>
    %775 = vector.broadcast %774 : vector<2x8x1xi1> to vector<2x8x16xi1>
    %776 = vector.shape_cast %762 : vector<2x1x16xf32> to vector<2x1x16xf32>
    %777 = vector.broadcast %776 : vector<2x1x16xf32> to vector<2x8x16xf32>
    %778 = arith.select %775, %777, %771 : vector<2x8x16xi1>, vector<2x8x16xf32>
    %779 = vector.extract_strided_slice %778 {offsets = [0, 3, 0], sizes = [2, 1, 16], strides = [1, 1, 1]} : vector<2x8x16xf32> to vector<2x1x16xf32>
    %780 = vector.extract_strided_slice %778 {offsets = [0, 3, 3], sizes = [2, 1, 1], strides = [1, 1, 1]} : vector<2x8x16xf32> to vector<2x1x1xf32>
    %781 = tpu.reciprocal %780 {approx = true} : vector<2x1x1xf32> -> vector<2x1x1xf32>
    %782 = arith.mulf %780, %781 : vector<2x1x1xf32>
    %cst_209 = arith.constant 2.000000e+00 : f32
    %783 = vector.broadcast %cst_209 : f32 to vector<2x1x1xf32>
    %784 = arith.subf %783, %782 : vector<2x1x1xf32>
    %785 = arith.mulf %781, %784 : vector<2x1x1xf32>
    %786 = vector.broadcast %785 : vector<2x1x1xf32> to vector<2x1x16xf32>
    %787 = arith.mulf %779, %786 : vector<2x1x16xf32>
    %c3_i32 = arith.constant 3 : i32
    %788 = vector.broadcast %c3_i32 : i32 to vector<2x8x1xi32>
    %789 = arith.cmpi eq, %702, %788 : vector<2x8x1xi32>
    %790 = vector.extract_strided_slice %778 {offsets = [0, 0, 3], sizes = [2, 8, 1], strides = [1, 1, 1]} : vector<2x8x16xf32> to vector<2x8x1xf32>
    %cst_210 = arith.constant 0.000000e+00 : f32
    %791 = vector.broadcast %cst_210 : f32 to vector<2x8x1xf32>
    %792 = arith.select %789, %791, %790 : vector<2x8x1xi1>, vector<2x8x1xf32>
    %793 = vector.broadcast %792 : vector<2x8x1xf32> to vector<2x8x16xf32>
    %794 = vector.broadcast %787 : vector<2x1x16xf32> to vector<2x8x16xf32>
    %795 = arith.mulf %793, %794 : vector<2x8x16xf32>
    %796 = arith.subf %778, %795 : vector<2x8x16xf32>
    %c3_i32_211 = arith.constant 3 : i32
    %797 = vector.broadcast %c3_i32_211 : i32 to vector<2x8x1xi32>
    %798 = arith.cmpi eq, %702, %797 : vector<2x8x1xi32>
    %799 = vector.shape_cast %798 : vector<2x8x1xi1> to vector<2x8x1xi1>
    %800 = vector.broadcast %799 : vector<2x8x1xi1> to vector<2x8x16xi1>
    %801 = vector.shape_cast %787 : vector<2x1x16xf32> to vector<2x1x16xf32>
    %802 = vector.broadcast %801 : vector<2x1x16xf32> to vector<2x8x16xf32>
    %803 = arith.select %800, %802, %796 : vector<2x8x16xi1>, vector<2x8x16xf32>
    %804 = vector.extract_strided_slice %803 {offsets = [0, 4, 0], sizes = [2, 1, 16], strides = [1, 1, 1]} : vector<2x8x16xf32> to vector<2x1x16xf32>
    %805 = vector.extract_strided_slice %803 {offsets = [0, 4, 4], sizes = [2, 1, 1], strides = [1, 1, 1]} : vector<2x8x16xf32> to vector<2x1x1xf32>
    %806 = tpu.reciprocal %805 {approx = true} : vector<2x1x1xf32> -> vector<2x1x1xf32>
    %807 = arith.mulf %805, %806 : vector<2x1x1xf32>
    %cst_212 = arith.constant 2.000000e+00 : f32
    %808 = vector.broadcast %cst_212 : f32 to vector<2x1x1xf32>
    %809 = arith.subf %808, %807 : vector<2x1x1xf32>
    %810 = arith.mulf %806, %809 : vector<2x1x1xf32>
    %811 = vector.broadcast %810 : vector<2x1x1xf32> to vector<2x1x16xf32>
    %812 = arith.mulf %804, %811 : vector<2x1x16xf32>
    %c4_i32 = arith.constant 4 : i32
    %813 = vector.broadcast %c4_i32 : i32 to vector<2x8x1xi32>
    %814 = arith.cmpi eq, %702, %813 : vector<2x8x1xi32>
    %815 = vector.extract_strided_slice %803 {offsets = [0, 0, 4], sizes = [2, 8, 1], strides = [1, 1, 1]} : vector<2x8x16xf32> to vector<2x8x1xf32>
    %cst_213 = arith.constant 0.000000e+00 : f32
    %816 = vector.broadcast %cst_213 : f32 to vector<2x8x1xf32>
    %817 = arith.select %814, %816, %815 : vector<2x8x1xi1>, vector<2x8x1xf32>
    %818 = vector.broadcast %817 : vector<2x8x1xf32> to vector<2x8x16xf32>
    %819 = vector.broadcast %812 : vector<2x1x16xf32> to vector<2x8x16xf32>
    %820 = arith.mulf %818, %819 : vector<2x8x16xf32>
    %821 = arith.subf %803, %820 : vector<2x8x16xf32>
    %c4_i32_214 = arith.constant 4 : i32
    %822 = vector.broadcast %c4_i32_214 : i32 to vector<2x8x1xi32>
    %823 = arith.cmpi eq, %702, %822 : vector<2x8x1xi32>
    %824 = vector.shape_cast %823 : vector<2x8x1xi1> to vector<2x8x1xi1>
    %825 = vector.broadcast %824 : vector<2x8x1xi1> to vector<2x8x16xi1>
    %826 = vector.shape_cast %812 : vector<2x1x16xf32> to vector<2x1x16xf32>
    %827 = vector.broadcast %826 : vector<2x1x16xf32> to vector<2x8x16xf32>
    %828 = arith.select %825, %827, %821 : vector<2x8x16xi1>, vector<2x8x16xf32>
    %829 = vector.extract_strided_slice %828 {offsets = [0, 5, 0], sizes = [2, 1, 16], strides = [1, 1, 1]} : vector<2x8x16xf32> to vector<2x1x16xf32>
    %830 = vector.extract_strided_slice %828 {offsets = [0, 5, 5], sizes = [2, 1, 1], strides = [1, 1, 1]} : vector<2x8x16xf32> to vector<2x1x1xf32>
    %831 = tpu.reciprocal %830 {approx = true} : vector<2x1x1xf32> -> vector<2x1x1xf32>
    %832 = arith.mulf %830, %831 : vector<2x1x1xf32>
    %cst_215 = arith.constant 2.000000e+00 : f32
    %833 = vector.broadcast %cst_215 : f32 to vector<2x1x1xf32>
    %834 = arith.subf %833, %832 : vector<2x1x1xf32>
    %835 = arith.mulf %831, %834 : vector<2x1x1xf32>
    %836 = vector.broadcast %835 : vector<2x1x1xf32> to vector<2x1x16xf32>
    %837 = arith.mulf %829, %836 : vector<2x1x16xf32>
    %c5_i32 = arith.constant 5 : i32
    %838 = vector.broadcast %c5_i32 : i32 to vector<2x8x1xi32>
    %839 = arith.cmpi eq, %702, %838 : vector<2x8x1xi32>
    %840 = vector.extract_strided_slice %828 {offsets = [0, 0, 5], sizes = [2, 8, 1], strides = [1, 1, 1]} : vector<2x8x16xf32> to vector<2x8x1xf32>
    %cst_216 = arith.constant 0.000000e+00 : f32
    %841 = vector.broadcast %cst_216 : f32 to vector<2x8x1xf32>
    %842 = arith.select %839, %841, %840 : vector<2x8x1xi1>, vector<2x8x1xf32>
    %843 = vector.broadcast %842 : vector<2x8x1xf32> to vector<2x8x16xf32>
    %844 = vector.broadcast %837 : vector<2x1x16xf32> to vector<2x8x16xf32>
    %845 = arith.mulf %843, %844 : vector<2x8x16xf32>
    %846 = arith.subf %828, %845 : vector<2x8x16xf32>
    %c5_i32_217 = arith.constant 5 : i32
    %847 = vector.broadcast %c5_i32_217 : i32 to vector<2x8x1xi32>
    %848 = arith.cmpi eq, %702, %847 : vector<2x8x1xi32>
    %849 = vector.shape_cast %848 : vector<2x8x1xi1> to vector<2x8x1xi1>
    %850 = vector.broadcast %849 : vector<2x8x1xi1> to vector<2x8x16xi1>
    %851 = vector.shape_cast %837 : vector<2x1x16xf32> to vector<2x1x16xf32>
    %852 = vector.broadcast %851 : vector<2x1x16xf32> to vector<2x8x16xf32>
    %853 = arith.select %850, %852, %846 : vector<2x8x16xi1>, vector<2x8x16xf32>
    %854 = vector.extract_strided_slice %853 {offsets = [0, 6, 0], sizes = [2, 1, 16], strides = [1, 1, 1]} : vector<2x8x16xf32> to vector<2x1x16xf32>
    %855 = vector.extract_strided_slice %853 {offsets = [0, 6, 6], sizes = [2, 1, 1], strides = [1, 1, 1]} : vector<2x8x16xf32> to vector<2x1x1xf32>
    %856 = tpu.reciprocal %855 {approx = true} : vector<2x1x1xf32> -> vector<2x1x1xf32>
    %857 = arith.mulf %855, %856 : vector<2x1x1xf32>
    %cst_218 = arith.constant 2.000000e+00 : f32
    %858 = vector.broadcast %cst_218 : f32 to vector<2x1x1xf32>
    %859 = arith.subf %858, %857 : vector<2x1x1xf32>
    %860 = arith.mulf %856, %859 : vector<2x1x1xf32>
    %861 = vector.broadcast %860 : vector<2x1x1xf32> to vector<2x1x16xf32>
    %862 = arith.mulf %854, %861 : vector<2x1x16xf32>
    %c6_i32 = arith.constant 6 : i32
    %863 = vector.broadcast %c6_i32 : i32 to vector<2x8x1xi32>
    %864 = arith.cmpi eq, %702, %863 : vector<2x8x1xi32>
    %865 = vector.extract_strided_slice %853 {offsets = [0, 0, 6], sizes = [2, 8, 1], strides = [1, 1, 1]} : vector<2x8x16xf32> to vector<2x8x1xf32>
    %cst_219 = arith.constant 0.000000e+00 : f32
    %866 = vector.broadcast %cst_219 : f32 to vector<2x8x1xf32>
    %867 = arith.select %864, %866, %865 : vector<2x8x1xi1>, vector<2x8x1xf32>
    %868 = vector.broadcast %867 : vector<2x8x1xf32> to vector<2x8x16xf32>
    %869 = vector.broadcast %862 : vector<2x1x16xf32> to vector<2x8x16xf32>
    %870 = arith.mulf %868, %869 : vector<2x8x16xf32>
    %871 = arith.subf %853, %870 : vector<2x8x16xf32>
    %c6_i32_220 = arith.constant 6 : i32
    %872 = vector.broadcast %c6_i32_220 : i32 to vector<2x8x1xi32>
    %873 = arith.cmpi eq, %702, %872 : vector<2x8x1xi32>
    %874 = vector.shape_cast %873 : vector<2x8x1xi1> to vector<2x8x1xi1>
    %875 = vector.broadcast %874 : vector<2x8x1xi1> to vector<2x8x16xi1>
    %876 = vector.shape_cast %862 : vector<2x1x16xf32> to vector<2x1x16xf32>
    %877 = vector.broadcast %876 : vector<2x1x16xf32> to vector<2x8x16xf32>
    %878 = arith.select %875, %877, %871 : vector<2x8x16xi1>, vector<2x8x16xf32>
    %879 = vector.extract_strided_slice %878 {offsets = [0, 7, 0], sizes = [2, 1, 16], strides = [1, 1, 1]} : vector<2x8x16xf32> to vector<2x1x16xf32>
    %880 = vector.extract_strided_slice %878 {offsets = [0, 7, 7], sizes = [2, 1, 1], strides = [1, 1, 1]} : vector<2x8x16xf32> to vector<2x1x1xf32>
    %881 = tpu.reciprocal %880 {approx = true} : vector<2x1x1xf32> -> vector<2x1x1xf32>
    %882 = arith.mulf %880, %881 : vector<2x1x1xf32>
    %cst_221 = arith.constant 2.000000e+00 : f32
    %883 = vector.broadcast %cst_221 : f32 to vector<2x1x1xf32>
    %884 = arith.subf %883, %882 : vector<2x1x1xf32>
    %885 = arith.mulf %881, %884 : vector<2x1x1xf32>
    %886 = vector.broadcast %885 : vector<2x1x1xf32> to vector<2x1x16xf32>
    %887 = arith.mulf %879, %886 : vector<2x1x16xf32>
    %c7_i32 = arith.constant 7 : i32
    %888 = vector.broadcast %c7_i32 : i32 to vector<2x8x1xi32>
    %889 = arith.cmpi eq, %702, %888 : vector<2x8x1xi32>
    %890 = vector.extract_strided_slice %878 {offsets = [0, 0, 7], sizes = [2, 8, 1], strides = [1, 1, 1]} : vector<2x8x16xf32> to vector<2x8x1xf32>
    %cst_222 = arith.constant 0.000000e+00 : f32
    %891 = vector.broadcast %cst_222 : f32 to vector<2x8x1xf32>
    %892 = arith.select %889, %891, %890 : vector<2x8x1xi1>, vector<2x8x1xf32>
    %893 = vector.broadcast %892 : vector<2x8x1xf32> to vector<2x8x16xf32>
    %894 = vector.broadcast %887 : vector<2x1x16xf32> to vector<2x8x16xf32>
    %895 = arith.mulf %893, %894 : vector<2x8x16xf32>
    %896 = arith.subf %878, %895 : vector<2x8x16xf32>
    %c7_i32_223 = arith.constant 7 : i32
    %897 = vector.broadcast %c7_i32_223 : i32 to vector<2x8x1xi32>
    %898 = arith.cmpi eq, %702, %897 : vector<2x8x1xi32>
    %899 = vector.shape_cast %898 : vector<2x8x1xi1> to vector<2x8x1xi1>
    %900 = vector.broadcast %899 : vector<2x8x1xi1> to vector<2x8x16xi1>
    %901 = vector.shape_cast %887 : vector<2x1x16xf32> to vector<2x1x16xf32>
    %902 = vector.broadcast %901 : vector<2x1x16xf32> to vector<2x8x16xf32>
    %903 = arith.select %900, %902, %896 : vector<2x8x16xi1>, vector<2x8x16xf32>
    %904 = vector.extract_strided_slice %903 {offsets = [0, 0, 8], sizes = [2, 8, 8], strides = [1, 1, 1]} : vector<2x8x16xf32> to vector<2x8x8xf32>
    %905 = tpu.transpose %904, [0, 2, 1] : vector<2x8x8xf32> -> vector<2x8x8xf32>
    %906 = arith.mulf %904, %669 : vector<2x8x8xf32>
    %cst_224 = arith.constant dense<0.000000e+00> : vector<2x8xf32>
    %907 = vector.multi_reduction <add>, %906, %cst_224 [1] : vector<2x8x8xf32> to vector<2x8xf32>
    %908 = vector.shape_cast %907 : vector<2x8xf32> to vector<2x1x8xf32>
    %c0_i32_225 = arith.constant 0 : i32
    %909 = vector.broadcast %c0_i32_225 : i32 to vector<2x8x8xi32>
    %910 = arith.cmpi ne, %663, %909 : vector<2x8x8xi32>
    %911 = arith.extui %910 : vector<2x8x8xi1> to vector<2x8x8xi32>
    %912 = arith.sitofp %911 : vector<2x8x8xi32> to vector<2x8x8xf32>
    %c0_i32_226 = arith.constant 0 : i32
    %913 = vector.broadcast %c0_i32_226 : i32 to vector<2x8x8xi32>
    %914 = arith.cmpi ne, %662, %913 : vector<2x8x8xi32>
    %915 = arith.extui %914 : vector<2x8x8xi1> to vector<2x8x8xi32>
    %916 = arith.sitofp %915 : vector<2x8x8xi32> to vector<2x8x8xf32>
    %917 = vector.broadcast %908 : vector<2x1x8xf32> to vector<2x8x8xf32>
    %918 = arith.mulf %680, %917 : vector<2x8x8xf32>
    %919 = arith.mulf %912, %918 : vector<2x8x8xf32>
    %920 = arith.mulf %680, %905 : vector<2x8x8xf32>
    %921 = arith.mulf %916, %920 : vector<2x8x8xf32>
    %922 = arith.subf %919, %921 : vector<2x8x8xf32>
    %923 = tpu.transpose %922, [0, 2, 1] : vector<2x8x8xf32> -> vector<2x8x8xf32>
    %924 = vector.extract_strided_slice %904 {offsets = [0, 0, 0], sizes = [2, 8, 1], strides = [1, 1, 1]} : vector<2x8x8xf32> to vector<2x8x1xf32>
    %925 = arith.mulf %686, %924 : vector<2x8x1xf32>
    %c0_227 = arith.constant 0 : index
    %c0_228 = arith.constant 0 : index
    %926 = vector.load %arg15[%c0_227, %c0_228] : memref<1x48xf32, #tpu.memory_space<vmem>>, vector<1x48xf32>
    %927 = vector.shape_cast %926 : vector<1x48xf32> to vector<1x1x48xf32>
    %928 = vector.broadcast %925 : vector<2x8x1xf32> to vector<2x8x48xf32>
    %929 = vector.broadcast %927 : vector<1x1x48xf32> to vector<2x8x48xf32>
    %930 = arith.mulf %928, %929 : vector<2x8x48xf32>
    %cst_229 = arith.constant dense<0.000000e+00> : vector<2x8x48xf32>
    %931 = tpu.matmul %923, %652, %cst_229 {dimension_numbers = #tpu.dot_dimension_numbers<[2], [1], [1], [2], [0, 0, 0, 1, 1, 2], [0], [0]>} : vector<2x8x8xf32>, vector<2x8x48xf32>, vector<2x8x48xf32> -> vector<2x8x48xf32>
    %932 = arith.addf %930, %931 : vector<2x8x48xf32>
    %cst_230 = arith.constant dense<0.000000e+00> : vector<2x8x48xf32>
    %933 = tpu.matmul %922, %652, %cst_230 {dimension_numbers = #tpu.dot_dimension_numbers<[2], [1], [1], [2], [0, 0, 0, 1, 1, 2], [0], [0]>} : vector<2x8x8xf32>, vector<2x8x48xf32>, vector<2x8x48xf32> -> vector<2x8x48xf32>
    %934 = tpu.concatenate %652, %932, %933 in 2 : vector<2x8x48xf32>, vector<2x8x48xf32>, vector<2x8x48xf32> -> vector<2x8x144xf32>
    %935 = vector.shape_cast %934 : vector<2x8x144xf32> to vector<16x144xf32>
    %c0_231 = arith.constant 0 : index
    %c0_232 = arith.constant 0 : index
    %936 = vector.load %arg16[%c0_231, %c0_232] : memref<144x48xf32, #tpu.memory_space<vmem>>, vector<144x48xf32>
    %cst_233 = arith.constant dense<0.000000e+00> : vector<16x48xf32>
    %937 = tpu.matmul %935, %936, %cst_233 {dimension_numbers = #tpu.dot_dimension_numbers<[1], [0], [0], [1], [0, 0, 1, 1], [], []>} : vector<16x144xf32>, vector<144x48xf32>, vector<16x48xf32> -> vector<16x48xf32>
    %c0_234 = arith.constant 0 : index
    %c0_235 = arith.constant 0 : index
    %938 = vector.load %arg17[%c0_234, %c0_235] : memref<1x48xf32, #tpu.memory_space<vmem>>, vector<1x48xf32>
    %939 = vector.broadcast %938 : vector<1x48xf32> to vector<16x48xf32>
    %940 = arith.addf %937, %939 : vector<16x48xf32>
    %cst_236 = arith.constant 0.000000e+00 : f32
    %941 = vector.broadcast %cst_236 : f32 to vector<16x48xf32>
    %942 = arith.maximumf %940, %941 : vector<16x48xf32>
    %c0_237 = arith.constant 0 : index
    %c0_238 = arith.constant 0 : index
    %943 = vector.load %arg18[%c0_237, %c0_238] : memref<48x128xf32, #tpu.memory_space<vmem>>, vector<48x128xf32>
    %cst_239 = arith.constant dense<0.000000e+00> : vector<16x128xf32>
    %944 = tpu.matmul %942, %943, %cst_239 {dimension_numbers = #tpu.dot_dimension_numbers<[1], [0], [0], [1], [0, 0, 1, 1], [], []>} : vector<16x48xf32>, vector<48x128xf32>, vector<16x128xf32> -> vector<16x128xf32>
    %c0_240 = arith.constant 0 : index
    %c0_241 = arith.constant 0 : index
    %945 = vector.load %arg19[%c0_240, %c0_241] : memref<1x128xf32, #tpu.memory_space<vmem>>, vector<1x128xf32>
    %946 = vector.broadcast %945 : vector<1x128xf32> to vector<16x128xf32>
    %947 = arith.addf %944, %946 : vector<16x128xf32>
    %cst_242 = arith.constant dense<0xFF800000> : vector<16xf32>
    %948 = vector.multi_reduction <maximumf>, %947, %cst_242 [1] : vector<16x128xf32> to vector<16xf32>
    %949 = vector.shape_cast %948 : vector<16xf32> to vector<16x1xf32>
    %950 = vector.broadcast %949 : vector<16x1xf32> to vector<16x128xf32>
    %951 = arith.subf %947, %950 : vector<16x128xf32>
    %952 = math.exp %951 : vector<16x128xf32>
    %cst_243 = arith.constant dense<0.000000e+00> : vector<16xf32>
    %953 = vector.multi_reduction <add>, %952, %cst_243 [1] : vector<16x128xf32> to vector<16xf32>
    %954 = vector.shape_cast %953 : vector<16xf32> to vector<16x1xf32>
    %955 = math.log %954 : vector<16x1xf32>
    %956 = arith.addf %949, %955 : vector<16x1xf32>
    %957 = vector.broadcast %956 : vector<16x1xf32> to vector<16x128xf32>
    %958 = arith.subf %947, %957 : vector<16x128xf32>
    %959 = tpu.iota {dimensions = array<i32: 1>} : vector<16x128xi32>
    %c0_244 = arith.constant 0 : index
    %c0_245 = arith.constant 0 : index
    %960 = vector.load %arg20[%c0_244, %c0_245] : memref<16x1xi32, #tpu.memory_space<vmem>>, vector<16x1xi32>
    %961 = vector.broadcast %960 : vector<16x1xi32> to vector<16x128xi32>
    %962 = arith.cmpi eq, %959, %961 : vector<16x128xi32>
    %963 = arith.extui %962 : vector<16x128xi1> to vector<16x128xi32>
    %964 = arith.sitofp %963 : vector<16x128xi32> to vector<16x128xf32>
    %965 = arith.mulf %958, %964 : vector<16x128xf32>
    %cst_246 = arith.constant dense<0.000000e+00> : vector<16xf32>
    %966 = vector.multi_reduction <add>, %965, %cst_246 [1] : vector<16x128xf32> to vector<16xf32>
    %967 = vector.shape_cast %966 : vector<16xf32> to vector<16x1xf32>
    %c0_247 = arith.constant 0 : index
    %c0_248 = arith.constant 0 : index
    %968 = vector.load %arg21[%c0_247, %c0_248] : memref<16x1xf32, #tpu.memory_space<vmem>>, vector<16x1xf32>
    %cst_249 = arith.constant 0.000000e+00 : f32
    %969 = vector.broadcast %cst_249 : f32 to vector<16x1xf32>
    %970 = arith.subf %969, %967 : vector<16x1xf32>
    %971 = arith.mulf %970, %968 : vector<16x1xf32>
    %972 = vector.shape_cast %971 : vector<16x1xf32> to vector<1x16x1xf32>
    %cst_250 = arith.constant dense<0.000000e+00> : vector<1xf32>
    %973 = vector.multi_reduction <add>, %972, %cst_250 [1, 2] : vector<1x16x1xf32> to vector<1xf32>
    %974 = vector.shape_cast %973 : vector<1xf32> to vector<1x1x1xf32>
    %975 = vector.extract %974[0, 0, 0] : f32 from vector<1x1x1xf32>
    %976 = vector.broadcast %975 : f32 to vector<1x1xf32>
    %977 = vector.shape_cast %968 : vector<16x1xf32> to vector<1x16x1xf32>
    %cst_251 = arith.constant dense<0.000000e+00> : vector<1xf32>
    %978 = vector.multi_reduction <add>, %977, %cst_251 [1, 2] : vector<1x16x1xf32> to vector<1xf32>
    %979 = vector.shape_cast %978 : vector<1xf32> to vector<1x1x1xf32>
    %980 = vector.extract %979[0, 0, 0] : f32 from vector<1x1x1xf32>
    %981 = vector.broadcast %980 : f32 to vector<1x1xf32>
    %982 = tpu.reciprocal %981 {approx = true} : vector<1x1xf32> -> vector<1x1xf32>
    %983 = arith.mulf %981, %982 : vector<1x1xf32>
    %cst_252 = arith.constant 2.000000e+00 : f32
    %984 = vector.broadcast %cst_252 : f32 to vector<1x1xf32>
    %985 = arith.subf %984, %983 : vector<1x1xf32>
    %986 = arith.mulf %982, %985 : vector<1x1xf32>
    %987 = arith.mulf %976, %986 : vector<1x1xf32>
    %c0_253 = arith.constant 0 : index
    %c0_254 = arith.constant 0 : index
    %988 = vector.load %arg22[%c0_253, %c0_254] : memref<1x1xf32, #tpu.memory_space<vmem>>, vector<1x1xf32>
    tpu.vector_store %arg22[%c0_253, %c0_254], %987 {strides = array<i32>} : memref<1x1xf32, #tpu.memory_space<vmem>>, vector<1x1xf32>,
    return
  }
}

</mosaic_0001>

<bundles_post_ra>
// kernel: bilstm_str_forward.1
= control target key start
LH: loop header
LB: loop body
LE: loop exit
PB: predicated region body
PF: predicated region fallthrough
CT: control target
= control target key end

     0   :  { %s5974_s0 = inlined_call_operand.vmem [shape: s32[16,1], index: 0, kind: input, shape index: {}]   ;;  %s5975_s1 = inlined_call_operand.vmem [shape: s32[16,1], index: 1, kind: input, shape index: {}]   ;;  %s5976_s2 = inlined_call_operand.vmem [shape: s32[16,1], index: 2, kind: input, shape index: {}]   ;;  %s5977_s3 = inlined_call_operand.vmem [shape: f32[50,16], index: 3, kind: input, shape index: {}]   ;;  %s5978_s4 = inlined_call_operand.vmem [shape: f32[2,4], index: 4, kind: input, shape index: {}]   ;;  %s5979_s5 = inlined_call_operand.vmem [shape: f32[4,4], index: 5, kind: input, shape index: {}]   ;;  %s5980_s6 = inlined_call_operand.vmem [shape: f32[24,256], index: 6, kind: input, shape index: {}]   ;;  %s5981_s7 = inlined_call_operand.vmem [shape: f32[1,256], index: 7, kind: input, shape index: {}]   ;;  %s5982_s8 = inlined_call_operand.vmem [shape: f32[64,256], index: 8, kind: input, shape index: {}]   ;;  %s5983_s9 = inlined_call_operand.vmem [shape: f32[16,16], index: 9, kind: input, shape index: {}]   ;;  %s5984_s10 = inlined_call_operand.vmem [shape: f32[1,16], index: 10, kind: input, shape index: {}]   ;;  %s5985_s11 = inlined_call_operand.vmem [shape: f32[16,16], index: 11, kind: input, shape index: {}]   ;;  %s5986_s12 = inlined_call_operand.vmem [shape: f32[1,16], index: 12, kind: input, shape index: {}]   ;;  %s5987_s13 = inlined_call_operand.vmem [shape: f32[16,16], index: 13, kind: input, shape index: {}]   ;;  %s5988_s14 = inlined_call_operand.vmem [shape: f32[1,16], index: 14, kind: input, shape index: {}]   ;;  %s5989_s15 = inlined_call_operand.vmem [shape: f32[1,48], index: 15, kind: input, shape index: {}]   ;;  %s5990_s16 = inlined_call_operand.vmem [shape: f32[144,48], index: 16, kind: input, shape index: {}]   ;;  %s5991_s17 = inlined_call_operand.vmem [shape: f32[1,48], index: 17, kind: input, shape index: {}]   ;;  %s5992_s18 = inlined_call_operand.vmem [shape: f32[48,128], index: 18, kind: input, shape index: {}]   ;;  %s5993_s19 = inlined_call_operand.vmem [shape: f32[1,128], index: 19, kind: input, shape index: {}]   ;;  %s5994_s20 = inlined_call_operand.vmem [shape: s32[16,1], index: 20, kind: input, shape index: {}]   ;;  %s5995_s21 = inlined_call_operand.vmem [shape: f32[16,1], index: 21, kind: input, shape index: {}]   ;;  %s5996_s22 = inlined_call_operand.hbm [shape: f32[1,1], index: 22, kind: output, shape index: {}]  }
   0x1   :  { %6002 = sst [smem:[#allocation5_spill]] %s5974_s0 }
   0x2   :  { %6003 = sst [smem:[#allocation6_spill]] %s5975_s1 }
   0x3   :  { %6004 = sst [smem:[#allocation7_spill]] %s5976_s2 }
   0x4   :  { %6005 = sst [smem:[#allocation8_spill]] %s5977_s3 }
   0x5   :  { %6006 = sst [smem:[#allocation9_spill]] %s5978_s4 }
   0x6   :  { %6007 = sst [smem:[#allocation10_spill]] %s5979_s5 }
   0x7   :  { %6008 = sst [smem:[#allocation11_spill]] %s5980_s6 }
   0x8   :  { %6009 = sst [smem:[#allocation12_spill]] %s5991_s17 }
   0x9   :  { %s6010_s29 = sld [smem:[#allocation6_spill]]  ;;  %vm102_vm0 = vcmask 1041408   ;;  %v4620_v2 = vmov 0  }
   0xa   :  { %s6011_s17 = sld [smem:[#allocation5_spill]]  ;;  %4310 = vset.pattern.permute.xlu1 %v4620_v2  ;;  %4309 = vset.pattern.permute.xlu0 %v4620_v2 }
   0xb   :  { %s6012_s1 = sld [smem:[#allocation8_spill]] }
   0xc   :  { %s6013_s28 = sld [smem:[#allocation9_spill]] }
   0xf   :  { %v181_v0 = vld [vmem:[%s6010_s29] sm:$0xff]  ;;  %v182_v5 = vld [vmem:[%s6010_s29 + $0x8] sm:$0xff] }
  0x10   :  { %v74_v1 = vld [vmem:[%s6011_s17] sm:$0xff]  ;;  %184 = vperm.xlu1 %4310, %v181_v0   ;;  %v75_v6 = vld [vmem:[%s6011_s17 + $0x8] sm:$0xff] }
  0x11   :  { %77 = vperm.xlu0 %4309, %v74_v1   ;;  %v94_v3 = vld [vmem:[%s6012_s1 + $0x30] sm:$0x3]  ;;  %v93_v4 = vld [vmem:[%s6012_s1 + $0x28] sm:$0xff]  ;;  %v92_v8 = vld [vmem:[%s6012_s1 + $0x20] sm:$0xff] }
  0x12   :  { %4181 = vmatprep.subr.msk.mxu1 %vm102_vm0, %v94_v3  ;;  %v195_v7 = vld [vmem:[%s6013_s28] sm:$0x3] }
  0x13   :  { %4182 = vmatpush3.msk.msra.mxu1 %vm102_vm0, %v94_v3  ;;  %4198 = vmatprep.subr.msk.mxu0 %vm102_vm0, %v195_v7 }
  0x14   :  { %4183 = vmatprep.subr.mxu1 %v93_v4 }
  0x15   :  { %27 = vsyncpa [#allocation3], 0  ;;  %187 = vperm.xlu1 %4310, %v182_v5   ;;  %80 = vperm.xlu0 %4309, %v75_v6   ;;  %s6014_s0 = sld [smem:[#allocation7_spill]]  ;;  %v91_v11 = vld [vmem:[%s6012_s1 + $0x18] sm:$0xff]  ;;  %v90_v12 = vld [vmem:[%s6012_s1 + $0x10] sm:$0xff]  ;;  %vm303_vm1 = vcmask 1043456   ;;  %v72_v16 = vlaneseq }
  0x16   :  { %4184 = vmatpush3.msra.mxu1 %v93_v4  ;;  %4199 = vmatpush3.msk.msra.mxu0 %vm102_vm0, %v195_v7  ;;  %v89_v13 = vld [vmem:[%s6012_s1 + $0x8] sm:$0xff]  ;;  %v88_v14 = vld [vmem:[%s6012_s1] sm:$0xff]  ;;  %s6015_s29 = sld [smem:[#allocation10_spill]]  ;;  %vm95_vm2 = vcmask 408576   ;;  %vm196_vm3 = vcmask 15360   ;;  %v4621_v20 = vmov 0.0  }
  0x17   :  { %4185 = vmatprep.subr.mxu1 %v92_v8  ;;  %v4809_v17 = vand.u32 127, %v72_v16  ;;  %vm296_vm8 = vcmask 31744   ;;  %v4847_v37 = vld [vmem:[%s5982_s8 + $0x78] sm:$0xff]  ;;  %v4853_v38 = vld [vmem:[%s5982_s8 + $0x70] sm:$0xff]  ;;  %v4860_v39 = vld [vmem:[%s5982_s8 + $0x68] sm:$0xff]  ;;  %s4622_s30 = smov 16  }
  0x18   :  { %4186 = vmatpush3.msra.mxu1 %v92_v8  ;;  %735 = vmatprep.subr.mxu0 %v4847_v37  ;;  %v4865_v40 = vld [vmem:[%s5982_s8 + $0x60] sm:$0xff]  ;;  %v4871_v41 = vld [vmem:[%s5982_s8 + $0x58] sm:$0xff]  ;;  %v4877_v44 = vld [vmem:[%s5982_s8 + $0x50] sm:$0xff]  ;;  %s4623_s26 = smov 20   ;;  %vm398_vm11 = vcmask 130048   ;;  %vm401_vm12 = vcmask 162816  }
  0x19   :  { %4187 = vmatprep.subr.mxu1 %v91_v11  ;;  %v4883_v45 = vld [vmem:[%s5982_s8 + $0x48] sm:$0xff]  ;;  %v4889_v48 = vld [vmem:[%s5982_s8 + $0x40] sm:$0xff]  ;;  %v4896_v49 = vld [vmem:[%s5982_s8 + $0x38] sm:$0xff]  ;;  %vm422_vm13 = vcmask 195584   ;;  %v4985_v6 = vshrl.u32 %v72_v16, 7  ;;  %s4625_s23 = smov 32  }
  0x1a   :  { %4188 = vmatpush3.msra.mxu1 %v91_v11  ;;  %v4902_v50 = vld [vmem:[%s5982_s8 + $0x30] sm:$0xff]  ;;  %v4908_v52 = vld [vmem:[%s5982_s8 + $0x28] sm:$0xff]  ;;  %v4914_v53 = vld [vmem:[%s5982_s8 + $0x20] sm:$0xff]  ;;  %vm701_vm14 = vcmask 1041409   ;;  %vm714_vm15 = vcmask 261120   ;;  %s6017_s24 = sld [smem:[#allocation12_spill]] }
  0x1b   :  { %v282_v9 = vld [vmem:[%s6014_s0 + $0x8] sm:$0xff]  ;;  %v281_v10 = vld [vmem:[%s6014_s0] sm:$0xff]  ;;  %4189 = vmatprep.subr.mxu1 %v90_v12  ;;  %s6016_s0 = sld [smem:[#allocation11_spill]]  ;;  %v4921_v55 = vld [vmem:[%s5982_s8 + $0x18] sm:$0xff]  ;;  %v4988_v8 = vsub.s32 0, %v4985_v6 }
  0x1c   :  { %287 = vperm.xlu1 %4310, %v282_v9   ;;  %284 = vperm.xlu0 %4309, %v281_v10   ;;  %v295_v15 = vld [vmem:[%s6015_s29] sm:$0xf]  ;;  %v4927_v56 = vld [vmem:[%s5982_s8 + $0x10] sm:$0xff]  ;;  %v4933_v57 = vld [vmem:[%s5982_s8 + $0x8] sm:$0xff]  ;;  %v4991_v9 = vsub.s32 1, %v4985_v6 }
  0x1d   :  { %4190 = vmatpush3.msra.mxu1 %v90_v12  ;;  %v4939_v58 = vld [vmem:[%s5982_s8] sm:$0xff] }
  0x1e   :  { %4191 = vmatprep.subr.mxu1 %v89_v13  ;;  %v410_v10 = vld [vmem:[%s5981_s7] sm:$0x3]  ;;  %s4624_s7 = smov 64  }
  0x1f   :  { %4192 = vmatpush3.msra.mxu1 %v89_v13  ;;  %v415_v12 = vrot.slane %v410_v10, %v4988_v8  ;;  %v419_v13 = vrot.slane %v410_v10, %v4991_v9 }
  0x20   :  { %4193 = vmatprep.subr.mxu1 %v88_v14 }
  0x21   :  { %4194 = vmatpush3.msra.mxu1 %v88_v14  ;;  %v409_v31 = vld [vmem:[%s6016_s0 + $0x28] sm:$0xff]  ;;  %v408_v32 = vld [vmem:[%s6016_s0 + $0x20] sm:$0xff]  ;;  %v407_v33 = vld [vmem:[%s6016_s0 + $0x18] sm:$0xff] }
  0x22   :  { %4203 = vmatprep.subr.msk.mxu1 %vm303_vm1, %v295_v15  ;;  %v406_v34 = vld [vmem:[%s6016_s0 + $0x10] sm:$0xff]  ;;  %v405_v35 = vld [vmem:[%s6016_s0 + $0x8] sm:$0xff]  ;;  %v404_v36 = vld [vmem:[%s6016_s0] sm:$0xff] }
  0x8b   :  { %v185_v18 = vpop.permute.xlu1 %184 }
  0x8c   :  { %v78_v19 = vpop.permute.xlu0 %77  ;;  %vm189_vm5 = vcmp.eq.s32.totalorder %v4809_v17, %v185_v18 }
  0x8d   :  { %vm82_vm4 = vcmp.eq.s32.totalorder %v4809_v17, %v78_v19  ;;  %v4078_v22 = vsel %vm189_vm5, 1.0, %v4621_v20  ;;  %vm1112_vm5 = vcmask 1043459  }
  0x8e   :  { %v4073_v21 = vsel %vm82_vm4, 1.0, %v4621_v20  ;;  %4200 = vmatprep.mubr.msk.f32.mxu0 %vm196_vm3, %v4078_v22  ;;  %vm2136_vm4 = vcmask 1040384  }
  0x8f   :  { %4195 = vmatprep.mubr.msk.f32.mxu1 %vm95_vm2, %v4073_v21 }
  0x90   :  { %v188_v23 = vpop.permute.xlu1 %187  ;;  %v81_v24 = vpop.permute.xlu0 %80 }
  0x91   :  { %vm190_vm6 = vcmp.eq.s32.totalorder %v4809_v17, %v188_v23  ;;  %vm83_vm7 = vcmp.eq.s32.totalorder %v4809_v17, %v81_v24 }
  0x92   :  { %v4079_v25 = vsel %vm190_vm6, 1.0, %v4621_v20  ;;  %v4074_v26 = vsel %vm83_vm7, 1.0, %v4621_v20  ;;  %vm2141_vm6 = vcmask 1042432   ;;  %vm1318_vm7 = vcmask 1044484  }
  0x93   :  { %4196 = vmatmul.mubr.msk.f32.vlgmr.msra.gmra.mxu1 %vm95_vm2, %v4074_v26  ;;  %4201 = vmatmul.mubr.msk.f32.vlgmr.msra.gmra.mxu0 %vm196_vm3, %v4079_v25  ;;  %vm522_vm2 = vcmask 523264   ;;  %vm906_vm3 = vcmask 1042434  }
  0x94   :  { %4204 = vmatpush3.msk.msra.mxu1 %vm303_vm1, %v295_v15  ;;  %783 = vmatprep.mubr.f32.mxu0 %v4621_v20 }
  0x95   :  { %455 = vmatprep.subr.mxu1 %v409_v31  ;;  %736 = vmatpush1.msra.mxu0 %v4853_v38 }
  0x96   :  { %737 = vmatprep.subr.mxu0 %v4860_v39 }
  0x97   :  { %v288_v27 = vpop.permute.xlu1 %287  ;;  %v285_v28 = vpop.permute.xlu0 %284  ;;  %738 = vmatpush1.msra.mxu0 %v4865_v40 }
  0x98   :  { %vm290_vm9 = vcmp.eq.s32.totalorder %v4809_v17, %v288_v27  ;;  %vm289_vm10 = vcmp.eq.s32.totalorder %v4809_v17, %v285_v28  ;;  %739 = vmatprep.subr.mxu0 %v4871_v41 }
  0x99   :  { %v4084_v29 = vsel %vm290_vm9, 1.0, %v4621_v20  ;;  %v4083_v30 = vsel %vm289_vm10, 1.0, %v4621_v20  ;;  %740 = vmatpush1.msra.mxu0 %v4877_v44  ;;  %vm2146_vm9 = vcmask 1044480   ;;  %vm1729_vm10 = vcmask 1046534  }
  0x9a   :  { %4205 = vmatprep.mubr.msk.f32.mxu1 %vm296_vm8, %v4083_v30  ;;  %741 = vmatprep.subr.mxu0 %v4883_v45 }
  0x9b   :  { %4206 = vmatmul.mubr.msk.f32.vlgmr.msra.gmra.mxu1 %vm296_vm8, %v4084_v29  ;;  %742 = vmatpush1.msra.mxu0 %v4889_v48  ;;  %vm1523_vm8 = vcmask 1045509  }
  0x9c   :  { %493 = vmatprep.mubr.f32.mxu1 %v4621_v20  ;;  %456 = vmatpush1.msra.mxu1 %v408_v32 }
  0x9d   :  { %457 = vmatprep.subr.mxu1 %v407_v33  ;;  %743 = vmatprep.subr.mxu0 %v4896_v49 }
  0x9e   :  { %458 = vmatpush1.msra.mxu1 %v406_v34  ;;  %744 = vmatpush1.msra.mxu0 %v4902_v50 }
  0x9f   :  { %459 = vmatprep.subr.mxu1 %v405_v35  ;;  %745 = vmatprep.subr.mxu0 %v4908_v52 }
  0xa0   :  { %460 = vmatpush1.msra.mxu1 %v404_v36  ;;  %746 = vmatpush1.msra.mxu0 %v4914_v53 }
  0xa1   :  { %542 = vmatprep.subr.mxu1 %v4847_v37  ;;  %747 = vmatprep.subr.mxu0 %v4921_v55 }
  0xa2   :  { %748 = vmatpush1.msra.mxu0 %v4927_v56 }
  0xa3   :  { %749 = vmatprep.subr.mxu0 %v4933_v57 }
  0xa4   :  { %750 = vmatpush1.msra.mxu0 %v4939_v58 }
  0xa5   :  { %1146 = vmatprep.subr.mxu0 %v4847_v37 }
 0x153   :  { %v4197_v42 = vpop.f32.mrf.mxu1  ;;  %v4202_v43 = vpop.f32.mrf.mxu0 }
 0x155   :  { %v172_v46 = vpop.f32.mrf.mxu1  ;;  %v272_v47 = vpop.f32.mrf.mxu0 }
 0x156   :  { %384 = vrot.lane.b32.xlu0 %v272_v47, %s4622_s30 }
 0x15a   :  { %386 = vrot.lane.b32.xlu0 %v4202_v43, %s4622_s30 }
 0x15b   :  { %v4207_v51 = vpop.f32.mrf.mxu1 }
 0x15d   :  { %v373_v54 = vpop.f32.mrf.mxu1 }
 0x15e   :  { %392 = vrot.lane.b32.xlu1 %v373_v54, %s4623_s26 }
 0x162   :  { %394 = vrot.lane.b32.xlu1 %v4207_v51, %s4623_s26 }
 0x1c8   :  { %v385_v59 = vpop.permute.xlu0 %384 }
 0x1c9   :  { %v399_v60 = vsel %vm398_vm11, %v172_v46, %v385_v59 }
 0x1cc   :  { %v387_v62 = vpop.permute.xlu0 %386 }
 0x1cd   :  { %v400_v0 = vsel %vm398_vm11, %v4197_v42, %v387_v62 }
 0x1d0   :  { %v393_v61 = vpop.permute.xlu1 %392 }
 0x1d1   :  { %v402_v63 = vsel %vm401_vm12, %v399_v60, %v393_v61 }
 0x1d2   :  { %4088 = vmatmul.mubr.msk.f32.vlgmr.msra.gmra.mxu1 %vm422_vm13, %v402_v63 }
 0x1d3   :  { %543 = vmatpush1.msra.mxu1 %v4853_v38  ;;  %499 = vmatprep.mubr.f32.mxu1 %v4621_v20 }
 0x1d4   :  { %544 = vmatprep.subr.mxu1 %v4860_v39  ;;  %v395_v1 = vpop.permute.xlu1 %394 }
 0x1d5   :  { %545 = vmatpush1.msra.mxu1 %v4865_v40  ;;  %v403_v3 = vsel %vm401_vm12, %v400_v0, %v395_v1  ;;  %vm2149_vm12 = vcmask 1045504  }
 0x1d6   :  { %546 = vmatprep.subr.mxu1 %v4871_v41  ;;  %4089 = vmatmul.mubr.msk.f32.gmra.mxu1 %vm422_vm13, %v403_v3 }
 0x1d7   :  { %547 = vmatpush1.msra.mxu1 %v4877_v44  ;;  %590 = vmatprep.mubr.f32.mxu1 %v4621_v20 }
 0x1d8   :  { %548 = vmatprep.subr.mxu1 %v4883_v45 }
 0x1d9   :  { %549 = vmatpush1.msra.mxu1 %v4889_v48 }
 0x1da   :  { %550 = vmatprep.subr.mxu1 %v4896_v49 }
 0x1db   :  { %551 = vmatpush1.msra.mxu1 %v4902_v50 }
 0x1dc   :  { %552 = vmatprep.subr.mxu1 %v4908_v52 }
 0x1dd   :  { %553 = vmatpush1.msra.mxu1 %v4914_v53 }
 0x1de   :  { %554 = vmatprep.subr.mxu1 %v4921_v55 }
 0x1df   :  { %555 = vmatpush1.msra.mxu1 %v4927_v56 }
 0x1e0   :  { %556 = vmatprep.subr.mxu1 %v4933_v57 }
 0x1e1   :  { %557 = vmatpush1.msra.mxu1 %v4939_v58 }
 0x1e2   :  { %591 = vmatmul.mubr.f32.vlgmr.msra.gmra.mxu1 %v4621_v20  ;;  %940 = vmatprep.subr.mxu1 %v4847_v37 }
 0x1e3   :  { %941 = vmatpush1.msra.mxu1 %v4853_v38  ;;  %988 = vmatprep.mubr.f32.mxu1 %v4621_v20 }
 0x1e4   :  { %942 = vmatprep.subr.mxu1 %v4860_v39 }
 0x1e5   :  { %943 = vmatpush1.msra.mxu1 %v4865_v40 }
 0x1e6   :  { %944 = vmatprep.subr.mxu1 %v4871_v41 }
 0x1e7   :  { %945 = vmatpush1.msra.mxu1 %v4877_v44 }
 0x1e8   :  { %946 = vmatprep.subr.mxu1 %v4883_v45 }
 0x1e9   :  { %947 = vmatpush1.msra.mxu1 %v4889_v48 }
 0x1ea   :  { %948 = vmatprep.subr.mxu1 %v4896_v49 }
 0x1eb   :  { %949 = vmatpush1.msra.mxu1 %v4902_v50 }
 0x1ec   :  { %950 = vmatprep.subr.mxu1 %v4908_v52 }
 0x1ed   :  { %951 = vmatpush1.msra.mxu1 %v4914_v53 }
 0x1ee   :  { %952 = vmatprep.subr.mxu1 %v4921_v55 }
 0x1ef   :  { %953 = vmatpush1.msra.mxu1 %v4927_v56 }
 0x1f0   :  { %954 = vmatprep.subr.mxu1 %v4933_v57 }
 0x1f1   :  { %955 = vmatpush1.msra.mxu1 %v4939_v58 }
 0x1f2   :  { %1351 = vmatprep.subr.mxu1 %v4847_v37 }
 0x292   :  { %v495_v4 = vpop.f32.mrf.mxu1 }
 0x293   :  { %v5006_v26 = vadd.f32 %v495_v4, %v415_v12 }
 0x294   :  { %v497_v5 = vpop.f32.mrf.mxu1 }
 0x295   :  { %v5000_v19 = vadd.f32 %v497_v5, %v419_v13 }
 0x296   :  { %v501_v7 = vpop.f32.mrf.mxu1 }
 0x297   :  { %v4998_v15 = vadd.f32 %v501_v7, %v415_v12 }
 0x298   :  { %v503_v11 = vpop.f32.mrf.mxu1 }
 0x299   :  { %v5003_v24 = vadd.f32 %v503_v11, %v419_v13 }
 0x2a2   :  { %v592_v14 = vpop.f32.mrf.mxu1 }
 0x2a3   :  { %v598_v16 = vrot.slane %v592_v14, 1  ;;  %v601_v28 = vadd.f32 %v592_v14, %v5006_v26 }
 0x2a4   :  { %v594_v18 = vpop.f32.mrf.mxu1 }
 0x2a5   :  { %v602_v21 = vadd.f32 %v598_v16, %v4998_v15  ;;  %v614_v22 = vrot.slane %v594_v18, 1  ;;  %v615_v23 = vrot.slane %v594_v18, 2  ;;  %v603_v36 = vmul.f32 0.5, %v601_v28 }
 0x2a7   :  { %v618_v25 = vadd.f32 %v614_v22, %v5000_v19  ;;  %4329 = vtanh.f32 %v602_v21  ;;  %v619_v27 = vadd.f32 %v615_v23, %v5003_v24  ;;  %v604_v33 = vmul.f32 0.5, %v602_v21 }
 0x2a9   :  { %4331 = vtanh.f32 %v618_v25  ;;  %v620_v34 = vmul.f32 0.5, %v618_v25  ;;  %v621_v35 = vmul.f32 0.5, %v619_v27 }
 0x2aa   :  { %4333 = vtanh.f32 %v619_v27 }
 0x2ab   :  { %4335 = vtanh.f32 %v601_v28 }
 0x2ac   :  { %4337 = vtanh.f32 %v604_v33 }
 0x2ad   :  { %4339 = vtanh.f32 %v620_v34 }
 0x2ae   :  { %4341 = vtanh.f32 %v621_v35 }
 0x2af   :  { %4343 = vtanh.f32 %v603_v36 }
 0x2b4   :  { %v4330_v29 = vpop.eup %4329 }
 0x2b5   :  { %636 = vrot.lane.b32.xlu0 %v4330_v29, %s4624_s7 }
 0x2b6   :  { %v4332_v30 = vpop.eup %4331 }
 0x2b7   :  { %668 = vrot.lane.b32.xlu1 %v4332_v30, %s4624_s7  ;;  %v4334_v31 = vpop.eup %4333 }
 0x2b8   :  { %v4336_v32 = vpop.eup %4335 }
 0x2b9   :  { %670 = vrot.lane.b32.xlu0 %v4334_v31, %s4624_s7  ;;  %v4338_v42 = vpop.eup %4337 }
 0x2ba   :  { %v4340_v43 = vpop.eup %4339  ;;  %v608_v46 = vadd.f32 1.0, %v4338_v42 }
 0x2bb   :  { %634 = vrot.lane.b32.xlu1 %v4336_v32, %s4624_s7  ;;  %v4342_v47 = vpop.eup %4341  ;;  %v624_v51 = vadd.f32 1.0, %v4340_v43 }
 0x2bc   :  { %v4344_v54 = vpop.eup %4343  ;;  %v610_v59 = vmul.f32 0.5, %v608_v46  ;;  %v625_v61 = vadd.f32 1.0, %v4342_v47 }
 0x2bd   :  { %v626_v63 = vmul.f32 0.5, %v624_v51  ;;  %v607_v0 = vadd.f32 1.0, %v4344_v54 }
 0x2be   :  { %v627_v4 = vmul.f32 0.5, %v625_v61  ;;  %v631_v13 = vmul.f32 0.0, %v610_v59 }
 0x2bf   :  { %v609_v7 = vmul.f32 0.5, %v607_v0  ;;  %v664_v18 = vmul.f32 0.0, %v626_v63 }
 0x2c0   :  { %v665_v23 = vmul.f32 0.0, %v627_v4 }
 0x2c1   :  { %v630_v27 = vmul.f32 0.0, %v609_v7 }
 0x327   :  { %v637_v60 = vpop.permute.xlu0 %636 }
 0x328   :  { %v641_v62 = vmul.f32 %v637_v60, %v610_v59 }
 0x329   :  { %v669_v1 = vpop.permute.xlu1 %668 }
 0x32a   :  { %v674_v3 = vmul.f32 %v669_v1, %v626_v63  ;;  %646 = vrot.lane.b32.xlu0 %v641_v62, %s4625_s23 }
 0x32b   :  { %v671_v5 = vpop.permute.xlu0 %670 }
 0x32c   :  { %678 = vrot.lane.b32.xlu1 %v674_v3, %s4625_s23  ;;  %v675_v10 = vmul.f32 %v671_v5, %v627_v4 }
 0x32d   :  { %v635_v11 = vpop.permute.xlu1 %634 }
 0x32e   :  { %v640_v12 = vmul.f32 %v635_v11, %v609_v7  ;;  %680 = vrot.lane.b32.xlu0 %v675_v10, %s4625_s23 }
 0x330   :  { %644 = vrot.lane.b32.xlu1 %v640_v12, %s4625_s23 }
 0x39c   :  { %v647_v14 = vpop.permute.xlu0 %646 }
 0x39d   :  { %v5018_v16 = vadd.f32 %v647_v14, %v631_v13 }
 0x39e   :  { %v679_v21 = vpop.permute.xlu1 %678 }
 0x39f   :  { %4345 = vtanh.f32 %v5018_v16  ;;  %v5021_v22 = vadd.f32 %v679_v21, %v664_v18 }
 0x3a0   :  { %v681_v25 = vpop.permute.xlu0 %680 }
 0x3a1   :  { %4347 = vtanh.f32 %v5021_v22  ;;  %v5024_v28 = vadd.f32 %v681_v25, %v665_v23 }
 0x3a2   :  { %v645_v29 = vpop.permute.xlu1 %644 }
 0x3a3   :  { %v5026_v30 = vadd.f32 %v645_v29, %v630_v27  ;;  %4349 = vtanh.f32 %v5024_v28 }
 0x3a5   :  { %4351 = vtanh.f32 %v5026_v30 }
 0x3ac   :  { %v4346_v31 = vpop.eup %4345 }
 0x3ad   :  { %658 = vrot.lane.b32.xlu0 %v4346_v31, %s4624_s7 }
 0x3ae   :  { %v4348_v32 = vpop.eup %4347 }
 0x3af   :  { %690 = vrot.lane.b32.xlu1 %v4348_v32, %s4624_s7 }
 0x3b0   :  { %v4350_v33 = vpop.eup %4349 }
 0x3b1   :  { %692 = vrot.lane.b32.xlu0 %v4350_v33, %s4624_s7 }
 0x3b2   :  { %v4352_v34 = vpop.eup %4351 }
 0x3b3   :  { %656 = vrot.lane.b32.xlu1 %v4352_v34, %s4624_s7 }
 0x41f   :  { %v659_v35 = vpop.permute.xlu0 %658 }
 0x420   :  { %v5034_v42 = vmul.f32 %v659_v35, %v610_v59 }
 0x421   :  { %v691_v36 = vpop.permute.xlu1 %690 }
 0x422   :  { %v5036_v43 = vmul.f32 %v691_v36, %v626_v63  ;;  %v700_v54 = vrot.slane %v5034_v42, 7 }
 0x423   :  { %v693_v46 = vpop.permute.xlu0 %692 }
 0x424   :  { %v5038_v47 = vmul.f32 %v693_v46, %v627_v4  ;;  %v708_v61 = vrot.slane %v5036_v43, 7 }
 0x425   :  { %v657_v51 = vpop.permute.xlu1 %656 }
 0x426   :  { %v5041_v60 = vmul.f32 %v657_v51, %v609_v7  ;;  %v709_v62 = vrot.slane %v5038_v47, 6 }
 0x428   :  { %v702_v0 = vsel %vm701_vm14, %v700_v54, %v5041_v60  ;;  %v710_v59 = vsel %vm701_vm14, %v709_v62, %v708_v61  ;;  %vm1934_vm14 = vcmask 1047559  }
 0x429   :  { %703 = vrot.lane.b32.xlu0 %v702_v0, %s4625_s23  ;;  %711 = vrot.lane.b32.xlu1 %v710_v59, %s4624_s7 }
 0x49b   :  { %v704_v63 = vpop.permute.xlu0 %703  ;;  %v712_v1 = vpop.permute.xlu1 %711 }
 0x49c   :  { %v715_v3 = vsel %vm714_vm15, %v704_v63, %v712_v1 }
 0x49d   :  { %4090 = vmatmul.mubr.msk.f32.vlgmr.msra.gmra.mxu0 %vm522_vm2, %v715_v3 }
 0x49e   :  { %1147 = vmatpush1.msra.mxu0 %v4853_v38  ;;  %1194 = vmatprep.mubr.f32.mxu0 %v4621_v20 }
 0x49f   :  { %1148 = vmatprep.subr.mxu0 %v4860_v39 }
 0x4a0   :  { %1149 = vmatpush1.msra.mxu0 %v4865_v40 }
 0x4a1   :  { %1150 = vmatprep.subr.mxu0 %v4871_v41 }
 0x4a2   :  { %1151 = vmatpush1.msra.mxu0 %v4877_v44 }
 0x4a3   :  { %1152 = vmatprep.subr.mxu0 %v4883_v45 }
 0x4a4   :  { %1153 = vmatpush1.msra.mxu0 %v4889_v48 }
 0x4a5   :  { %1154 = vmatprep.subr.mxu0 %v4896_v49 }
 0x4a6   :  { %1155 = vmatpush1.msra.mxu0 %v4902_v50 }
 0x4a7   :  { %1156 = vmatprep.subr.mxu0 %v4908_v52 }
 0x4a8   :  { %1157 = vmatpush1.msra.mxu0 %v4914_v53 }
 0x4a9   :  { %1158 = vmatprep.subr.mxu0 %v4921_v55 }
 0x4aa   :  { %1159 = vmatpush1.msra.mxu0 %v4927_v56 }
 0x4ab   :  { %1160 = vmatprep.subr.mxu0 %v4933_v57 }
 0x4ac   :  { %1161 = vmatpush1.msra.mxu0 %v4939_v58 }
 0x4ad   :  { %1557 = vmatprep.subr.mxu0 %v4847_v37 }
 0x55d   :  { %v785_v4 = vpop.f32.mrf.mxu0 }
 0x55e   :  { %v795_v5 = vadd.f32 %v785_v4, %v4998_v15  ;;  %v791_v11 = vrot.slane %v785_v4, 7 }
 0x55f   :  { %v787_v7 = vpop.f32.mrf.mxu0 }
 0x560   :  { %4353 = vtanh.f32 %v795_v5  ;;  %v807_v10 = vrot.slane %v787_v7, 2  ;;  %v808_v12 = vrot.slane %v787_v7, 3  ;;  %v794_v18 = vadd.f32 %v791_v11, %v5006_v26 }
 0x561   :  { %v797_v29 = vmul.f32 0.5, %v795_v5 }
 0x562   :  { %v811_v13 = vadd.f32 %v807_v10, %v5000_v19  ;;  %v812_v14 = vadd.f32 %v808_v12, %v5003_v24  ;;  %v796_v33 = vmul.f32 0.5, %v794_v18 }
 0x564   :  { %4355 = vtanh.f32 %v811_v13  ;;  %v813_v31 = vmul.f32 0.5, %v811_v13  ;;  %v814_v32 = vmul.f32 0.5, %v812_v14 }
 0x565   :  { %4357 = vtanh.f32 %v812_v14  ;;  %v826_v14 = vrot.slane %v5018_v16, 7 }
 0x566   :  { %4359 = vtanh.f32 %v794_v18 }
 0x567   :  { %4361 = vtanh.f32 %v797_v29  ;;  %v866_v29 = vrot.slane %v5024_v28, 1 }
 0x568   :  { %4363 = vtanh.f32 %v813_v31 }
 0x569   :  { %4365 = vtanh.f32 %v814_v32  ;;  %v825_v32 = vrot.slane %v5026_v30, 7 }
 0x56a   :  { %4367 = vtanh.f32 %v796_v33 }
 0x56d   :  { %v4354_v21 = vpop.eup %4353 }
 0x56e   :  { %835 = vrot.lane.b32.xlu0 %v4354_v21, %s4624_s7 }
 0x571   :  { %v4356_v23 = vpop.eup %4355 }
 0x572   :  { %873 = vrot.lane.b32.xlu1 %v4356_v23, %s4624_s7  ;;  %v4358_v25 = vpop.eup %4357 }
 0x573   :  { %v4360_v27 = vpop.eup %4359  ;;  %875 = vrot.lane.b32.xlu0 %v4358_v25, %s4624_s7  ;;  %v865_v25 = vrot.slane %v5021_v22, 1 }
 0x574   :  { %v4362_v34 = vpop.eup %4361 }
 0x575   :  { %v801_v35 = vadd.f32 1.0, %v4362_v34  ;;  %v4364_v36 = vpop.eup %4363 }
 0x576   :  { %833 = vrot.lane.b32.xlu1 %v4360_v27, %s4624_s7  ;;  %v4366_v51 = vpop.eup %4365  ;;  %v817_v61 = vadd.f32 1.0, %v4364_v36 }
 0x577   :  { %v803_v46 = vmul.f32 0.5, %v801_v35  ;;  %v4368_v62 = vpop.eup %4367  ;;  %v818_v59 = vadd.f32 1.0, %v4366_v51 }
 0x578   :  { %v819_v63 = vmul.f32 0.5, %v817_v61  ;;  %v800_v1 = vadd.f32 1.0, %v4368_v62 }
 0x579   :  { %v820_v5 = vmul.f32 0.5, %v818_v59  ;;  %v830_v18 = vmul.f32 %v826_v14, %v803_v46 }
 0x57a   :  { %v802_v10 = vmul.f32 0.5, %v800_v1  ;;  %v869_v27 = vmul.f32 %v865_v25, %v819_v63 }
 0x57b   :  { %v870_v34 = vmul.f32 %v866_v29, %v820_v5 }
 0x57c   :  { %v829_v16 = vmul.f32 %v825_v32, %v802_v10 }
 0x5e0   :  { %v836_v54 = vpop.permute.xlu0 %835 }
 0x5e1   :  { %v840_v0 = vmul.f32 %v836_v54, %v803_v46 }
 0x5e3   :  { %845 = vrot.lane.b32.xlu0 %v840_v0, %s4625_s23 }
 0x5e4   :  { %v874_v3 = vpop.permute.xlu1 %873 }
 0x5e5   :  { %v879_v4 = vmul.f32 %v874_v3, %v819_v63  ;;  %v876_v7 = vpop.permute.xlu0 %875 }
 0x5e6   :  { %v880_v11 = vmul.f32 %v876_v7, %v820_v5 }
 0x5e7   :  { %883 = vrot.lane.b32.xlu1 %v879_v4, %s4625_s23 }
 0x5e8   :  { %v834_v12 = vpop.permute.xlu1 %833  ;;  %885 = vrot.lane.b32.xlu0 %v880_v11, %s4625_s23 }
 0x5e9   :  { %v839_v13 = vmul.f32 %v834_v12, %v802_v10 }
 0x5eb   :  { %843 = vrot.lane.b32.xlu1 %v839_v13, %s4625_s23 }
 0x655   :  { %v846_v21 = vpop.permute.xlu0 %845 }
 0x656   :  { %v5080_v23 = vadd.f32 %v846_v21, %v830_v18 }
 0x658   :  { %4369 = vtanh.f32 %v5080_v23 }
 0x659   :  { %v884_v31 = vpop.permute.xlu1 %883 }
 0x65a   :  { %v5086_v33 = vadd.f32 %v884_v31, %v869_v27  ;;  %v886_v35 = vpop.permute.xlu0 %885 }
 0x65b   :  { %v5089_v36 = vadd.f32 %v886_v35, %v870_v34 }
 0x65c   :  { %4371 = vtanh.f32 %v5086_v33 }
 0x65d   :  { %v844_v51 = vpop.permute.xlu1 %843  ;;  %4373 = vtanh.f32 %v5089_v36 }
 0x65e   :  { %v5091_v54 = vadd.f32 %v844_v51, %v829_v16 }
 0x660   :  { %4375 = vtanh.f32 %v5091_v54 }
 0x665   :  { %v4370_v22 = vpop.eup %4369 }
 0x666   :  { %857 = vrot.lane.b32.xlu0 %v4370_v22, %s4624_s7 }
 0x669   :  { %v4372_v28 = vpop.eup %4371 }
 0x66a   :  { %895 = vrot.lane.b32.xlu1 %v4372_v28, %s4624_s7  ;;  %v4374_v30 = vpop.eup %4373 }
 0x66b   :  { %897 = vrot.lane.b32.xlu0 %v4374_v30, %s4624_s7 }
 0x66d   :  { %v4376_v61 = vpop.eup %4375 }
 0x66e   :  { %855 = vrot.lane.b32.xlu1 %v4376_v61, %s4624_s7 }
 0x6d8   :  { %v858_v62 = vpop.permute.xlu0 %857 }
 0x6d9   :  { %v5099_v59 = vmul.f32 %v858_v62, %v803_v46 }
 0x6db   :  { %v905_v12 = vrot.slane %v5099_v59, 7 }
 0x6dc   :  { %v896_v0 = vpop.permute.xlu1 %895 }
 0x6dd   :  { %v5101_v1 = vmul.f32 %v896_v0, %v819_v63  ;;  %v898_v3 = vpop.permute.xlu0 %897 }
 0x6de   :  { %v5103_v4 = vmul.f32 %v898_v3, %v820_v5 }
 0x6df   :  { %v913_v7 = vrot.slane %v5101_v1, 5 }
 0x6e0   :  { %v856_v11 = vpop.permute.xlu1 %855  ;;  %v914_v14 = vrot.slane %v5103_v4, 4 }
 0x6e1   :  { %v5107_v13 = vmul.f32 %v856_v11, %v802_v10 }
 0x6e2   :  { %v915_v21 = vsel %vm906_vm3, %v914_v14, %v913_v7 }
 0x6e3   :  { %v907_v18 = vsel %vm906_vm3, %v905_v12, %v5107_v13  ;;  %916 = vrot.lane.b32.xlu1 %v915_v21, %s4624_s7  ;;  %vm2777_vm3 = vcmp.eq.s32.totalorder %v4985_v6, %v4809_v17 }
 0x6e4   :  { %908 = vrot.lane.b32.xlu0 %v907_v18, %s4625_s23 }
 0x755   :  { %v917_v63 = vpop.permute.xlu1 %916 }
 0x756   :  { %v909_v46 = vpop.permute.xlu0 %908 }
 0x757   :  { %v919_v5 = vsel %vm714_vm15, %v909_v46, %v917_v63 }
 0x758   :  { %v921_v25 = vrot.slane %v919_v5, 1 }
 0x75a   :  { %4091 = vmatmul.mubr.msk.f32.vlgmr.msra.gmra.mxu1 %vm522_vm2, %v921_v25 }
 0x75b   :  { %1352 = vmatpush1.msra.mxu1 %v4853_v38  ;;  %1399 = vmatprep.mubr.f32.mxu1 %v4621_v20 }
 0x75c   :  { %1353 = vmatprep.subr.mxu1 %v4860_v39 }
 0x75d   :  { %1354 = vmatpush1.msra.mxu1 %v4865_v40 }
 0x75e   :  { %1355 = vmatprep.subr.mxu1 %v4871_v41 }
 0x75f   :  { %1356 = vmatpush1.msra.mxu1 %v4877_v44 }
 0x760   :  { %1357 = vmatprep.subr.mxu1 %v4883_v45 }
 0x761   :  { %1358 = vmatpush1.msra.mxu1 %v4889_v48 }
 0x762   :  { %1359 = vmatprep.subr.mxu1 %v4896_v49 }
 0x763   :  { %1360 = vmatpush1.msra.mxu1 %v4902_v50 }
 0x764   :  { %1361 = vmatprep.subr.mxu1 %v4908_v52 }
 0x765   :  { %1362 = vmatpush1.msra.mxu1 %v4914_v53 }
 0x766   :  { %1363 = vmatprep.subr.mxu1 %v4921_v55 }
 0x767   :  { %1364 = vmatpush1.msra.mxu1 %v4927_v56 }
 0x768   :  { %1365 = vmatprep.subr.mxu1 %v4933_v57 }
 0x769   :  { %1366 = vmatpush1.msra.mxu1 %v4939_v58 }
 0x76a   :  { %1763 = vmatprep.subr.mxu1 %v4847_v37 }
 0x81a   :  { %v990_v10 = vpop.f32.mrf.mxu1 }
 0x81b   :  { %v997_v27 = vrot.slane %v990_v10, 7  ;;  %v996_v35 = vrot.slane %v990_v10, 6 }
 0x81c   :  { %v992_v29 = vpop.f32.mrf.mxu1 }
 0x81d   :  { %v1001_v31 = vadd.f32 %v997_v27, %v4998_v15  ;;  %v1013_v32 = vrot.slane %v992_v29, 3  ;;  %v1014_v34 = vrot.slane %v992_v29, 4  ;;  %v1000_v22 = vadd.f32 %v996_v35, %v5006_v26 }
 0x81f   :  { %4377 = vtanh.f32 %v1001_v31  ;;  %v1017_v16 = vadd.f32 %v1013_v32, %v5000_v19  ;;  %v1018_v51 = vadd.f32 %v1014_v34, %v5003_v24  ;;  %v1003_v0 = vmul.f32 0.5, %v1001_v31 }
 0x820   :  { %v1002_v11 = vmul.f32 0.5, %v1000_v22 }
 0x821   :  { %4379 = vtanh.f32 %v1017_v16  ;;  %v1019_v3 = vmul.f32 0.5, %v1017_v16  ;;  %v1020_v7 = vmul.f32 0.5, %v1018_v51 }
 0x822   :  { %4381 = vtanh.f32 %v1018_v51 }
 0x823   :  { %4383 = vtanh.f32 %v1000_v22 }
 0x824   :  { %4385 = vtanh.f32 %v1003_v0 }
 0x825   :  { %4387 = vtanh.f32 %v1019_v3 }
 0x826   :  { %4389 = vtanh.f32 %v1020_v7  ;;  %v1071_v7 = vrot.slane %v5086_v33, 1 }
 0x827   :  { %4391 = vtanh.f32 %v1002_v11  ;;  %v1072_v11 = vrot.slane %v5089_v36, 1 }
 0x82c   :  { %v4378_v28 = vpop.eup %4377 }
 0x82d   :  { %1041 = vrot.lane.b32.xlu0 %v4378_v28, %s4624_s7 }
 0x82e   :  { %v4380_v30 = vpop.eup %4379 }
 0x82f   :  { %v4382_v61 = vpop.eup %4381  ;;  %1079 = vrot.lane.b32.xlu1 %v4380_v30, %s4624_s7 }
 0x830   :  { %v4384_v62 = vpop.eup %4383 }
 0x831   :  { %1081 = vrot.lane.b32.xlu0 %v4382_v61, %s4624_s7  ;;  %v4386_v12 = vpop.eup %4385  ;;  %v1032_v61 = vrot.slane %v5080_v23, 7 }
 0x832   :  { %v1007_v14 = vadd.f32 1.0, %v4386_v12  ;;  %v4388_v18 = vpop.eup %4387 }
 0x833   :  { %1039 = vrot.lane.b32.xlu1 %v4384_v62, %s4624_s7  ;;  %v4390_v21 = vpop.eup %4389  ;;  %v1023_v5 = vadd.f32 1.0, %v4388_v18 }
 0x834   :  { %v1009_v46 = vmul.f32 0.5, %v1007_v14  ;;  %v4392_v25 = vpop.eup %4391  ;;  %v1024_v27 = vadd.f32 1.0, %v4390_v21  ;;  %v1031_v21 = vrot.slane %v5091_v54, 7 }
 0x835   :  { %v1025_v29 = vmul.f32 0.5, %v1023_v5  ;;  %v1006_v31 = vadd.f32 1.0, %v4392_v25 }
 0x836   :  { %v1026_v34 = vmul.f32 0.5, %v1024_v27  ;;  %v1036_v62 = vmul.f32 %v1032_v61, %v1009_v46 }
 0x837   :  { %v1008_v22 = vmul.f32 0.5, %v1006_v31  ;;  %v1075_v12 = vmul.f32 %v1071_v7, %v1025_v29 }
 0x838   :  { %v1076_v18 = vmul.f32 %v1072_v11, %v1026_v34 }
 0x839   :  { %v1035_v23 = vmul.f32 %v1031_v21, %v1008_v22 }
 0x89f   :  { %v1042_v63 = vpop.permute.xlu0 %1041 }
 0x8a0   :  { %v1046_v10 = vmul.f32 %v1042_v63, %v1009_v46 }
 0x8a1   :  { %v1080_v32 = vpop.permute.xlu1 %1079 }
 0x8a2   :  { %1051 = vrot.lane.b32.xlu0 %v1046_v10, %s4625_s23  ;;  %v1085_v35 = vmul.f32 %v1080_v32, %v1025_v29 }
 0x8a3   :  { %v1082_v16 = vpop.permute.xlu0 %1081 }
 0x8a4   :  { %v1086_v51 = vmul.f32 %v1082_v16, %v1026_v34  ;;  %1089 = vrot.lane.b32.xlu1 %v1085_v35, %s4625_s23  ;;  %v2138_v16 = vsel %vm2136_vm4, %v5034_v42, %v5099_v59  ;;  %v2137_v42 = vsel %vm2136_vm4, %v5041_v60, %v5107_v13 }
 0x8a5   :  { %v1040_v28 = vpop.permute.xlu1 %1039 }
 0x8a6   :  { %1091 = vrot.lane.b32.xlu0 %v1086_v51, %s4625_s23  ;;  %v1045_v30 = vmul.f32 %v1040_v28, %v1008_v22 }
 0x8a8   :  { %1049 = vrot.lane.b32.xlu1 %v1045_v30, %s4625_s23 }
 0x914   :  { %v1052_v0 = vpop.permute.xlu0 %1051 }
 0x915   :  { %v5145_v3 = vadd.f32 %v1052_v0, %v1036_v62 }
 0x916   :  { %v1090_v14 = vpop.permute.xlu1 %1089 }
 0x917   :  { %4393 = vtanh.f32 %v5145_v3  ;;  %v5151_v63 = vadd.f32 %v1090_v14, %v1075_v12 }
 0x918   :  { %v1092_v5 = vpop.permute.xlu0 %1091 }
 0x919   :  { %v5153_v25 = vadd.f32 %v1092_v5, %v1076_v18  ;;  %4395 = vtanh.f32 %v5151_v63 }
 0x91a   :  { %v1050_v33 = vpop.permute.xlu1 %1049 }
 0x91b   :  { %4397 = vtanh.f32 %v5153_v25  ;;  %v5157_v10 = vadd.f32 %v1050_v33, %v1035_v23 }
 0x91d   :  { %4399 = vtanh.f32 %v5157_v10 }
 0x924   :  { %v4394_v36 = vpop.eup %4393 }
 0x925   :  { %1063 = vrot.lane.b32.xlu0 %v4394_v36, %s4624_s7 }
 0x926   :  { %v4396_v27 = vpop.eup %4395 }
 0x927   :  { %1101 = vrot.lane.b32.xlu1 %v4396_v27, %s4624_s7 }
 0x928   :  { %v4398_v54 = vpop.eup %4397 }
 0x929   :  { %1103 = vrot.lane.b32.xlu0 %v4398_v54, %s4624_s7 }
 0x92a   :  { %v4400_v31 = vpop.eup %4399 }
 0x92b   :  { %1061 = vrot.lane.b32.xlu1 %v4400_v31, %s4624_s7 }
 0x997   :  { %v1064_v32 = vpop.permute.xlu0 %1063 }
 0x998   :  { %v1068_v35 = vmul.f32 %v1064_v32, %v1009_v46 }
 0x999   :  { %v1102_v28 = vpop.permute.xlu1 %1101 }
 0x99a   :  { %v5168_v51 = vsel %vm102_vm0, %v2138_v16, %v1068_v35  ;;  %v5170_v30 = vmul.f32 %v1102_v28, %v1025_v29  ;;  %v1111_v46 = vrot.slane %v1068_v35, 7 }
 0x99b   :  { %v1104_v61 = vpop.permute.xlu0 %1103 }
 0x99c   :  { %v5172_v62 = vmul.f32 %v1104_v61, %v1026_v34  ;;  %v1119_v0 = vrot.slane %v5170_v30, 3 }
 0x99d   :  { %v1062_v11 = vpop.permute.xlu1 %1061 }
 0x99e   :  { %v1120_v7 = vrot.slane %v5172_v62, 2  ;;  %v1067_v12 = vmul.f32 %v1062_v11, %v1008_v22 }
 0x9a0   :  { %v1121_v59 = vsel %vm1112_vm5, %v1120_v7, %v1119_v0  ;;  %v5180_v14 = vsel %vm102_vm0, %v2137_v42, %v1067_v12  ;;  %v1113_v29 = vsel %vm1112_vm5, %v1111_v46, %v1067_v12  ;;  %vm2855_vm5 = vcmp.eq.s32.totalorder %v4985_v6, 0 }
 0x9a1   :  { %1122 = vrot.lane.b32.xlu1 %v1121_v59, %s4624_s7  ;;  %1114 = vrot.lane.b32.xlu0 %v1113_v29, %s4625_s23 }
 0xa13   :  { %v1123_v34 = vpop.permute.xlu1 %1122  ;;  %v1115_v18 = vpop.permute.xlu0 %1114 }
 0xa14   :  { %v1125_v21 = vsel %vm714_vm15, %v1115_v18, %v1123_v34  ;;  %v1238_v34 = vrot.slane %v5145_v3, 7 }
 0xa15   :  { %v1127_v5 = vrot.slane %v1125_v21, 2 }
 0xa17   :  { %4092 = vmatmul.mubr.msk.f32.vlgmr.msra.gmra.mxu0 %vm522_vm2, %v1127_v5  ;;  %v1237_v5 = vrot.slane %v5157_v10, 7 }
 0xa18   :  { %1558 = vmatpush1.msra.mxu0 %v4853_v38  ;;  %1605 = vmatprep.mubr.f32.mxu0 %v4621_v20 }
 0xa19   :  { %1559 = vmatprep.subr.mxu0 %v4860_v39 }
 0xa1a   :  { %1560 = vmatpush1.msra.mxu0 %v4865_v40 }
 0xa1b   :  { %1561 = vmatprep.subr.mxu0 %v4871_v41 }
 0xa1c   :  { %1562 = vmatpush1.msra.mxu0 %v4877_v44 }
 0xa1d   :  { %1563 = vmatprep.subr.mxu0 %v4883_v45 }
 0xa1e   :  { %1564 = vmatpush1.msra.mxu0 %v4889_v48 }
 0xa1f   :  { %1565 = vmatprep.subr.mxu0 %v4896_v49 }
 0xa20   :  { %1566 = vmatpush1.msra.mxu0 %v4902_v50 }
 0xa21   :  { %1567 = vmatprep.subr.mxu0 %v4908_v52 }
 0xa22   :  { %1568 = vmatpush1.msra.mxu0 %v4914_v53 }
 0xa23   :  { %1569 = vmatprep.subr.mxu0 %v4921_v55 }
 0xa24   :  { %1570 = vmatpush1.msra.mxu0 %v4927_v56 }
 0xa25   :  { %1571 = vmatprep.subr.mxu0 %v4933_v57 }
 0xa26   :  { %1572 = vmatpush1.msra.mxu0 %v4939_v58 }
 0xa27   :  { %1968 = vmatprep.subr.mxu0 %v4847_v37 }
 0xad7   :  { %v1196_v38 = vpop.f32.mrf.mxu0 }
 0xad8   :  { %v1203_v39 = vrot.slane %v1196_v38, 6  ;;  %v1202_v40 = vrot.slane %v1196_v38, 5 }
 0xad9   :  { %v1198_v41 = vpop.f32.mrf.mxu0 }
 0xada   :  { %v1207_v44 = vadd.f32 %v1203_v39, %v4998_v15  ;;  %v1219_v45 = vrot.slane %v1198_v41, 4  ;;  %v1206_v48 = vadd.f32 %v1202_v40, %v5006_v26  ;;  %v1220_v49 = vrot.slane %v1198_v41, 5 }
 0xadb   :  { %v1277_v39 = vrot.slane %v5151_v63, 1 }
 0xadc   :  { %4401 = vtanh.f32 %v1207_v44  ;;  %v1223_v50 = vadd.f32 %v1219_v45, %v5000_v19  ;;  %v1224_v52 = vadd.f32 %v1220_v49, %v5003_v24  ;;  %v1209_v57 = vmul.f32 0.5, %v1207_v44 }
 0xadd   :  { %4403 = vtanh.f32 %v1206_v48  ;;  %v1208_v58 = vmul.f32 0.5, %v1206_v48  ;;  %v1278_v49 = vrot.slane %v5153_v25, 1 }
 0xade   :  { %4405 = vtanh.f32 %v1223_v50  ;;  %v1225_v60 = vmul.f32 0.5, %v1223_v50  ;;  %v1226_v13 = vmul.f32 0.5, %v1224_v52 }
 0xadf   :  { %4407 = vtanh.f32 %v1224_v52 }
 0xae0   :  { %4409 = vtanh.f32 %v1209_v57 }
 0xae1   :  { %4411 = vtanh.f32 %v1208_v58 }
 0xae2   :  { %4413 = vtanh.f32 %v1225_v60 }
 0xae3   :  { %4415 = vtanh.f32 %v1226_v13 }
 0xae9   :  { %v4402_v53 = vpop.eup %4401 }
 0xaea   :  { %1247 = vrot.lane.b32.xlu0 %v4402_v53, %s4624_s7  ;;  %v4404_v37 = vpop.eup %4403 }
 0xaeb   :  { %v4406_v55 = vpop.eup %4405 }
 0xaec   :  { %1285 = vrot.lane.b32.xlu1 %v4406_v55, %s4624_s7  ;;  %v4408_v56 = vpop.eup %4407 }
 0xaed   :  { %v4410_v22 = vpop.eup %4409 }
 0xaee   :  { %1245 = vrot.lane.b32.xlu0 %v4404_v37, %s4624_s7  ;;  %v1213_v23 = vadd.f32 1.0, %v4410_v22  ;;  %v4412_v33 = vpop.eup %4411 }
 0xaef   :  { %v4414_v36 = vpop.eup %4413  ;;  %v1212_v54 = vadd.f32 1.0, %v4412_v33 }
 0xaf0   :  { %1287 = vrot.lane.b32.xlu1 %v4408_v56, %s4624_s7  ;;  %v1215_v27 = vmul.f32 0.5, %v1213_v23  ;;  %v1229_v32 = vadd.f32 1.0, %v4414_v36  ;;  %v4416_v35 = vpop.eup %4415 }
 0xaf1   :  { %v1214_v28 = vmul.f32 0.5, %v1212_v54  ;;  %v1230_v7 = vadd.f32 1.0, %v4416_v35 }
 0xaf2   :  { %v1231_v61 = vmul.f32 0.5, %v1229_v32  ;;  %v1242_v18 = vmul.f32 %v1238_v34, %v1215_v27  ;;  %v5317_v34 = vld [vmem:[%s5982_s8 + $0x20] sm:$0xff] }
 0xaf3   :  { %v1232_v42 = vmul.f32 0.5, %v1230_v7  ;;  %v1241_v40 = vmul.f32 %v1237_v5, %v1214_v28  ;;  %v5275_v7 = vld [vmem:[%s5982_s8 + $0x58] sm:$0xff]  ;;  %v5335_v5 = vld [vmem:[%s5982_s8 + $0x8] sm:$0xff] }
 0xaf4   :  { %v1281_v41 = vmul.f32 %v1277_v39, %v1231_v61  ;;  %v5341_v39 = vld [vmem:[%s5982_s8] sm:$0xff] }
 0xaf5   :  { %v1282_v3 = vmul.f32 %v1278_v49, %v1232_v42 }
 0xb5c   :  { %v1248_v31 = vpop.permute.xlu0 %1247 }
 0xb5d   :  { %v1252_v16 = vmul.f32 %v1248_v31, %v1215_v27 }
 0xb5e   :  { %v1286_v11 = vpop.permute.xlu1 %1285 }
 0xb5f   :  { %1257 = vrot.lane.b32.xlu0 %v1252_v16, %s4625_s23  ;;  %v1291_v12 = vmul.f32 %v1286_v11, %v1231_v61  ;;  %v5281_v11 = vld [vmem:[%s5982_s8 + $0x50] sm:$0xff] }
 0xb60   :  { %v1246_v0 = vpop.permute.xlu0 %1245 }
 0xb61   :  { %v1251_v46 = vmul.f32 %v1246_v0, %v1214_v28  ;;  %1295 = vrot.lane.b32.xlu1 %v1291_v12, %s4625_s23  ;;  %v5269_v0 = vld [vmem:[%s5982_s8 + $0x60] sm:$0xff] }
 0xb62   :  { %v1288_v59 = vpop.permute.xlu1 %1287  ;;  %v5293_v12 = vld [vmem:[%s5982_s8 + $0x40] sm:$0xff] }
 0xb63   :  { %1255 = vrot.lane.b32.xlu0 %v1251_v46, %s4625_s23  ;;  %v1292_v29 = vmul.f32 %v1288_v59, %v1232_v42  ;;  %v5287_v46 = vld [vmem:[%s5982_s8 + $0x48] sm:$0xff]  ;;  %v5305_v59 = vld [vmem:[%s5982_s8 + $0x30] sm:$0xff] }
 0xb65   :  { %1297 = vrot.lane.b32.xlu1 %v1292_v29, %s4625_s23  ;;  %v5311_v29 = vld [vmem:[%s5982_s8 + $0x28] sm:$0xff] }
 0xbd1   :  { %v1258_v21 = vpop.permute.xlu0 %1257 }
 0xbd2   :  { %v5217_v38 = vadd.f32 %v1258_v21, %v1242_v18  ;;  %v5323_v18 = vld [vmem:[%s5982_s8 + $0x18] sm:$0xff]  ;;  %v5329_v21 = vld [vmem:[%s5982_s8 + $0x10] sm:$0xff] }
 0xbd3   :  { %v1296_v45 = vpop.permute.xlu1 %1295 }
 0xbd4   :  { %4417 = vtanh.f32 %v5217_v38  ;;  %v5224_v50 = vadd.f32 %v1296_v45, %v1281_v41 }
 0xbd5   :  { %v1256_v44 = vpop.permute.xlu0 %1255 }
 0xbd6   :  { %v5221_v48 = vadd.f32 %v1256_v44, %v1241_v40 }
 0xbd7   :  { %v1298_v10 = vpop.permute.xlu1 %1297 }
 0xbd8   :  { %4419 = vtanh.f32 %v5221_v48  ;;  %v5228_v52 = vadd.f32 %v1298_v10, %v1282_v3 }
 0xbd9   :  { %4421 = vtanh.f32 %v5224_v50 }
 0xbda   :  { %4423 = vtanh.f32 %v5228_v52 }
 0xbe1   :  { %v4418_v63 = vpop.eup %4417 }
 0xbe2   :  { %1269 = vrot.lane.b32.xlu0 %v4418_v63, %s4624_s7 }
 0xbe5   :  { %v4420_v53 = vpop.eup %4419 }
 0xbe6   :  { %v4422_v37 = vpop.eup %4421  ;;  %1267 = vrot.lane.b32.xlu0 %v4420_v53, %s4624_s7 }
 0xbe7   :  { %1307 = vrot.lane.b32.xlu1 %v4422_v37, %s4624_s7  ;;  %v4424_v25 = vpop.eup %4423 }
 0xbeb   :  { %1309 = vrot.lane.b32.xlu1 %v4424_v25, %s4624_s7 }
 0xc54   :  { %v1270_v55 = vpop.permute.xlu0 %1269 }
 0xc55   :  { %v1274_v56 = vmul.f32 %v1270_v55, %v1215_v27 }
 0xc57   :  { %v5237_v57 = vsel %vm2141_vm6, %v5168_v51, %v1274_v56  ;;  %v1317_v60 = vrot.slane %v1274_v56, 7 }
 0xc58   :  { %v1268_v58 = vpop.permute.xlu0 %1267 }
 0xc59   :  { %v1308_v13 = vpop.permute.xlu1 %1307  ;;  %v1273_v22 = vmul.f32 %v1268_v58, %v1214_v28 }
 0xc5a   :  { %v5239_v23 = vmul.f32 %v1308_v13, %v1231_v61  ;;  %v5263_v61 = vld [vmem:[%s5982_s8 + $0x68] sm:$0xff] }
 0xc5b   :  { %v5243_v33 = vsel %vm2141_vm6, %v5180_v14, %v1273_v22  ;;  %v1319_v36 = vsel %vm1318_vm7, %v1317_v60, %v1273_v22  ;;  %v5256_v14 = vld [vmem:[%s5982_s8 + $0x70] sm:$0xff] }
 0xc5c   :  { %1320 = vrot.lane.b32.xlu0 %v1319_v36, %s4625_s23  ;;  %v1325_v27 = vrot.slane %v5239_v23, 1 }
 0xc5d   :  { %v1310_v54 = vpop.permute.xlu1 %1309 }
 0xc5e   :  { %v5247_v31 = vmul.f32 %v1310_v54, %v1232_v42  ;;  %v5299_v42 = vld [vmem:[%s5982_s8 + $0x38] sm:$0xff] }
 0xc60   :  { %v1326_v51 = vsel %vm1318_vm7, %v5247_v31, %v1325_v27  ;;  %vm2989_vm7 = vcmp.eq.s32.totalorder %v4985_v6, 2 }
 0xc61   :  { %1327 = vrot.lane.b32.xlu1 %v1326_v51, %s4624_s7 }
 0xcce   :  { %v1321_v32 = vpop.permute.xlu0 %1320 }
 0xcd3   :  { %v1328_v35 = vpop.permute.xlu1 %1327 }
 0xcd4   :  { %v1330_v16 = vsel %vm714_vm15, %v1321_v32, %v1328_v35 }
 0xcd5   :  { %v1332_v28 = vrot.slane %v1330_v16, 3 }
 0xcd7   :  { %4093 = vmatmul.mubr.msk.f32.vlgmr.msra.gmra.mxu1 %vm522_vm2, %v1332_v28 }
 0xcd8   :  { %1764 = vmatpush1.msra.mxu1 %v5256_v14  ;;  %1811 = vmatprep.mubr.f32.mxu1 %v4621_v20 }
 0xcd9   :  { %1765 = vmatprep.subr.mxu1 %v5263_v61 }
 0xcda   :  { %1766 = vmatpush1.msra.mxu1 %v5269_v0 }
 0xcdb   :  { %1767 = vmatprep.subr.mxu1 %v5275_v7 }
 0xcdc   :  { %1768 = vmatpush1.msra.mxu1 %v5281_v11 }
 0xcdd   :  { %1769 = vmatprep.subr.mxu1 %v5287_v46 }
 0xcde   :  { %1770 = vmatpush1.msra.mxu1 %v5293_v12 }
 0xcdf   :  { %1771 = vmatprep.subr.mxu1 %v5299_v42 }
 0xce0   :  { %1772 = vmatpush1.msra.mxu1 %v5305_v59 }
 0xce1   :  { %1773 = vmatprep.subr.mxu1 %v5311_v29 }
 0xce2   :  { %1774 = vmatpush1.msra.mxu1 %v5317_v34 }
 0xce3   :  { %1775 = vmatprep.subr.mxu1 %v5323_v18 }
 0xce4   :  { %1776 = vmatpush1.msra.mxu1 %v5329_v21 }
 0xce5   :  { %1777 = vmatprep.subr.mxu1 %v5335_v5 }
 0xce6   :  { %1778 = vmatpush1.msra.mxu1 %v5341_v39 }
 0xd97   :  { %v1401_v40 = vpop.f32.mrf.mxu1 }
 0xd98   :  { %v1408_v41 = vrot.slane %v1401_v40, 5  ;;  %v1407_v10 = vrot.slane %v1401_v40, 4 }
 0xd99   :  { %v1403_v44 = vpop.f32.mrf.mxu1 }
 0xd9a   :  { %v1412_v45 = vadd.f32 %v1408_v41, %v4998_v15  ;;  %v1424_v49 = vrot.slane %v1403_v44, 5  ;;  %v1425_v3 = vrot.slane %v1403_v44, 6  ;;  %v1411_v37 = vadd.f32 %v1407_v10, %v5006_v26 }
 0xd9c   :  { %4425 = vtanh.f32 %v1412_v45  ;;  %v1428_v63 = vadd.f32 %v1424_v49, %v5000_v19  ;;  %v1429_v53 = vadd.f32 %v1425_v3, %v5003_v24  ;;  %v1414_v60 = vmul.f32 0.5, %v1412_v45 }
 0xd9d   :  { %v1413_v36 = vmul.f32 0.5, %v1411_v37 }
 0xd9e   :  { %4427 = vtanh.f32 %v1428_v63  ;;  %v1430_v13 = vmul.f32 0.5, %v1428_v63  ;;  %v1431_v22 = vmul.f32 0.5, %v1429_v53 }
 0xd9f   :  { %4429 = vtanh.f32 %v1429_v53 }
 0xda0   :  { %4431 = vtanh.f32 %v1411_v37 }
 0xda1   :  { %4433 = vtanh.f32 %v1414_v60 }
 0xda2   :  { %4435 = vtanh.f32 %v1430_v13 }
 0xda3   :  { %4437 = vtanh.f32 %v1431_v22 }
 0xda4   :  { %4439 = vtanh.f32 %v1413_v36  ;;  %v1482_v36 = vrot.slane %v5224_v50, 1 }
 0xda9   :  { %v4426_v25 = vpop.eup %4425 }
 0xdaa   :  { %1452 = vrot.lane.b32.xlu0 %v4426_v25, %s4624_s7 }
 0xdab   :  { %v4428_v55 = vpop.eup %4427 }
 0xdac   :  { %v4430_v56 = vpop.eup %4429  ;;  %1490 = vrot.lane.b32.xlu1 %v4428_v55, %s4624_s7 }
 0xdad   :  { %v4432_v58 = vpop.eup %4431 }
 0xdae   :  { %1492 = vrot.lane.b32.xlu0 %v4430_v56, %s4624_s7  ;;  %v4434_v54 = vpop.eup %4433 }
 0xdaf   :  { %v1418_v27 = vadd.f32 1.0, %v4434_v54  ;;  %v4436_v51 = vpop.eup %4435  ;;  %v1483_v54 = vrot.slane %v5228_v52, 1 }
 0xdb0   :  { %1450 = vrot.lane.b32.xlu1 %v4432_v58, %s4624_s7  ;;  %v4438_v32 = vpop.eup %4437  ;;  %v1434_v28 = vadd.f32 1.0, %v4436_v51  ;;  %v1443_v58 = vrot.slane %v5217_v38, 7 }
 0xdb1   :  { %v1420_v35 = vmul.f32 0.5, %v1418_v27  ;;  %v4440_v40 = vpop.eup %4439  ;;  %v1435_v44 = vadd.f32 1.0, %v4438_v32 }
 0xdb2   :  { %v1436_v45 = vmul.f32 0.5, %v1434_v28  ;;  %v1417_v49 = vadd.f32 1.0, %v4440_v40 }
 0xdb3   :  { %v1437_v10 = vmul.f32 0.5, %v1435_v44  ;;  %v1447_v60 = vmul.f32 %v1443_v58, %v1420_v35 }
 0xdb4   :  { %v1419_v25 = vmul.f32 0.5, %v1417_v49  ;;  %v1486_v27 = vmul.f32 %v1482_v36, %v1436_v45 }
 0xdb5   :  { %v1487_v32 = vmul.f32 %v1483_v54, %v1437_v10 }
 0xe1c   :  { %v1453_v16 = vpop.permute.xlu0 %1452 }
 0xe1d   :  { %v1457_v41 = vmul.f32 %v1453_v16, %v1420_v35  ;;  %v1442_v16 = vrot.slane %v5221_v48, 7 }
 0xe1e   :  { %v1491_v3 = vpop.permute.xlu1 %1490 }
 0xe1f   :  { %1462 = vrot.lane.b32.xlu0 %v1457_v41, %s4625_s23  ;;  %v1496_v63 = vmul.f32 %v1491_v3, %v1436_v45  ;;  %v1446_v38 = vmul.f32 %v1442_v16, %v1419_v25 }
 0xe20   :  { %v1493_v53 = vpop.permute.xlu0 %1492 }
 0xe21   :  { %v1497_v37 = vmul.f32 %v1493_v53, %v1437_v10  ;;  %1500 = vrot.lane.b32.xlu1 %v1496_v63, %s4625_s23 }
 0xe22   :  { %v1451_v55 = vpop.permute.xlu1 %1450 }
 0xe23   :  { %1502 = vrot.lane.b32.xlu0 %v1497_v37, %s4625_s23  ;;  %v1456_v56 = vmul.f32 %v1451_v55, %v1419_v25 }
 0xe25   :  { %1460 = vrot.lane.b32.xlu1 %v1456_v56, %s4625_s23 }
 0xe91   :  { %v1463_v13 = vpop.permute.xlu0 %1462 }
 0xe92   :  { %v5357_v22 = vadd.f32 %v1463_v13, %v1447_v60 }
 0xe93   :  { %v1501_v51 = vpop.permute.xlu1 %1500 }
 0xe94   :  { %4441 = vtanh.f32 %v5357_v22  ;;  %v5363_v28 = vadd.f32 %v1501_v51, %v1486_v27 }
 0xe95   :  { %v1503_v40 = vpop.permute.xlu0 %1502 }
 0xe96   :  { %v5365_v41 = vadd.f32 %v1503_v40, %v1487_v32  ;;  %4443 = vtanh.f32 %v5363_v28 }
 0xe97   :  { %v1461_v50 = vpop.permute.xlu1 %1460 }
 0xe98   :  { %4445 = vtanh.f32 %v5365_v41  ;;  %v5369_v44 = vadd.f32 %v1461_v50, %v1446_v38 }
 0xe9a   :  { %4447 = vtanh.f32 %v5369_v44 }
 0xea1   :  { %v4442_v52 = vpop.eup %4441 }
 0xea2   :  { %1474 = vrot.lane.b32.xlu0 %v4442_v52, %s4624_s7 }
 0xea3   :  { %v4444_v49 = vpop.eup %4443 }
 0xea4   :  { %1512 = vrot.lane.b32.xlu1 %v4444_v49, %s4624_s7 }
 0xea5   :  { %v4446_v48 = vpop.eup %4445 }
 0xea6   :  { %1514 = vrot.lane.b32.xlu0 %v4446_v48, %s4624_s7 }
 0xea7   :  { %v4448_v3 = vpop.eup %4447 }
 0xea8   :  { %1472 = vrot.lane.b32.xlu1 %v4448_v3, %s4624_s7 }
 0xf14   :  { %v1475_v63 = vpop.permute.xlu0 %1474 }
 0xf15   :  { %v1479_v53 = vmul.f32 %v1475_v63, %v1420_v35 }
 0xf16   :  { %v1513_v55 = vpop.permute.xlu1 %1512 }
 0xf17   :  { %v5378_v37 = vsel %vm303_vm1, %v5237_v57, %v1479_v53  ;;  %v5380_v56 = vmul.f32 %v1513_v55, %v1436_v45  ;;  %v1522_v27 = vrot.slane %v1479_v53, 7 }
 0xf18   :  { %v1515_v58 = vpop.permute.xlu0 %1514 }
 0xf19   :  { %v5382_v60 = vmul.f32 %v1515_v58, %v1437_v10  ;;  %v1530_v13 = vrot.slane %v5380_v56, 7 }
 0xf1a   :  { %v1473_v54 = vpop.permute.xlu1 %1472 }
 0xf1b   :  { %v1531_v36 = vrot.slane %v5382_v60, 6  ;;  %v1478_v51 = vmul.f32 %v1473_v54, %v1419_v25 }
 0xf1d   :  { %v1532_v32 = vsel %vm1523_vm8, %v1531_v36, %v1530_v13  ;;  %v5388_v35 = vsel %vm303_vm1, %v5243_v33, %v1478_v51  ;;  %v1524_v57 = vsel %vm1523_vm8, %v1522_v27, %v1478_v51  ;;  %vm3038_vm8 = vcmp.eq.s32.totalorder %v4985_v6, 3 }
 0xf1e   :  { %1533 = vrot.lane.b32.xlu1 %v1532_v32, %s4624_s7  ;;  %1525 = vrot.lane.b32.xlu0 %v1524_v57, %s4625_s23 }
 0xf90   :  { %v1534_v45 = vpop.permute.xlu1 %1533  ;;  %v1526_v10 = vpop.permute.xlu0 %1525 }
 0xf91   :  { %v1536_v16 = vsel %vm714_vm15, %v1526_v10, %v1534_v45 }
 0xf92   :  { %v1538_v40 = vrot.slane %v1536_v16, 4 }
 0xf94   :  { %4094 = vmatmul.mubr.msk.f32.vlgmr.msra.gmra.mxu0 %vm522_vm2, %v1538_v40 }
 0xf95   :  { %1969 = vmatpush1.msra.mxu0 %v5256_v14  ;;  %2016 = vmatprep.mubr.f32.mxu0 %v4621_v20 }
 0xf96   :  { %1970 = vmatprep.subr.mxu0 %v5263_v61 }
 0xf97   :  { %1971 = vmatpush1.msra.mxu0 %v5269_v0 }
 0xf98   :  { %1972 = vmatprep.subr.mxu0 %v5275_v7 }
 0xf99   :  { %1973 = vmatpush1.msra.mxu0 %v5281_v11 }
 0xf9a   :  { %1974 = vmatprep.subr.mxu0 %v5287_v46 }
 0xf9b   :  { %1975 = vmatpush1.msra.mxu0 %v5293_v12 }
 0xf9c   :  { %1976 = vmatprep.subr.mxu0 %v5299_v42 }
 0xf9d   :  { %1977 = vmatpush1.msra.mxu0 %v5305_v59 }
 0xf9e   :  { %1978 = vmatprep.subr.mxu0 %v5311_v29 }
 0xf9f   :  { %1979 = vmatpush1.msra.mxu0 %v5317_v34 }
 0xfa0   :  { %1980 = vmatprep.subr.mxu0 %v5323_v18 }
 0xfa1   :  { %1981 = vmatpush1.msra.mxu0 %v5329_v21 }
 0xfa2   :  { %1982 = vmatprep.subr.mxu0 %v5335_v5 }
 0xfa3   :  { %1983 = vmatpush1.msra.mxu0 %v5341_v39 }
0x1054   :  { %v1607_v33 = vpop.f32.mrf.mxu0 }
0x1055   :  { %v1614_v14 = vrot.slane %v1607_v33, 4  ;;  %v1613_v46 = vrot.slane %v1607_v33, 3  ;;  %v1649_v33 = vrot.slane %v5357_v22, 7 }
0x1056   :  { %v1609_v61 = vpop.f32.mrf.mxu0 }
0x1057   :  { %v1618_v0 = vadd.f32 %v1614_v14, %v4998_v15  ;;  %v1630_v7 = vrot.slane %v1609_v61, 6  ;;  %v1631_v11 = vrot.slane %v1609_v61, 7  ;;  %v1617_v59 = vadd.f32 %v1613_v46, %v5006_v26 }
0x1059   :  { %4449 = vtanh.f32 %v1618_v0  ;;  %v1634_v12 = vadd.f32 %v1630_v7, %v5000_v19  ;;  %v1635_v42 = vadd.f32 %v1631_v11, %v5003_v24  ;;  %v1620_v5 = vmul.f32 0.5, %v1618_v0 }
0x105a   :  { %v1619_v38 = vmul.f32 0.5, %v1617_v59  ;;  %v1688_v7 = vrot.slane %v5363_v28, 1  ;;  %v1689_v11 = vrot.slane %v5365_v41, 1 }
0x105b   :  { %4451 = vtanh.f32 %v1634_v12  ;;  %v1636_v39 = vmul.f32 0.5, %v1634_v12  ;;  %v1637_v25 = vmul.f32 0.5, %v1635_v42 }
0x105c   :  { %4453 = vtanh.f32 %v1635_v42 }
0x105d   :  { %4455 = vtanh.f32 %v1617_v59  ;;  %v1648_v59 = vrot.slane %v5369_v44, 7 }
0x105e   :  { %4457 = vtanh.f32 %v1620_v5 }
0x105f   :  { %4459 = vtanh.f32 %v1636_v39 }
0x1060   :  { %4461 = vtanh.f32 %v1637_v25 }
0x1061   :  { %4463 = vtanh.f32 %v1619_v38 }
0x1066   :  { %v4450_v29 = vpop.eup %4449 }
0x1067   :  { %1658 = vrot.lane.b32.xlu0 %v4450_v29, %s4624_s7 }
0x1068   :  { %v4452_v34 = vpop.eup %4451 }
0x1069   :  { %v4454_v18 = vpop.eup %4453  ;;  %1696 = vrot.lane.b32.xlu1 %v4452_v34, %s4624_s7 }
0x106a   :  { %v4456_v21 = vpop.eup %4455 }
0x106b   :  { %1698 = vrot.lane.b32.xlu0 %v4454_v18, %s4624_s7  ;;  %v4458_v50 = vpop.eup %4457 }
0x106c   :  { %v1624_v52 = vadd.f32 1.0, %v4458_v50  ;;  %v4460_v49 = vpop.eup %4459 }
0x106d   :  { %1656 = vrot.lane.b32.xlu1 %v4456_v21, %s4624_s7  ;;  %v4462_v48 = vpop.eup %4461  ;;  %v1640_v53 = vadd.f32 1.0, %v4460_v49 }
0x106e   :  { %v1626_v3 = vmul.f32 0.5, %v1624_v52  ;;  %v4464_v55 = vpop.eup %4463  ;;  %v1641_v13 = vadd.f32 1.0, %v4462_v48 }
0x106f   :  { %v1642_v36 = vmul.f32 0.5, %v1640_v53  ;;  %v1623_v54 = vadd.f32 1.0, %v4464_v55 }
0x1070   :  { %v1643_v51 = vmul.f32 0.5, %v1641_v13  ;;  %v1653_v14 = vmul.f32 %v1649_v33, %v1626_v3 }
0x1071   :  { %v1625_v10 = vmul.f32 0.5, %v1623_v54  ;;  %v1692_v46 = vmul.f32 %v1688_v7, %v1642_v36 }
0x1072   :  { %v1693_v42 = vmul.f32 %v1689_v11, %v1643_v51 }
0x1073   :  { %v1652_v22 = vmul.f32 %v1648_v59, %v1625_v10 }
0x10d9   :  { %v1659_v63 = vpop.permute.xlu0 %1658 }
0x10da   :  { %v1663_v58 = vmul.f32 %v1659_v63, %v1626_v3 }
0x10db   :  { %v1697_v27 = vpop.permute.xlu1 %1696 }
0x10dc   :  { %1668 = vrot.lane.b32.xlu0 %v1663_v58, %s4625_s23  ;;  %v1702_v32 = vmul.f32 %v1697_v27, %v1642_v36 }
0x10dd   :  { %v1699_v57 = vpop.permute.xlu0 %1698 }
0x10de   :  { %v1703_v45 = vmul.f32 %v1699_v57, %v1643_v51  ;;  %1706 = vrot.lane.b32.xlu1 %v1702_v32, %s4625_s23 }
0x10df   :  { %v1657_v16 = vpop.permute.xlu1 %1656 }
0x10e0   :  { %1708 = vrot.lane.b32.xlu0 %v1703_v45, %s4625_s23  ;;  %v1662_v40 = vmul.f32 %v1657_v16, %v1625_v10 }
0x10e2   :  { %1666 = vrot.lane.b32.xlu1 %v1662_v40, %s4625_s23 }
0x114e   :  { %v1669_v61 = vpop.permute.xlu0 %1668 }
0x114f   :  { %v5423_v0 = vadd.f32 %v1669_v61, %v1653_v14 }
0x1150   :  { %v1707_v12 = vpop.permute.xlu1 %1706 }
0x1151   :  { %4465 = vtanh.f32 %v5423_v0  ;;  %v5429_v29 = vadd.f32 %v1707_v12, %v1692_v46 }
0x1152   :  { %v1709_v34 = vpop.permute.xlu0 %1708 }
0x1153   :  { %v5431_v18 = vadd.f32 %v1709_v34, %v1693_v42  ;;  %4467 = vtanh.f32 %v5429_v29 }
0x1154   :  { %v1667_v28 = vpop.permute.xlu1 %1666 }
0x1155   :  { %4469 = vtanh.f32 %v5431_v18  ;;  %v5435_v21 = vadd.f32 %v1667_v28, %v1652_v22 }
0x1157   :  { %4471 = vtanh.f32 %v5435_v21 }
0x115e   :  { %v4466_v41 = vpop.eup %4465 }
0x115f   :  { %1680 = vrot.lane.b32.xlu0 %v4466_v41, %s4624_s7 }
0x1160   :  { %v4468_v5 = vpop.eup %4467 }
0x1161   :  { %1718 = vrot.lane.b32.xlu1 %v4468_v5, %s4624_s7 }
0x1162   :  { %v4470_v44 = vpop.eup %4469 }
0x1163   :  { %1720 = vrot.lane.b32.xlu0 %v4470_v44, %s4624_s7 }
0x1164   :  { %v4472_v39 = vpop.eup %4471 }
0x1165   :  { %1678 = vrot.lane.b32.xlu1 %v4472_v39, %s4624_s7 }
0x11d1   :  { %v1681_v25 = vpop.permute.xlu0 %1680 }
0x11d2   :  { %v1685_v38 = vmul.f32 %v1681_v25, %v1626_v3 }
0x11d3   :  { %v1719_v52 = vpop.permute.xlu1 %1718 }
0x11d4   :  { %v5444_v50 = vsel %vm2146_vm9, %v5378_v37, %v1685_v38  ;;  %v5446_v49 = vmul.f32 %v1719_v52, %v1642_v36  ;;  %v1728_v13 = vrot.slane %v1685_v38, 7 }
0x11d5   :  { %v1721_v48 = vpop.permute.xlu0 %1720 }
0x11d6   :  { %v5448_v63 = vmul.f32 %v1721_v48, %v1643_v51  ;;  %v1736_v53 = vrot.slane %v5446_v49, 5 }
0x11d7   :  { %v1679_v58 = vpop.permute.xlu1 %1678 }
0x11d8   :  { %v1737_v55 = vrot.slane %v5448_v63, 4  ;;  %v1684_v54 = vmul.f32 %v1679_v58, %v1625_v10 }
0x11da   :  { %v1738_v27 = vsel %vm1729_vm10, %v1737_v55, %v1736_v53  ;;  %v5454_v3 = vsel %vm2146_vm9, %v5388_v35, %v1684_v54  ;;  %v1730_v37 = vsel %vm1729_vm10, %v1728_v13, %v1684_v54  ;;  %vm3136_vm10 = vcmp.eq.s32.totalorder %v4985_v6, 5 }
0x11db   :  { %1739 = vrot.lane.b32.xlu1 %v1738_v27, %s4624_s7  ;;  %1731 = vrot.lane.b32.xlu0 %v1730_v37, %s4625_s23 }
0x124d   :  { %v1740_v36 = vpop.permute.xlu1 %1739  ;;  %v1732_v51 = vpop.permute.xlu0 %1731 }
0x124e   :  { %v1742_v32 = vsel %vm714_vm15, %v1732_v51, %v1740_v36 }
0x124f   :  { %v1744_v57 = vrot.slane %v1742_v32, 5 }
0x1251   :  { %4095 = vmatmul.mubr.msk.f32.vlgmr.msra.gmra.mxu1 %vm522_vm2, %v1744_v57 }
0x1311   :  { %v1813_v45 = vpop.f32.mrf.mxu1 }
0x1312   :  { %v1820_v16 = vrot.slane %v1813_v45, 3  ;;  %v1819_v35 = vrot.slane %v1813_v45, 2 }
0x1313   :  { %v1815_v10 = vpop.f32.mrf.mxu1 }
0x1314   :  { %v1824_v40 = vadd.f32 %v1820_v16, %v4998_v15  ;;  %v1836_v33 = vrot.slane %v1815_v10, 7  ;;  %v1840_v61 = vadd.f32 %v1815_v10, %v5003_v24  ;;  %v1823_v7 = vadd.f32 %v1819_v35, %v5006_v26 }
0x1315   :  { %v1854_v16 = vrot.slane %v5423_v0, 7  ;;  %v1893_v35 = vrot.slane %v5429_v29, 1 }
0x1316   :  { %4473 = vtanh.f32 %v1824_v40  ;;  %v1839_v14 = vadd.f32 %v1836_v33, %v5000_v19  ;;  %v1826_v59 = vmul.f32 0.5, %v1824_v40  ;;  %v1842_v22 = vmul.f32 0.5, %v1840_v61 }
0x1317   :  { %v1825_v28 = vmul.f32 0.5, %v1823_v7 }
0x1318   :  { %4475 = vtanh.f32 %v1839_v14  ;;  %v1841_v34 = vmul.f32 0.5, %v1839_v14  ;;  %v1894_v14 = vrot.slane %v5431_v18, 1 }
0x1319   :  { %4477 = vtanh.f32 %v1840_v61 }
0x131a   :  { %4479 = vtanh.f32 %v1823_v7 }
0x131b   :  { %4481 = vtanh.f32 %v1826_v59 }
0x131c   :  { %4483 = vtanh.f32 %v1841_v34 }
0x131d   :  { %4485 = vtanh.f32 %v1842_v22 }
0x131e   :  { %4487 = vtanh.f32 %v1825_v28 }
0x1323   :  { %v4474_v11 = vpop.eup %4473 }
0x1324   :  { %1863 = vrot.lane.b32.xlu0 %v4474_v11, %s4624_s7 }
0x1325   :  { %v4476_v46 = vpop.eup %4475 }
0x1326   :  { %v4478_v12 = vpop.eup %4477  ;;  %1901 = vrot.lane.b32.xlu1 %v4476_v46, %s4624_s7  ;;  %v1853_v46 = vrot.slane %v5435_v21, 7 }
0x1327   :  { %v4480_v42 = vpop.eup %4479 }
0x1328   :  { %1903 = vrot.lane.b32.xlu0 %v4478_v12, %s4624_s7  ;;  %v4482_v41 = vpop.eup %4481 }
0x1329   :  { %v1830_v5 = vadd.f32 1.0, %v4482_v41  ;;  %v4484_v44 = vpop.eup %4483 }
0x132a   :  { %1861 = vrot.lane.b32.xlu1 %v4480_v42, %s4624_s7  ;;  %v4486_v39 = vpop.eup %4485  ;;  %v1845_v52 = vadd.f32 1.0, %v4484_v44 }
0x132b   :  { %v1832_v25 = vmul.f32 0.5, %v1830_v5  ;;  %v4488_v48 = vpop.eup %4487  ;;  %v1846_v55 = vadd.f32 1.0, %v4486_v39 }
0x132c   :  { %v1847_v58 = vmul.f32 0.5, %v1845_v52  ;;  %v1829_v13 = vadd.f32 1.0, %v4488_v48 }
0x132d   :  { %v1848_v27 = vmul.f32 0.5, %v1846_v55  ;;  %v1858_v10 = vmul.f32 %v1854_v16, %v1832_v25 }
0x132e   :  { %v1831_v32 = vmul.f32 0.5, %v1829_v13  ;;  %v1897_v61 = vmul.f32 %v1893_v35, %v1847_v58 }
0x132f   :  { %v1898_v11 = vmul.f32 %v1894_v14, %v1848_v27 }
0x1330   :  { %v1857_v0 = vmul.f32 %v1853_v46, %v1831_v32 }
0x1396   :  { %v1864_v38 = vpop.permute.xlu0 %1863 }
0x1397   :  { %v1868_v53 = vmul.f32 %v1864_v38, %v1832_v25 }
0x1398   :  { %v1902_v54 = vpop.permute.xlu1 %1901 }
0x1399   :  { %1873 = vrot.lane.b32.xlu0 %v1868_v53, %s4625_s23  ;;  %v1907_v37 = vmul.f32 %v1902_v54, %v1847_v58 }
0x139a   :  { %v1904_v36 = vpop.permute.xlu0 %1903 }
0x139b   :  { %v1908_v51 = vmul.f32 %v1904_v36, %v1848_v27  ;;  %1911 = vrot.lane.b32.xlu1 %v1907_v37, %s4625_s23 }
0x139c   :  { %v1862_v57 = vpop.permute.xlu1 %1861 }
0x139d   :  { %1913 = vrot.lane.b32.xlu0 %v1908_v51, %s4625_s23  ;;  %v1867_v45 = vmul.f32 %v1862_v57, %v1831_v32 }
0x139f   :  { %1871 = vrot.lane.b32.xlu1 %v1867_v45, %s4625_s23 }
0x140b   :  { %v1874_v40 = vpop.permute.xlu0 %1873 }
0x140c   :  { %v5473_v33 = vadd.f32 %v1874_v40, %v1858_v10 }
0x140d   :  { %v1912_v7 = vpop.permute.xlu1 %1911 }
0x140e   :  { %4489 = vtanh.f32 %v5473_v33  ;;  %v5479_v12 = vadd.f32 %v1912_v7, %v1897_v61 }
0x140f   :  { %v1914_v42 = vpop.permute.xlu0 %1913 }
0x1410   :  { %v5481_v59 = vadd.f32 %v1914_v42, %v1898_v11  ;;  %4491 = vtanh.f32 %v5479_v12 }
0x1411   :  { %v1872_v29 = vpop.permute.xlu1 %1871 }
0x1412   :  { %4493 = vtanh.f32 %v5481_v59  ;;  %v5485_v34 = vadd.f32 %v1872_v29, %v1857_v0 }
0x1414   :  { %4495 = vtanh.f32 %v5485_v34 }
0x141b   :  { %v4490_v18 = vpop.eup %4489 }
0x141c   :  { %1885 = vrot.lane.b32.xlu0 %v4490_v18, %s4624_s7 }
0x141d   :  { %v4492_v22 = vpop.eup %4491 }
0x141e   :  { %1923 = vrot.lane.b32.xlu1 %v4492_v22, %s4624_s7 }
0x141f   :  { %v4494_v21 = vpop.eup %4493 }
0x1420   :  { %1925 = vrot.lane.b32.xlu0 %v4494_v21, %s4624_s7 }
0x1421   :  { %v4496_v28 = vpop.eup %4495 }
0x1422   :  { %1883 = vrot.lane.b32.xlu1 %v4496_v28, %s4624_s7 }
0x148e   :  { %v1886_v41 = vpop.permute.xlu0 %1885 }
0x148f   :  { %v1890_v5 = vmul.f32 %v1886_v41, %v1832_v25 }
0x1490   :  { %v1924_v39 = vpop.permute.xlu1 %1923 }
0x1491   :  { %v5494_v44 = vsel %vm2149_vm12, %v5444_v50, %v1890_v5  ;;  %v5496_v38 = vmul.f32 %v1924_v39, %v1847_v58  ;;  %v1933_v54 = vrot.slane %v1890_v5, 7 }
0x1492   :  { %v1926_v52 = vpop.permute.xlu0 %1925 }
0x1493   :  { %v5498_v48 = vmul.f32 %v1926_v52, %v1848_v27  ;;  %v1941_v53 = vrot.slane %v5496_v38, 3 }
0x1494   :  { %v1884_v13 = vpop.permute.xlu1 %1883 }
0x1495   :  { %v1942_v55 = vrot.slane %v5498_v48, 2  ;;  %v1889_v37 = vmul.f32 %v1884_v13, %v1831_v32 }
0x1497   :  { %v1943_v36 = vsel %vm1934_vm14, %v1942_v55, %v1941_v53  ;;  %v1935_v25 = vsel %vm1934_vm14, %v1933_v54, %v1889_v37  ;;  %v5505_v50 = vsel %vm2149_vm12, %v5454_v3, %v1889_v37  ;;  %vm3234_vm14 = vcmp.eq.s32.totalorder %v4985_v6, 7 }
0x1498   :  { %1944 = vrot.lane.b32.xlu1 %v1943_v36, %s4624_s7  ;;  %1936 = vrot.lane.b32.xlu0 %v1935_v25, %s4625_s23 }
0x150a   :  { %v1945_v58 = vpop.permute.xlu1 %1944  ;;  %v1937_v27 = vpop.permute.xlu0 %1936 }
0x150b   :  { %v1947_v51 = vsel %vm714_vm15, %v1937_v27, %v1945_v58  ;;  %vm2152_vm15 = vcmask 1046528  }
0x150c   :  { %v1949_v57 = vrot.slane %v1947_v51, 6 }
0x150e   :  { %4096 = vmatmul.mubr.msk.f32.vlgmr.msra.gmra.mxu0 %vm522_vm2, %v1949_v57  ;;  %v2098_v57 = vrot.slane %v5479_v12, 1  ;;  %vm2798_vm2 = vcmask 57344  }
0x15ce   :  { %v2018_v45 = vpop.f32.mrf.mxu0 }
0x15cf   :  { %v2024_v10 = vrot.slane %v2018_v45, 1  ;;  %v2025_v35 = vrot.slane %v2018_v45, 2  ;;  %v2099_v45 = vrot.slane %v5481_v59, 1 }
0x15d0   :  { %v2020_v16 = vpop.f32.mrf.mxu0 }
0x15d1   :  { %v2041_v32 = vrot.slane %v2020_v16, 1  ;;  %v2044_v40 = vadd.f32 %v2020_v16, %v5000_v19  ;;  %v2028_v3 = vadd.f32 %v2024_v10, %v5006_v26  ;;  %v2029_v61 = vadd.f32 %v2025_v35, %v4998_v15 }
0x15d3   :  { %v2045_v14 = vadd.f32 %v2041_v32, %v5003_v24  ;;  %4497 = vtanh.f32 %v2044_v40  ;;  %v2046_v19 = vmul.f32 0.5, %v2044_v40  ;;  %v2030_v26 = vmul.f32 0.5, %v2028_v3 }
0x15d4   :  { %v2031_v15 = vmul.f32 0.5, %v2029_v61  ;;  %v2058_v40 = vrot.slane %v5485_v34, 7 }
0x15d5   :  { %4499 = vtanh.f32 %v2045_v14  ;;  %v2047_v24 = vmul.f32 0.5, %v2045_v14 }
0x15d6   :  { %4501 = vtanh.f32 %v2028_v3  ;;  %v2059_v3 = vrot.slane %v5473_v33, 7 }
0x15d7   :  { %4503 = vtanh.f32 %v2029_v61 }
0x15d8   :  { %4505 = vtanh.f32 %v2046_v19 }
0x15d9   :  { %4507 = vtanh.f32 %v2047_v24 }
0x15da   :  { %4509 = vtanh.f32 %v2030_v26  ;;  %v2203_v26 = vld [vmem:[%s5983_s9 + $0x8] sm:$0xff] }
0x15db   :  { %4511 = vtanh.f32 %v2031_v15  ;;  %v2295_v15 = vld [vmem:[%s5985_s11 + $0x8] sm:$0xff]  ;;  %4208 = vmatprep.subr.mxu1 %v2203_v26 }
0x15dc   :  { %4215 = vmatprep.subr.mxu0 %v2295_v15  ;;  %4209 = vmatpush3.msra.mxu1 %v2203_v26 }
0x15dd   :  { %4216 = vmatpush3.msra.mxu0 %v2295_v15 }
0x15e0   :  { %v4498_v7 = vpop.eup %4497 }
0x15e1   :  { %2106 = vrot.lane.b32.xlu0 %v4498_v7, %s4624_s7 }
0x15e2   :  { %v4500_v11 = vpop.eup %4499 }
0x15e3   :  { %2108 = vrot.lane.b32.xlu1 %v4500_v11, %s4624_s7  ;;  %v4502_v46 = vpop.eup %4501 }
0x15e4   :  { %v4504_v42 = vpop.eup %4503 }
0x15e5   :  { %2066 = vrot.lane.b32.xlu0 %v4502_v46, %s4624_s7  ;;  %v4506_v0 = vpop.eup %4505 }
0x15e6   :  { %v4508_v29 = vpop.eup %4507  ;;  %v2050_v18 = vadd.f32 1.0, %v4506_v0  ;;  %v2202_v0 = vld [vmem:[%s5983_s9] sm:$0xff]  ;;  %s4626_s9 = smov 8  }
0x15e7   :  { %2068 = vrot.lane.b32.xlu1 %v4504_v42, %s4624_s7  ;;  %v4510_v22 = vpop.eup %4509  ;;  %v2051_v21 = vadd.f32 1.0, %v4508_v29  ;;  %v2294_v29 = vld [vmem:[%s5985_s11] sm:$0xff]  ;;  %4210 = vmatprep.subr.mxu1 %v2202_v0 }
0x15e8   :  { %v4512_v28 = vpop.eup %4511  ;;  %v2052_v41 = vmul.f32 0.5, %v2050_v18  ;;  %v2034_v5 = vadd.f32 1.0, %v4510_v22  ;;  %4217 = vmatprep.subr.mxu0 %v2294_v29  ;;  %4211 = vmatpush3.msra.mxu1 %v2202_v0 }
0x15e9   :  { %v2053_v52 = vmul.f32 0.5, %v2051_v21  ;;  %v2035_v53 = vadd.f32 1.0, %v4512_v28  ;;  %4218 = vmatpush3.msra.mxu0 %v2294_v29 }
0x15ea   :  { %v2036_v37 = vmul.f32 0.5, %v2034_v5  ;;  %v2102_v16 = vmul.f32 %v2098_v57, %v2052_v41  ;;  %4229 = vmatprep.subr.mxu0 %v4621_v20 }
0x15eb   :  { %v5520_v25 = vmul.f32 0.5, %v2035_v53  ;;  %v2103_v10 = vmul.f32 %v2099_v45, %v2053_v52  ;;  %v4100_v45 = vld [vmem:[%s5986_s12] ss:$0 sm:$0xff] }
0x15ec   :  { %v2062_v7 = vmul.f32 %v2058_v40, %v2036_v37 }
0x15ed   :  { %v2063_v46 = vmul.f32 %v2059_v3, %v5520_v25 }
0x1653   :  { %v2107_v39 = vpop.permute.xlu0 %2106 }
0x1654   :  { %v2112_v55 = vmul.f32 %v2107_v39, %v2052_v41 }
0x1655   :  { %v2109_v13 = vpop.permute.xlu1 %2108 }
0x1656   :  { %v2113_v54 = vmul.f32 %v2109_v13, %v2053_v52  ;;  %2116 = vrot.lane.b32.xlu0 %v2112_v55, %s4625_s23 }
0x1657   :  { %v2067_v36 = vpop.permute.xlu0 %2066 }
0x1658   :  { %2118 = vrot.lane.b32.xlu1 %v2113_v54, %s4625_s23  ;;  %v2072_v58 = vmul.f32 %v2067_v36, %v2036_v37 }
0x1659   :  { %v2069_v27 = vpop.permute.xlu1 %2068 }
0x165a   :  { %v2073_v51 = vmul.f32 %v2069_v27, %v5520_v25  ;;  %2076 = vrot.lane.b32.xlu0 %v2072_v58, %s4625_s23  ;;  %v2380_v58 = vld [vmem:[%s5987_s13] sm:$0xff] }
0x165b   :  { %v4097_v27 = vld [vmem:[%s5984_s10] ss:$0 sm:$0xff] }
0x165c   :  { %2078 = vrot.lane.b32.xlu1 %v2073_v51, %s4625_s23 }
0x16c8   :  { %v2117_v32 = vpop.permute.xlu0 %2116 }
0x16c9   :  { %v2122_v35 = vadd.f32 %v2117_v32, %v2102_v16 }
0x16ca   :  { %v2119_v14 = vpop.permute.xlu1 %2118 }
0x16cb   :  { %v2123_v61 = vadd.f32 %v2119_v14, %v2103_v10  ;;  %4513 = vtanh.f32 %v2122_v35 }
0x16cc   :  { %v2077_v11 = vpop.permute.xlu0 %2076 }
0x16cd   :  { %4515 = vtanh.f32 %v2123_v61  ;;  %v2082_v42 = vadd.f32 %v2077_v11, %v2062_v7 }
0x16ce   :  { %v2079_v12 = vpop.permute.xlu1 %2078 }
0x16cf   :  { %v2083_v19 = vadd.f32 %v2079_v12, %v2063_v46  ;;  %4517 = vtanh.f32 %v2082_v42  ;;  %v5647_v12 = vld [vmem:[%s5988_s14] sm:$0x1]  ;;  %s4636_s14 = smov 120  }
0x16d1   :  { %4519 = vtanh.f32 %v2083_v19 }
0x16d8   :  { %v4514_v59 = vpop.eup %4513 }
0x16d9   :  { %2128 = vrot.lane.b32.xlu0 %v4514_v59, %s4624_s7 }
0x16da   :  { %v4516_v24 = vpop.eup %4515 }
0x16db   :  { %2130 = vrot.lane.b32.xlu1 %v4516_v24, %s4624_s7 }
0x16dc   :  { %v4518_v34 = vpop.eup %4517 }
0x16dd   :  { %2088 = vrot.lane.b32.xlu0 %v4518_v34, %s4624_s7 }
0x16de   :  { %v4520_v33 = vpop.eup %4519 }
0x16df   :  { %2090 = vrot.lane.b32.xlu1 %v4520_v33, %s4624_s7 }
0x174b   :  { %v2129_v18 = vpop.permute.xlu0 %2128 }
0x174c   :  { %v2134_v22 = vmul.f32 %v2129_v18, %v2052_v41 }
0x174d   :  { %v2131_v21 = vpop.permute.xlu1 %2130 }
0x174e   :  { %v2135_v28 = vmul.f32 %v2131_v21, %v2053_v52  ;;  %v2155_v5 = vsel %vm2136_vm4, %v2134_v22, %v5496_v38 }
0x174f   :  { %v2157_v39 = vsel %vm102_vm0, %v2155_v5, %v5446_v49  ;;  %v2089_v55 = vpop.permute.xlu0 %2088 }
0x1750   :  { %v2156_v53 = vsel %vm2136_vm4, %v2135_v28, %v5498_v48  ;;  %v2159_v41 = vsel %vm2141_vm6, %v2157_v39, %v5380_v56  ;;  %v2094_v52 = vmul.f32 %v2089_v55, %v2036_v37  ;;  %v4114_v28 = vsel %vm2777_vm3, 1.0, %v4621_v20 }
0x1751   :  { %v2158_v13 = vsel %vm102_vm0, %v2156_v53, %v5448_v63  ;;  %v2091_v54 = vpop.permute.xlu1 %2090  ;;  %v2161_v38 = vsel %vm303_vm1, %v2159_v41, %v5239_v23  ;;  %vm2199_vm0 = vcmask 64512   ;;  %vm2774_vm4 = vcmp.ne.s32.totalorder %v4985_v6, %v4809_v17 }
0x1752   :  { %v2160_v36 = vsel %vm2141_vm6, %v2158_v13, %v5382_v60  ;;  %v2095_v49 = vmul.f32 %v2091_v54, %v5520_v25  ;;  %v5564_v48 = vsel %vm2152_vm15, %v5505_v50, %v2094_v52  ;;  %v2163_v56 = vsel %vm2146_vm9, %v2161_v38, %v5170_v30  ;;  %v2381_v25 = vld [vmem:[%s5987_s13 + $0x8] sm:$0xff]  ;;  %s4635_s13 = smov 56  }
0x1753   :  { %v2162_v63 = vsel %vm303_vm1, %v2160_v36, %v5247_v31  ;;  %2187 = vrot.lane.b32.xlu0 %v5564_v48, %s4626_s9  ;;  %v2165_v60 = vsel %vm2149_vm12, %v2163_v56, %v5101_v1  ;;  %4222 = vmatprep.subr.mxu1 %v2381_v25  ;;  %vm4627_vm1 = vmmov 0   ;;  %vm2940_vm6 = vcmp.eq.s32.totalorder %v4985_v6, 1 }
0x1754   :  { %v2164_v23 = vsel %vm2146_vm9, %v2162_v63, %v5172_v62  ;;  %v5578_v50 = vsel %vm2152_vm15, %v2165_v60, %v5036_v43  ;;  %v5586_v31 = vsel %vm2152_vm15, %v5494_v44, %v2095_v49  ;;  %vm3087_vm9 = vcmp.eq.s32.totalorder %v4985_v6, 4 }
0x1755   :  { %2193 = vrot.lane.b32.xlu1 %v5578_v50, %s4622_s30  ;;  %v2166_v30 = vsel %vm2149_vm12, %v2164_v23, %v5103_v4  ;;  %vm3185_vm12 = vcmp.eq.s32.totalorder %v4985_v6, 6 }
0x1756   :  { %v5592_v1 = vsel %vm2152_vm15, %v2166_v30, %v5038_v47  ;;  %vm3337_vm15 = vcmask 130112  }
0x1757   :  { %2189 = vrot.lane.b32.xlu0 %v5586_v31, %s4626_s9 }
0x1759   :  { %2195 = vrot.lane.b32.xlu1 %v5592_v1, %s4622_s30  ;;  %s4640_s30 = smov [#allocation2]  }
0x17c5   :  { %v2188_v43 = vpop.permute.xlu0 %2187 }
0x17c7   :  { %v2194_v62 = vpop.permute.xlu1 %2193 }
0x17c8   :  { %v5597_v37 = vsel %vm2199_vm0, %v2188_v43, %v2194_v62 }
0x17c9   :  { %4212 = vmatprep.mubr.msk.f32.mxu1 %vm398_vm11, %v5597_v37  ;;  %4219 = vmatprep.mubr.msk.f32.mxu0 %vm398_vm11, %v5597_v37  ;;  %v2190_v4 = vpop.permute.xlu0 %2189 }
0x17cb   :  { %v2196_v44 = vpop.permute.xlu1 %2195 }
0x17cc   :  { %v5604_v47 = vsel %vm2199_vm0, %v2190_v4, %v2196_v44 }
0x17cd   :  { %4213 = vmatmul.mubr.msk.f32.vlgmr.msra.gmra.mxu1 %vm398_vm11, %v5604_v47  ;;  %4220 = vmatmul.mubr.msk.f32.vlgmr.msra.gmra.mxu0 %vm398_vm11, %v5604_v47 }
0x17ce   :  { %4223 = vmatpush3.msra.mxu1 %v2381_v25  ;;  %4231 = vmatprep.mubr.msk.f32.mxu0 %vm4627_vm1, %v4621_v20 }
0x17cf   :  { %4224 = vmatprep.subr.mxu1 %v2380_v58 }
0x17d0   :  { %4225 = vmatpush3.msra.mxu1 %v2380_v58 }
0x17d1   :  { %4234 = vmatprep.subr.mxu1 %v4621_v20 }
0x188d   :  { %v4214_v51 = vpop.f32.mrf.mxu1  ;;  %v4221_v57 = vpop.f32.mrf.mxu0 }
0x188e   :  { %v2289_v16 = vadd.f32 %v4214_v51, %v4097_v27  ;;  %v2375_v40 = vadd.f32 %v4221_v57, %v4100_v45 }
0x188f   :  { %v2283_v32 = vpop.f32.mrf.mxu1  ;;  %v2369_v10 = vpop.f32.mrf.mxu0 }
0x1890   :  { %v2284_v35 = vadd.f32 %v4097_v27, %v2283_v32  ;;  %v2370_v14 = vadd.f32 %v4100_v45, %v2369_v10  ;;  %4521 = vtanh.f32 %v2289_v16  ;;  %v4113_v32 = vsel %vm2774_vm4, 1.0, %v4621_v20 }
0x1891   :  { %vm4025_vm4 = vcmask 7168  }
0x1892   :  { %4523 = vtanh.f32 %v2284_v35 }
0x1893   :  { %4525 = vtanh.f32 %v2370_v14 }
0x1894   :  { %4527 = vtanh.f32 %v2375_v40 }
0x189d   :  { %v4522_v3 = vpop.eup %4521 }
0x189f   :  { %v4524_v61 = vpop.eup %4523 }
0x18a0   :  { %v4526_v7 = vpop.eup %4525  ;;  %4226 = vmatprep.mubr.msk.f32.mxu1 %vm398_vm11, %v4524_v61 }
0x18a1   :  { %v4528_v11 = vpop.eup %4527  ;;  %4230 = vmatpush3.xpose.msk.msra.mxu0 %vm398_vm11, %v4526_v7  ;;  %4227 = vmatmul.mubr.msk.f32.vlgmr.msra.gmra.mxu1 %vm398_vm11, %v4522_v3 }
0x18a2   :  { %4235 = vmatpush3.xpose.msk.msra.mxu1 %vm398_vm11, %v4528_v11  ;;  %4239 = vmatprep.subr.mxu0 %v4621_v20 }
0x18a3   :  { %4244 = vmatprep.subr.mxu1 %v4621_v20  ;;  %4236 = vmatprep.mubr.msk.f32.mxu1 %vm4627_vm1, %v4621_v20 }
0x1961   :  { %v4228_v46 = vpop.f32.mrf.mxu1 }
0x1962   :  { %4237 = vmatmul.mubr.msk.f32.vlgmr.msra.gmra.mxu1 %vm398_vm11, %v4228_v46 }
0x1963   :  { %4245 = vmatpush3.xpose.msk.msra.mxu1 %vm398_vm11, %v5604_v47  ;;  %v2454_v42 = vpop.f32.mrf.mxu1  ;;  %4246 = vmatprep.mubr.msk.f32.mxu1 %vm4627_vm1, %v4621_v20 }
0x1964   :  { %4232 = vmatmul.mubr.msk.f32.vlgmr.msra.gmra.mxu0 %vm398_vm11, %v2454_v42  ;;  %4254 = vmatprep.subr.mxu1 %v4621_v20 }
0x1965   :  { %4240 = vmatpush3.xpose.msk.msra.mxu0 %vm398_vm11, %v5597_v37  ;;  %4241 = vmatprep.mubr.msk.f32.mxu0 %vm4627_vm1, %v4621_v20 }
0x1966   :  { %4247 = vmatmul.mubr.msk.f32.vlgmr.msra.gmra.mxu1 %vm398_vm11, %v5647_v12  ;;  %4249 = vmatprep.subr.mxu0 %v4621_v20 }
0x1967   :  { %4256 = vmatprep.mubr.msk.f32.mxu1 %vm4627_vm1, %v4621_v20 }
0x1968   :  { %4242 = vmatmul.mubr.msk.f32.vlgmr.msra.gmra.mxu0 %vm398_vm11, %v5647_v12 }
0x1969   :  { %4251 = vmatprep.mubr.msk.f32.mxu0 %vm4627_vm1, %v4621_v20 }
0x1a22   :  { %v2611_v19 = vpop.f32.mrf.mxu1 }
0x1a23   :  { %v2783_v59 = vsel %vm2199_vm0, %v2611_v19, -inf }
0x1a24   :  { %2784 = vmax.xlane.f32.xlu1 %v2783_v59  ;;  %v2535_v24 = vpop.f32.mrf.mxu0  ;;  %v4238_v34 = vpop.f32.mrf.mxu1 }
0x1a25   :  { %v2780_v33 = vsel %vm2199_vm0, %v2535_v24, -inf }
0x1a26   :  { %2781 = vmax.xlane.f32.xlu0 %v2780_v33  ;;  %v4233_v26 = vpop.f32.mrf.mxu0  ;;  %v2755_v15 = vpop.f32.mrf.mxu1 }
0x1a27   :  { %v2802_v21 = vsel %vm2798_vm2, %v2755_v15, -inf }
0x1a28   :  { %v2685_v0 = vpop.f32.mrf.mxu0  ;;  %v4248_v29 = vpop.f32.mrf.mxu1 }
0x1a29   :  { %v2799_v18 = vsel %vm2798_vm2, %v2685_v0, -inf  ;;  %vm3352_vm2 = vcmp.ne.s32.totalorder %v4809_v17, 0 }
0x1a2a   :  { %2800 = vmax.xlane.f32.xlu0 %v2799_v18  ;;  %v4243_v22 = vpop.f32.mrf.mxu0 }
0x1a2e   :  { %2803 = vmax.xlane.f32.xlu0 %v2802_v21 }
0x1a35   :  { %2867 = vrot.lane.b32.xlu1 %v4114_v28, %s4626_s9 }
0x1aad   :  { %v2785_v5 = vpop.xlane.xlu1 %2784 }
0x1aae   :  { %v2792_v39 = vrot.slane %v2785_v5, 4 }
0x1aaf   :  { %v2782_v53 = vpop.xlane.xlu0 %2781 }
0x1ab0   :  { %v2793_v55 = vmax.f32 %v2785_v5, %v2792_v39  ;;  %v2786_v41 = vrot.slane %v2782_v53, 4 }
0x1ab1   :  { %v5692_v39 = vpop.permute.xlu1 %2867 }
0x1ab2   :  { %v2794_v13 = vrot.slane %v2793_v55, 2  ;;  %v2787_v52 = vmax.f32 %v2782_v53, %v2786_v41 }
0x1ab3   :  { %v2801_v54 = vpop.xlane.xlu0 %2800 }
0x1ab4   :  { %v2795_v36 = vmax.f32 %v2793_v55, %v2794_v13  ;;  %v2788_v38 = vrot.slane %v2787_v52, 2 }
0x1ab6   :  { %v2789_v49 = vmax.f32 %v2787_v52, %v2788_v38  ;;  %v2796_v56 = vrot.slane %v2795_v36, 1 }
0x1ab7   :  { %v2804_v63 = vpop.xlane.xlu0 %2803 }
0x1ab8   :  { %v2790_v60 = vrot.slane %v2789_v49, 1  ;;  %v2797_v23 = vmax.f32 %v2795_v36, %v2796_v56 }
0x1aba   :  { %v2791_v30 = vmax.f32 %v2789_v49, %v2790_v60  ;;  %v2806_v43 = vmax.f32 %v2797_v23, %v2804_v63 }
0x1abc   :  { %v2805_v62 = vmax.f32 %v2791_v30, %v2801_v54  ;;  %v5668_v4 = vrot.slane %v2806_v43, %v4988_v8  ;;  %v2824_v57 = vsub.f32 %v2755_v15, %v2806_v43 }
0x1abe   :  { %v5671_v44 = vrot.slane %v2805_v62, %v4988_v8  ;;  %v2816_v25 = vsub.f32 %v2611_v19, %v5668_v4  ;;  %v2823_v45 = vsub.f32 %v2685_v0, %v2805_v62  ;;  %v2827_v16 = vmul.f32 1.442695, %v2824_v57 }
0x1ac0   :  { %v2815_v58 = vsub.f32 %v2535_v24, %v5671_v44  ;;  %v2819_v27 = vmul.f32 1.442695, %v2816_v25  ;;  %v2825_v10 = vmul.f32 1.442695, %v2823_v45 }
0x1ac2   :  { %v2817_v51 = vmul.f32 1.442695, %v2815_v58  ;;  %4529 = vpow2.f32 %v2819_v27 }
0x1ac4   :  { %4531 = vpow2.f32 %v2817_v51  ;;  %v4628_v51 = vmov 1  }
0x1ac5   :  { %4533 = vpow2.f32 %v2827_v16 }
0x1ac6   :  { %4535 = vpow2.f32 %v2825_v10 }
0x1acf   :  { %v4530_v40 = vpop.eup %4529 }
0x1ad0   :  { %v5678_v14 = vmul.f32 %v4530_v40, %v4113_v32 }
0x1ad1   :  { %v4532_v35 = vpop.eup %4531 }
0x1ad2   :  { %v5680_v3 = vmul.f32 %v4532_v35, %v4113_v32  ;;  %v2842_v61 = vsel %vm2199_vm0, %v5678_v14, 0.0  ;;  %v4534_v0 = vpop.eup %4533  ;;  %v2850_v21 = vsub.f32 0.0, %v5678_v14 }
0x1ad3   :  { %v2843_v11 = vrot.slane %v2842_v61, 4  ;;  %v4536_v18 = vpop.eup %4535  ;;  %v2863_v41 = vrot.slane %v4534_v0, %v4988_v8 }
0x1ad4   :  { %v2835_v7 = vsel %vm2199_vm0, %v5680_v3, 0.0  ;;  %v2849_v28 = vsub.f32 0.0, %v5680_v3  ;;  %v2859_v52 = vrot.slane %v4536_v18, %v4988_v8 }
0x1ad5   :  { %v2836_v46 = vrot.slane %v2835_v7, 4  ;;  %v2844_v42 = vadd.f32 %v2843_v11, %v2842_v61 }
0x1ad7   :  { %v2837_v19 = vadd.f32 %v2836_v46, %v2835_v7  ;;  %v2845_v59 = vrot.slane %v2844_v42, 2 }
0x1ad9   :  { %v2838_v24 = vrot.slane %v2837_v19, 2  ;;  %v2846_v34 = vadd.f32 %v2845_v59, %v2844_v42 }
0x1adb   :  { %v2839_v33 = vadd.f32 %v2838_v24, %v2837_v19  ;;  %v2847_v26 = vrot.slane %v2846_v34, 1 }
0x1add   :  { %v2840_v15 = vrot.slane %v2839_v33, 1  ;;  %v2848_v29 = vadd.f32 %v2847_v26, %v2846_v34 }
0x1adf   :  { %v2841_v22 = vadd.f32 %v2840_v15, %v2839_v33  ;;  %v2852_v5 = vsel %vm2777_vm3, %v2848_v29, 0.0 }
0x1ae0   :  { %v2854_v55 = vadd.f32 %v2852_v5, %v2850_v21 }
0x1ae1   :  { %v2851_v53 = vsel %vm2777_vm3, %v2841_v22, 0.0  ;;  %vm3355_vm3 = vcmp.ne.s32.totalorder %v4985_v6, 0 }
0x1ae2   :  { %v2853_v13 = vadd.f32 %v2851_v53, %v2849_v28  ;;  %v2865_v54 = vsel %vm2855_vm5, %v2863_v41, %v2854_v55  ;;  %v4629_v28 = vmov 2  }
0x1ae3   :  { %v2871_v38 = vsel %vm2199_vm0, %v2865_v54, %v5692_v39 }
0x1ae4   :  { %v2864_v36 = vsel %vm2855_vm5, %v2859_v52, %v2853_v13  ;;  %4537 = vrcp.f32 %v2871_v38  ;;  %v2893_v27 = vsel %vm2855_vm5, 0.0, %v2871_v38 }
0x1ae5   :  { %v2870_v49 = vsel %vm2199_vm0, %v2864_v36, %v5692_v39 }
0x1ae6   :  { %4539 = vrcp.f32 %v2870_v49  ;;  %v2892_v58 = vsel %vm2855_vm5, 0.0, %v2870_v49 }
0x1af1   :  { %v4538_v56 = vpop.eup %4537 }
0x1af2   :  { %v2875_v60 = vmul.f32 %v4538_v56, %v2871_v38 }
0x1af3   :  { %v4540_v63 = vpop.eup %4539 }
0x1af4   :  { %v2874_v23 = vmul.f32 %v4540_v63, %v2870_v49  ;;  %v2877_v30 = vsub.f32 2.0, %v2875_v60 }
0x1af6   :  { %v2876_v43 = vsub.f32 2.0, %v2874_v23  ;;  %v2879_v62 = vmul.f32 %v4538_v56, %v2877_v30 }
0x1af8   :  { %v2878_v25 = vmul.f32 %v4540_v63, %v2876_v43  ;;  %2887 = vperm.xlu1 %4310, %v2879_v62  }
0x1afa   :  { %2882 = vperm.xlu0 %4309, %v2878_v25  }
0x1afc   :  { %2896 = vperm.xlu1 %4310, %v2892_v58  }
0x1afe   :  { %2901 = vperm.xlu0 %4309, %v2893_v27  }
0x1b00   :  { %4312 = vset.pattern.permute.xlu1 %v4628_v51 }
0x1b02   :  { %4311 = vset.pattern.permute.xlu0 %v4628_v51 }
0x1b73   :  { %v2888_v57 = vpop.permute.xlu1 %2887 }
0x1b74   :  { %v2891_v45 = vmul.f32 %v2888_v57, %v2871_v38 }
0x1b75   :  { %v2883_v16 = vpop.permute.xlu0 %2882 }
0x1b76   :  { %v2890_v32 = vmul.f32 %v2883_v16, %v2870_v49  ;;  %v2911_v40 = vrot.slane %v2891_v45, %v4988_v8  ;;  %v4630_v16 = vmov 3  }
0x1b77   :  { %v2897_v35 = vpop.permute.xlu1 %2896 }
0x1b78   :  { %v2907_v10 = vrot.slane %v2890_v32, %v4988_v8 }
0x1b79   :  { %v2902_v61 = vpop.permute.xlu0 %2901 }
0x1b7a   :  { %v2912_v7 = vmul.f32 %v2907_v10, %v2897_v35  ;;  %v2913_v11 = vmul.f32 %v2911_v40, %v2902_v61 }
0x1b7c   :  { %v2914_v46 = vsub.f32 %v2870_v49, %v2912_v7  ;;  %v2915_v42 = vsub.f32 %v2871_v38, %v2913_v11 }
0x1b7e   :  { %v2918_v19 = vsel %vm2855_vm5, %v2907_v10, %v2914_v46  ;;  %v2919_v59 = vsel %vm2855_vm5, %v2911_v40, %v2915_v42  ;;  %v3004_v40 = vsub.s32 2, %v4985_v6  ;;  %vm4057_vm5 = vcmask 0  }
0x1b7f   :  { %4541 = vrcp.f32 %v2918_v19  ;;  %v2941_v22 = vsel %vm2940_vm6, 0.0, %v2918_v19  ;;  %v2942_v21 = vsel %vm2940_vm6, 0.0, %v2919_v59 }
0x1b80   :  { %4543 = vrcp.f32 %v2919_v59 }
0x1b8c   :  { %v4542_v24 = vpop.eup %4541 }
0x1b8d   :  { %v4544_v34 = vpop.eup %4543  ;;  %v2922_v33 = vmul.f32 %v4542_v24, %v2918_v19 }
0x1b8e   :  { %v2923_v26 = vmul.f32 %v4544_v34, %v2919_v59 }
0x1b8f   :  { %v2924_v15 = vsub.f32 2.0, %v2922_v33 }
0x1b90   :  { %v2925_v0 = vsub.f32 2.0, %v2923_v26 }
0x1b91   :  { %v2926_v29 = vmul.f32 %v4542_v24, %v2924_v15 }
0x1b92   :  { %v2927_v18 = vmul.f32 %v4544_v34, %v2925_v0 }
0x1b93   :  { %2930 = vperm.xlu1 %4312, %v2926_v29  }
0x1b94   :  { %2935 = vperm.xlu0 %4311, %v2927_v18  }
0x1b97   :  { %2945 = vperm.xlu1 %4312, %v2941_v22  }
0x1b98   :  { %4313 = vset.pattern.permute.xlu0 %v4629_v28 }
0x1b9b   :  { %2950 = vperm.xlu1 %4312, %v2942_v21  }
0x1b9f   :  { %4314 = vset.pattern.permute.xlu1 %v4629_v28 }
0x1c0e   :  { %v2931_v5 = vpop.permute.xlu1 %2930 }
0x1c0f   :  { %v2938_v53 = vmul.f32 %v2931_v5, %v2918_v19  ;;  %v2936_v55 = vpop.permute.xlu0 %2935 }
0x1c10   :  { %v2939_v41 = vmul.f32 %v2936_v55, %v2919_v59 }
0x1c11   :  { %v2956_v13 = vrot.slane %v2938_v53, %v4991_v9 }
0x1c12   :  { %v2946_v52 = vpop.permute.xlu1 %2945  ;;  %v2960_v38 = vrot.slane %v2939_v41, %v4991_v9  ;;  %v4631_v41 = vmov 4  }
0x1c13   :  { %v2961_v54 = vmul.f32 %v2956_v13, %v2946_v52 }
0x1c15   :  { %v2963_v36 = vsub.f32 %v2918_v19, %v2961_v54 }
0x1c16   :  { %v2951_v49 = vpop.permute.xlu1 %2950 }
0x1c17   :  { %v2967_v56 = vsel %vm2940_vm6, %v2956_v13, %v2963_v36  ;;  %v2962_v63 = vmul.f32 %v2960_v38, %v2951_v49  ;;  %v3053_v13 = vsub.s32 3, %v4985_v6 }
0x1c18   :  { %4545 = vrcp.f32 %v2967_v56  ;;  %v2990_v45 = vsel %vm2989_vm7, 0.0, %v2967_v56 }
0x1c19   :  { %v2964_v60 = vsub.f32 %v2919_v59, %v2962_v63 }
0x1c1b   :  { %v2968_v23 = vsel %vm2940_vm6, %v2960_v38, %v2964_v60 }
0x1c1c   :  { %4547 = vrcp.f32 %v2968_v23  ;;  %v2991_v57 = vsel %vm2989_vm7, 0.0, %v2968_v23 }
0x1c25   :  { %v4546_v30 = vpop.eup %4545 }
0x1c26   :  { %v2971_v43 = vmul.f32 %v4546_v30, %v2967_v56 }
0x1c28   :  { %v2973_v62 = vsub.f32 2.0, %v2971_v43 }
0x1c29   :  { %v4548_v25 = vpop.eup %4547 }
0x1c2a   :  { %v2975_v58 = vmul.f32 %v4546_v30, %v2973_v62  ;;  %v2972_v27 = vmul.f32 %v4548_v25, %v2968_v23 }
0x1c2c   :  { %2979 = vperm.xlu0 %4313, %v2975_v58   ;;  %v2974_v51 = vsub.f32 2.0, %v2972_v27 }
0x1c2e   :  { %v2976_v9 = vmul.f32 %v4548_v25, %v2974_v51 }
0x1c30   :  { %2999 = vperm.xlu0 %4313, %v2991_v57   ;;  %2984 = vperm.xlu1 %4314, %v2976_v9  }
0x1c34   :  { %2994 = vperm.xlu1 %4314, %v2990_v45   ;;  %4315 = vset.pattern.permute.xlu0 %v4630_v16 }
0x1c38   :  { %4316 = vset.pattern.permute.xlu1 %v4630_v16 }
0x1ca7   :  { %v2980_v32 = vpop.permute.xlu0 %2979 }
0x1ca8   :  { %v2987_v10 = vmul.f32 %v2980_v32, %v2967_v56 }
0x1caa   :  { %v3005_v11 = vrot.slane %v2987_v10, %v3004_v40 }
0x1cab   :  { %v2985_v35 = vpop.permute.xlu1 %2984  ;;  %v3000_v46 = vpop.permute.xlu0 %2999 }
0x1cac   :  { %v2988_v61 = vmul.f32 %v2985_v35, %v2968_v23 }
0x1cae   :  { %v3009_v7 = vrot.slane %v2988_v61, %v3004_v40  ;;  %v4632_v61 = vmov 5  }
0x1caf   :  { %v2995_v42 = vpop.permute.xlu1 %2994 }
0x1cb0   :  { %v3011_v19 = vmul.f32 %v3009_v7, %v3000_v46  ;;  %v3010_v59 = vmul.f32 %v3005_v11, %v2995_v42  ;;  %v3102_v46 = vsub.s32 4, %v4985_v6 }
0x1cb2   :  { %v3013_v24 = vsub.f32 %v2968_v23, %v3011_v19  ;;  %v3012_v34 = vsub.f32 %v2967_v56, %v3010_v59 }
0x1cb4   :  { %v3017_v33 = vsel %vm2989_vm7, %v3009_v7, %v3013_v24  ;;  %v3016_v26 = vsel %vm2989_vm7, %v3005_v11, %v3012_v34 }
0x1cb5   :  { %4549 = vrcp.f32 %v3017_v33  ;;  %v3039_v53 = vsel %vm3038_vm8, 0.0, %v3016_v26  ;;  %v3040_v55 = vsel %vm3038_vm8, 0.0, %v3017_v33 }
0x1cb6   :  { %4551 = vrcp.f32 %v3016_v26 }
0x1cc2   :  { %v4550_v15 = vpop.eup %4549 }
0x1cc3   :  { %v4552_v0 = vpop.eup %4551  ;;  %v3021_v29 = vmul.f32 %v4550_v15, %v3017_v33 }
0x1cc4   :  { %v3020_v18 = vmul.f32 %v4552_v0, %v3016_v26 }
0x1cc5   :  { %v3023_v22 = vsub.f32 2.0, %v3021_v29 }
0x1cc6   :  { %v3022_v21 = vsub.f32 2.0, %v3020_v18 }
0x1cc7   :  { %v3025_v28 = vmul.f32 %v4550_v15, %v3023_v22 }
0x1cc8   :  { %v3024_v5 = vmul.f32 %v4552_v0, %v3022_v21 }
0x1cc9   :  { %3033 = vperm.xlu0 %4315, %v3025_v28  }
0x1cca   :  { %3028 = vperm.xlu1 %4316, %v3024_v5  }
0x1ccd   :  { %4317 = vset.pattern.permute.xlu0 %v4631_v41 }
0x1cce   :  { %3043 = vperm.xlu1 %4316, %v3039_v53  }
0x1cd2   :  { %3048 = vperm.xlu1 %4316, %v3040_v55  }
0x1cd6   :  { %4318 = vset.pattern.permute.xlu1 %v4631_v41 }
0x1d44   :  { %v3034_v54 = vpop.permute.xlu0 %3033 }
0x1d45   :  { %v3029_v52 = vpop.permute.xlu1 %3028  ;;  %v3037_v38 = vmul.f32 %v3034_v54, %v3017_v33 }
0x1d46   :  { %v3036_v36 = vmul.f32 %v3029_v52, %v3016_v26 }
0x1d47   :  { %v3058_v23 = vrot.slane %v3037_v38, %v3053_v13  ;;  %v4633_v38 = vmov 6  }
0x1d48   :  { %v3054_v49 = vrot.slane %v3036_v36, %v3053_v13 }
0x1d49   :  { %v3044_v56 = vpop.permute.xlu1 %3043 }
0x1d4a   :  { %v3059_v63 = vmul.f32 %v3054_v49, %v3044_v56 }
0x1d4c   :  { %v3061_v60 = vsub.f32 %v3016_v26, %v3059_v63 }
0x1d4d   :  { %v3049_v30 = vpop.permute.xlu1 %3048 }
0x1d4e   :  { %v3065_v43 = vsel %vm3038_vm8, %v3054_v49, %v3061_v60  ;;  %v3060_v62 = vmul.f32 %v3058_v23, %v3049_v30  ;;  %v3151_v49 = vsub.s32 5, %v4985_v6 }
0x1d4f   :  { %4553 = vrcp.f32 %v3065_v43  ;;  %v3088_v35 = vsel %vm3087_vm9, 0.0, %v3065_v43 }
0x1d50   :  { %v3062_v25 = vsub.f32 %v3017_v33, %v3060_v62 }
0x1d52   :  { %v3066_v58 = vsel %vm3038_vm8, %v3058_v23, %v3062_v25 }
0x1d53   :  { %4555 = vrcp.f32 %v3066_v58  ;;  %v3089_v40 = vsel %vm3087_vm9, 0.0, %v3066_v58 }
0x1d5c   :  { %v4554_v27 = vpop.eup %4553 }
0x1d5d   :  { %v3069_v51 = vmul.f32 %v4554_v27, %v3065_v43 }
0x1d5f   :  { %v3071_v9 = vsub.f32 2.0, %v3069_v51 }
0x1d60   :  { %v4556_v57 = vpop.eup %4555 }
0x1d61   :  { %v3073_v45 = vmul.f32 %v4554_v27, %v3071_v9  ;;  %v3070_v16 = vmul.f32 %v4556_v57, %v3066_v58 }
0x1d63   :  { %3077 = vperm.xlu0 %4317, %v3073_v45   ;;  %v3072_v32 = vsub.f32 2.0, %v3070_v16 }
0x1d65   :  { %v3074_v10 = vmul.f32 %v4556_v57, %v3072_v32 }
0x1d67   :  { %3097 = vperm.xlu0 %4317, %v3089_v40   ;;  %3082 = vperm.xlu1 %4318, %v3074_v10  }
0x1d6b   :  { %3092 = vperm.xlu1 %4318, %v3088_v35   ;;  %4319 = vset.pattern.permute.xlu0 %v4632_v61 }
0x1d6f   :  { %4320 = vset.pattern.permute.xlu1 %v4632_v61 }
0x1dde   :  { %v3078_v7 = vpop.permute.xlu0 %3077 }
0x1ddf   :  { %v3085_v11 = vmul.f32 %v3078_v7, %v3065_v43 }
0x1de1   :  { %v3103_v24 = vrot.slane %v3085_v11, %v3102_v46 }
0x1de2   :  { %v3083_v42 = vpop.permute.xlu1 %3082  ;;  %v3098_v34 = vpop.permute.xlu0 %3097 }
0x1de3   :  { %v3086_v19 = vmul.f32 %v3083_v42, %v3066_v58 }
0x1de5   :  { %v3107_v59 = vrot.slane %v3086_v19, %v3102_v46  ;;  %v4634_v19 = vmov 7  }
0x1de6   :  { %v3093_v33 = vpop.permute.xlu1 %3092 }
0x1de7   :  { %v3109_v26 = vmul.f32 %v3107_v59, %v3098_v34  ;;  %v3108_v15 = vmul.f32 %v3103_v24, %v3093_v33  ;;  %v3200_v34 = vsub.s32 6, %v4985_v6 }
0x1de9   :  { %v3111_v0 = vsub.f32 %v3066_v58, %v3109_v26  ;;  %v3110_v29 = vsub.f32 %v3065_v43, %v3108_v15 }
0x1deb   :  { %v3115_v18 = vsel %vm3087_vm9, %v3107_v59, %v3111_v0  ;;  %v3114_v22 = vsel %vm3087_vm9, %v3103_v24, %v3110_v29 }
0x1dec   :  { %4557 = vrcp.f32 %v3115_v18  ;;  %v3137_v54 = vsel %vm3136_vm10, 0.0, %v3114_v22  ;;  %v3138_v36 = vsel %vm3136_vm10, 0.0, %v3115_v18 }
0x1ded   :  { %4559 = vrcp.f32 %v3114_v22 }
0x1df9   :  { %v4558_v21 = vpop.eup %4557 }
0x1dfa   :  { %v4560_v28 = vpop.eup %4559  ;;  %v3119_v5 = vmul.f32 %v4558_v21, %v3115_v18 }
0x1dfb   :  { %v3118_v53 = vmul.f32 %v4560_v28, %v3114_v22 }
0x1dfc   :  { %v3121_v55 = vsub.f32 2.0, %v3119_v5 }
0x1dfd   :  { %v3120_v41 = vsub.f32 2.0, %v3118_v53 }
0x1dfe   :  { %v3123_v13 = vmul.f32 %v4558_v21, %v3121_v55 }
0x1dff   :  { %v3122_v52 = vmul.f32 %v4560_v28, %v3120_v41 }
0x1e00   :  { %3131 = vperm.xlu0 %4319, %v3123_v13  }
0x1e01   :  { %3126 = vperm.xlu1 %4320, %v3122_v52  }
0x1e04   :  { %4321 = vset.pattern.permute.xlu0 %v4633_v38 }
0x1e05   :  { %3141 = vperm.xlu1 %4320, %v3137_v54  }
0x1e09   :  { %3146 = vperm.xlu1 %4320, %v3138_v36  }
0x1e0d   :  { %4322 = vset.pattern.permute.xlu1 %v4633_v38 }
0x1e7b   :  { %v3132_v63 = vpop.permute.xlu0 %3131 }
0x1e7c   :  { %v3127_v56 = vpop.permute.xlu1 %3126  ;;  %v3135_v23 = vmul.f32 %v3132_v63, %v3115_v18 }
0x1e7d   :  { %v3134_v60 = vmul.f32 %v3127_v56, %v3114_v22 }
0x1e7e   :  { %v3156_v58 = vrot.slane %v3135_v23, %v3151_v49  ;;  %v3249_v23 = vsub.s32 7, %v4985_v6 }
0x1e7f   :  { %v3152_v30 = vrot.slane %v3134_v60, %v3151_v49 }
0x1e80   :  { %v3142_v43 = vpop.permute.xlu1 %3141 }
0x1e81   :  { %v3157_v62 = vmul.f32 %v3152_v30, %v3142_v43 }
0x1e83   :  { %v3159_v25 = vsub.f32 %v3114_v22, %v3157_v62 }
0x1e84   :  { %v3147_v27 = vpop.permute.xlu1 %3146 }
0x1e85   :  { %v3163_v51 = vsel %vm3136_vm10, %v3152_v30, %v3159_v25  ;;  %v3158_v9 = vmul.f32 %v3156_v58, %v3147_v27 }
0x1e86   :  { %4561 = vrcp.f32 %v3163_v51  ;;  %v3186_v42 = vsel %vm3185_vm12, 0.0, %v3163_v51 }
0x1e87   :  { %v3160_v57 = vsub.f32 %v3115_v18, %v3158_v9 }
0x1e89   :  { %v3164_v45 = vsel %vm3136_vm10, %v3156_v58, %v3160_v57 }
0x1e8a   :  { %4563 = vrcp.f32 %v3164_v45  ;;  %v3187_v46 = vsel %vm3185_vm12, 0.0, %v3164_v45 }
0x1e93   :  { %v4562_v16 = vpop.eup %4561 }
0x1e94   :  { %v3167_v32 = vmul.f32 %v4562_v16, %v3163_v51 }
0x1e96   :  { %v3169_v10 = vsub.f32 2.0, %v3167_v32 }
0x1e97   :  { %v4564_v40 = vpop.eup %4563 }
0x1e98   :  { %v3171_v35 = vmul.f32 %v4562_v16, %v3169_v10  ;;  %v3168_v61 = vmul.f32 %v4564_v40, %v3164_v45 }
0x1e9a   :  { %3175 = vperm.xlu0 %4321, %v3171_v35   ;;  %v3170_v7 = vsub.f32 2.0, %v3168_v61 }
0x1e9c   :  { %v3172_v11 = vmul.f32 %v4564_v40, %v3170_v7 }
0x1e9e   :  { %3195 = vperm.xlu0 %4321, %v3187_v46   ;;  %3180 = vperm.xlu1 %4322, %v3172_v11  }
0x1ea2   :  { %3190 = vperm.xlu1 %4322, %v3186_v42   ;;  %4323 = vset.pattern.permute.xlu0 %v4634_v19 }
0x1ea6   :  { %4324 = vset.pattern.permute.xlu1 %v4634_v19 }
0x1f15   :  { %v3176_v59 = vpop.permute.xlu0 %3175 }
0x1f16   :  { %v3183_v24 = vmul.f32 %v3176_v59, %v3163_v51 }
0x1f18   :  { %v3201_v0 = vrot.slane %v3183_v24, %v3200_v34 }
0x1f19   :  { %v3181_v33 = vpop.permute.xlu1 %3180  ;;  %v3196_v29 = vpop.permute.xlu0 %3195 }
0x1f1a   :  { %v3184_v26 = vmul.f32 %v3181_v33, %v3164_v45 }
0x1f1c   :  { %v3205_v15 = vrot.slane %v3184_v26, %v3200_v34 }
0x1f1d   :  { %v3191_v18 = vpop.permute.xlu1 %3190 }
0x1f1e   :  { %v3207_v22 = vmul.f32 %v3205_v15, %v3196_v29  ;;  %v3206_v21 = vmul.f32 %v3201_v0, %v3191_v18 }
0x1f20   :  { %v3209_v28 = vsub.f32 %v3164_v45, %v3207_v22  ;;  %v3208_v5 = vsub.f32 %v3163_v51, %v3206_v21 }
0x1f22   :  { %v3213_v53 = vsel %vm3185_vm12, %v3205_v15, %v3209_v28  ;;  %v3212_v55 = vsel %vm3185_vm12, %v3201_v0, %v3208_v5 }
0x1f23   :  { %4565 = vrcp.f32 %v3213_v53  ;;  %v3235_v63 = vsel %vm3234_vm14, 0.0, %v3212_v55  ;;  %v3236_v60 = vsel %vm3234_vm14, 0.0, %v3213_v53 }
0x1f24   :  { %4567 = vrcp.f32 %v3212_v55 }
0x1f30   :  { %v4566_v41 = vpop.eup %4565 }
0x1f31   :  { %v4568_v13 = vpop.eup %4567  ;;  %v3217_v52 = vmul.f32 %v4566_v41, %v3213_v53 }
0x1f32   :  { %v3216_v54 = vmul.f32 %v4568_v13, %v3212_v55 }
0x1f33   :  { %v3219_v36 = vsub.f32 2.0, %v3217_v52 }
0x1f34   :  { %v3218_v38 = vsub.f32 2.0, %v3216_v54 }
0x1f35   :  { %v3221_v49 = vmul.f32 %v4566_v41, %v3219_v36  ;;  %v4116_v41 = vsel %vm3355_vm3, 1.0, %v4621_v20 }
0x1f36   :  { %v3220_v56 = vmul.f32 %v4568_v13, %v3218_v38 }
0x1f37   :  { %3229 = vperm.xlu0 %4323, %v3221_v49  }
0x1f38   :  { %3224 = vperm.xlu1 %4324, %v3220_v56  }
0x1f3b   :  { %2171 = vrot.lane.b32.xlu0 %v5564_v48, %s4625_s23 }
0x1f3c   :  { %3239 = vperm.xlu1 %4324, %v3235_v63  }
0x1f40   :  { %3244 = vperm.xlu1 %4324, %v3236_v60  }
0x1f44   :  { %2179 = vrot.lane.b32.xlu1 %v5578_v50, %s4635_s13 }
0x1fb2   :  { %v3230_v43 = vpop.permute.xlu0 %3229 }
0x1fb3   :  { %v3225_v30 = vpop.permute.xlu1 %3224  ;;  %v3233_v25 = vmul.f32 %v3230_v43, %v3213_v53 }
0x1fb4   :  { %v3232_v62 = vmul.f32 %v3225_v30, %v3212_v55 }
0x1fb5   :  { %v3254_v48 = vrot.slane %v3233_v25, %v3249_v23 }
0x1fb6   :  { %v3250_v58 = vrot.slane %v3232_v62, %v3249_v23  ;;  %v2172_v10 = vpop.permute.xlu0 %2171 }
0x1fb7   :  { %v3240_v27 = vpop.permute.xlu1 %3239 }
0x1fb8   :  { %v3255_v51 = vmul.f32 %v3250_v58, %v3240_v27 }
0x1fba   :  { %v3257_v9 = vsub.f32 %v3212_v55, %v3255_v51 }
0x1fbb   :  { %v3245_v57 = vpop.permute.xlu1 %3244 }
0x1fbc   :  { %v3256_v45 = vmul.f32 %v3254_v48, %v3245_v57  ;;  %v5790_v16 = vsel %vm3234_vm14, %v3250_v58, %v3257_v9  ;;  %v4637_v58 = vmov 8  }
0x1fbd   :  { %v3335_v50 = vmul.f32 %v5790_v16, %v5692_v39  ;;  %3265 = vrot.lane.b32.xlu0 %v5790_v16, %s4636_s14 }
0x1fbe   :  { %v3258_v32 = vsub.f32 %v3213_v53, %v3256_v45  ;;  %v4115_v53 = vsel %vm3352_vm2, 1.0, %v4621_v20 }
0x1fbf   :  { %v3338_v40 = vsel %vm3337_vm15, %v3335_v50, 0.0  ;;  %v2180_v35 = vpop.permute.xlu1 %2179 }
0x1fc0   :  { %v3339_v61 = vrot.slane %v3338_v40, 4  ;;  %v5797_v7 = vsel %vm422_vm13, %v2172_v10, %v2180_v35  ;;  %v5801_v11 = vsel %vm3234_vm14, %v3254_v48, %v3258_v32  ;;  %v3788_v10 = vld [vmem:[%s5990_s16 + $0x58] sm:$0xff]  ;;  %v3786_v35 = vld [vmem:[%s5990_s16 + $0x48] sm:$0xff] }
0x1fc1   :  { %3267 = vrot.lane.b32.xlu1 %v5801_v11, %s4636_s14  ;;  %v3336_v46 = vmul.f32 %v5801_v11, %v5692_v39  ;;  %4250 = vmatpush3.msra.mxu0 %v5797_v7 }
0x1fc2   :  { %v3340_v42 = vadd.f32 %v3339_v61, %v3338_v40  ;;  %4259 = vmatprep.subr.mxu0 %v4621_v20  ;;  %v3787_v40 = vld [vmem:[%s5990_s16 + $0x50] sm:$0xff]  ;;  %v3785_v61 = vld [vmem:[%s5990_s16 + $0x40] sm:$0xff] }
0x1fc3   :  { %v3345_v19 = vsel %vm3337_vm15, %v3336_v46, 0.0  ;;  %v3783_v46 = vld [vmem:[%s5990_s16 + $0x30] sm:$0xff] }
0x1fc4   :  { %v3341_v59 = vrot.slane %v3340_v42, 2  ;;  %v3346_v24 = vrot.slane %v3345_v19, 4 }
0x1fc6   :  { %v3347_v34 = vadd.f32 %v3346_v24, %v3345_v19  ;;  %v3342_v33 = vadd.f32 %v3341_v59, %v3340_v42  ;;  %v3782_v42 = vld [vmem:[%s5990_s16 + $0x28] sm:$0xff]  ;;  %v3781_v19 = vld [vmem:[%s5990_s16 + $0x20] sm:$0xff]  ;;  %v3780_v59 = vld [vmem:[%s5990_s16 + $0x18] sm:$0xff] }
0x1fc7   :  { %v3779_v24 = vld [vmem:[%s5990_s16 + $0x10] sm:$0xff] }
0x1fc8   :  { %v3348_v26 = vrot.slane %v3347_v34, 2  ;;  %v3343_v15 = vrot.slane %v3342_v33, 1 }
0x1fca   :  { %v3344_v0 = vadd.f32 %v3343_v15, %v3342_v33  ;;  %v3349_v29 = vadd.f32 %v3348_v26, %v3347_v34  ;;  %v3778_v34 = vld [vmem:[%s5990_s16 + $0x8] sm:$0xff]  ;;  %v3777_v15 = vld [vmem:[%s5990_s16] sm:$0xff] }
0x1fcc   :  { %3360 = vrot.lane.b32.xlu0 %v3344_v0, %s4636_s14  ;;  %v3350_v18 = vrot.slane %v3349_v29, 1  ;;  %v3794_v0 = vld [vmem:[%s5990_s16 + $0x88] sm:$0xff] }
0x1fce   :  { %v3351_v22 = vadd.f32 %v3350_v18, %v3349_v29 }
0x1fd0   :  { %3362 = vrot.lane.b32.xlu1 %v3351_v22, %s4636_s14  ;;  %v4117_v22 = vld [vmem:[%s5989_s15] ss:$0 sm:$0xff]  ;;  %s4638_s15 = smov 48  }
0x202f   :  { %v3266_v39 = vpop.permute.xlu0 %3265 }
0x2030   :  { %3271 = vxpose.xlu0.b32.start.end [1/1] (short) (narrow) %v3266_v39, 8 }
0x2033   :  { %v3268_v21 = vpop.permute.xlu1 %3267 }
0x2034   :  { %3303 = vxpose.xlu1.b32.start.end [1/1] (short) (narrow) %v3268_v21, 8 }
0x203e   :  { %v3361_v28 = vpop.permute.xlu0 %3360 }
0x203f   :  { %v3366_v5 = vmul.f32 %v3361_v28, %v5680_v3 }
0x2041   :  { %v3368_v54 = vmul.f32 %v4115_v53, %v3366_v5  ;;  %v3793_v5 = vld [vmem:[%s5990_s16 + $0x80] sm:$0xff] }
0x2042   :  { %v3363_v55 = vpop.permute.xlu1 %3362 }
0x2052   :  { %2181 = vrot.lane.b32.xlu1 %v5592_v1, %s4635_s13  ;;  %v3367_v1 = vmul.f32 %v3363_v55, %v5678_v14 }
0x2054   :  { %v3369_v56 = vmul.f32 %v4115_v53, %v3367_v1  ;;  %v3888_v1 = vld [vmem:[%s5992_s18 + $0x28] sm:$0xff] }
0x2059   :  { %2173 = vrot.lane.b32.xlu0 %v5586_v31, %s4625_s23 }
0x20ac   :  { %v3287_v13 = vpop.trf.xlu0 }
0x20ad   :  { %v3370_v52 = vmul.f32 %v3287_v13, %v5680_v3  ;;  %v2762_v3 = vrot.slane %v5647_v12, %v4988_v8 }
0x20af   :  { %v3372_v36 = vmul.f32 %v4116_v41, %v3370_v52  ;;  %v2765_v43 = vmul.f32 %v2762_v3, %v5604_v47 }
0x20b0   :  { %v3319_v31 = vpop.trf.xlu1 }
0x20b1   :  { %v3374_v38 = vsub.f32 %v3368_v54, %v3372_v36  ;;  %v3371_v49 = vmul.f32 %v3319_v31, %v5678_v14  ;;  %v2764_v14 = vmul.f32 %v2762_v3, %v5597_v37  ;;  %v2769_v62 = vsel %vm398_vm11, %v2765_v43, 0.0  ;;  %v3887_v36 = vld [vmem:[%s5992_s18 + $0x20] sm:$0xff]  ;;  %v3886_v43 = vld [vmem:[%s5992_s18 + $0x18] sm:$0xff] }
0x20b3   :  { %v3373_v6 = vmul.f32 %v4116_v41, %v3371_v49  ;;  %3376 = vxpose.xlu0.b32.start.end [1/1] (short) (narrow) %v3374_v38, 8  ;;  %v2766_v25 = vsel %vm398_vm11, %v2764_v14, 0.0  ;;  %v3883_v14 = vld [vmem:[%s5992_s18] sm:$0xff] }
0x20b5   :  { %v3375_v63 = vsub.f32 %v3369_v56, %v3373_v6 }
0x20b7   :  { %3408 = vxpose.xlu1.b32.start.end [1/1] (short) (narrow) %v3375_v63, 8 }
0x20c4   :  { %v2182_v60 = vpop.permute.xlu1 %2181 }
0x20cb   :  { %v2174_v23 = vpop.permute.xlu0 %2173 }
0x20cc   :  { %v5822_v30 = vsel %vm422_vm13, %v2174_v23, %v2182_v60  ;;  %vm3774_vm13 = vcmask 785408  }
0x20cd   :  { %4255 = vmatpush3.msra.mxu1 %v5822_v30 }
0x20ce   :  { %4264 = vmatprep.subr.mxu1 %v4621_v20 }
0x20d5   :  { %4326 = vset.pattern.permute.xlu1 %v4637_v58 }
0x20dc   :  { %4325 = vset.pattern.permute.xlu0 %v4637_v58 }
0x20de   :  { %2770 = vadd.xlane.f32.xlu1 %v2769_v62  ;;  %v4122_v62 = vld [vmem:[%s6017_s24] ss:$0 sm:$0xff] }
0x20e0   :  { %2767 = vadd.xlane.f32.xlu0 %v2766_v25 }
0x212f   :  { %v3392_v27 = vpop.trf.xlu0 }
0x2130   :  { %4252 = vmatmul.mubr.msk.f32.vlgmr.msra.gmra.mxu0 %vm2199_vm0, %v3392_v27 }
0x2131   :  { %4260 = vmatpush3.msra.mxu0 %v5797_v7  ;;  %4261 = vmatprep.mubr.msk.f32.mxu0 %vm4627_vm1, %v4621_v20 }
0x2132   :  { %3806 = vmatprep.subr.mxu0 %v4621_v20 }
0x2133   :  { %v3424_v8 = vpop.trf.xlu1 }
0x2134   :  { %4257 = vmatmul.mubr.msk.f32.vlgmr.msra.gmra.mxu1 %vm2199_vm0, %v3424_v8  ;;  %4262 = vmatmul.mubr.msk.f32.vlgmr.msra.gmra.mxu0 %vm2199_vm0, %v3374_v38 }
0x2135   :  { %4265 = vmatpush3.msra.mxu1 %v5822_v30  ;;  %4266 = vmatprep.mubr.msk.f32.mxu1 %vm4627_vm1, %v4621_v20 }
0x2136   :  { %4269 = vmatprep.subr.mxu1 %v3888_v1 }
0x2138   :  { %4267 = vmatmul.mubr.msk.f32.vlgmr.msra.gmra.mxu1 %vm2199_vm0, %v3375_v63  ;;  %vm3771_vm0 = vcmask 392192  }
0x2139   :  { %4270 = vmatpush3.msra.mxu1 %v3888_v1 }
0x213a   :  { %4271 = vmatprep.subr.mxu1 %v3887_v36 }
0x213b   :  { %4272 = vmatpush3.msra.mxu1 %v3887_v36 }
0x213c   :  { %4273 = vmatprep.subr.mxu1 %v3886_v43 }
0x213d   :  { %4274 = vmatpush3.msra.mxu1 %v3886_v43 }
0x2167   :  { %v2771_v37 = vpop.xlane.xlu1 %2770 }
0x2168   :  { %v2830_v47 = vsub.f32 %v2771_v37, %v5668_v4  ;;  %v3792_v4 = vld [vmem:[%s5990_s16 + $0x78] sm:$0xff] }
0x2169   :  { %v2768_v12 = vpop.xlane.xlu0 %2767  ;;  %3807 = vmatpush1.msra.mxu0 %v3792_v4 }
0x216a   :  { %v2833_v51 = vmul.f32 1.442695, %v2830_v47  ;;  %v2829_v9 = vsub.f32 %v2768_v12, %v5671_v44  ;;  %v3791_v44 = vld [vmem:[%s5990_s16 + $0x70] sm:$0xff]  ;;  %3808 = vmatprep.subr.mxu0 %v4621_v20 }
0x216b   :  { %3809 = vmatpush1.msra.mxu0 %v3791_v44 }
0x216c   :  { %4569 = vpow2.f32 %v2833_v51  ;;  %v2831_v48 = vmul.f32 1.442695, %v2829_v9  ;;  %3810 = vmatprep.subr.mxu0 %v4621_v20  ;;  %v4125_v9 = vld [vmem:[%s5993_s19] ss:$0 sm:$0xff] }
0x216e   :  { %4571 = vpow2.f32 %v2831_v48 }
0x2179   :  { %v4570_v57 = vpop.eup %4569 }
0x217a   :  { %v3441_v45 = vmul.f32 %v4570_v57, %v5801_v11  ;;  %v3784_v11 = vld [vmem:[%s5990_s16 + $0x38] sm:$0xff] }
0x217b   :  { %v4572_v50 = vpop.eup %4571 }
0x217c   :  { %3450 = vperm.xlu1 %4326, %v3441_v45   ;;  %v3440_v32 = vmul.f32 %v4572_v50, %v5790_v16  ;;  %v3790_v16 = vld [vmem:[%s5990_s16 + $0x68] sm:$0xff] }
0x217d   :  { %3811 = vmatpush1.msra.mxu0 %v3790_v16 }
0x217e   :  { %3445 = vperm.xlu0 %4325, %v3440_v32   ;;  %3812 = vmatprep.subr.mxu0 %v4621_v20 }
0x2180   :  { %4327 = vset.pattern.permute.xlu1 %v4620_v2 }
0x2182   :  { %4328 = vset.pattern.permute.xlu0 %v4620_v2  ;;  %v3789_v2 = vld [vmem:[%s5990_s16 + $0x60] sm:$0xff]  ;;  %s4639_s16 = smov 96  }
0x2183   :  { %3813 = vmatpush1.msra.mxu0 %v3789_v2 }
0x2184   :  { %3814 = vmatprep.subr.mxu0 %v4621_v20 }
0x2185   :  { %3815 = vmatpush1.msra.mxu0 %v3788_v10 }
0x2186   :  { %3816 = vmatprep.subr.mxu0 %v4621_v20 }
0x2187   :  { %3817 = vmatpush1.msra.mxu0 %v3787_v40 }
0x2188   :  { %3818 = vmatprep.subr.mxu0 %v4621_v20 }
0x2189   :  { %3819 = vmatpush1.msra.mxu0 %v3786_v35 }
0x218a   :  { %3820 = vmatprep.subr.mxu0 %v4621_v20 }
0x218b   :  { %3821 = vmatpush1.msra.mxu0 %v3785_v61  ;;  %v3999_v61 = vld [vmem:[%s5994_s20] sm:$0xff] }
0x218c   :  { %3822 = vmatprep.subr.mxu0 %v4621_v20 }
0x218d   :  { %3823 = vmatpush1.msra.mxu0 %v3784_v11  ;;  %v4000_v11 = vld [vmem:[%s5994_s20 + $0x8] sm:$0xff] }
0x218e   :  { %3824 = vmatprep.subr.mxu0 %v4621_v20 }
0x218f   :  { %3825 = vmatpush1.msra.mxu0 %v3783_v46 }
0x2190   :  { %3826 = vmatprep.subr.mxu0 %v4621_v20 }
0x2191   :  { %3827 = vmatpush1.msra.mxu0 %v3782_v42 }
0x2192   :  { %3828 = vmatprep.subr.mxu0 %v4621_v20 }
0x2193   :  { %3829 = vmatpush1.msra.mxu0 %v3781_v19 }
0x2194   :  { %3830 = vmatprep.subr.mxu0 %v4621_v20 }
0x2195   :  { %3831 = vmatpush1.msra.mxu0 %v3780_v59 }
0x2196   :  { %3832 = vmatprep.subr.mxu0 %v4621_v20 }
0x2197   :  { %3833 = vmatpush1.msra.mxu0 %v3779_v24 }
0x2198   :  { %3834 = vmatprep.subr.mxu0 %v4621_v20 }
0x2199   :  { %3835 = vmatpush1.msra.mxu0 %v3778_v34 }
0x219a   :  { %3836 = vmatprep.subr.mxu0 %v4621_v20 }
0x219b   :  { %3837 = vmatpush1.msra.mxu0 %v3777_v15 }
0x219c   :  { %3866 = vmatprep.subr.mxu0 %v4621_v20 }
0x219d   :  { %3867 = vmatpush2.msra.mxu0 %v3794_v0 }
0x219e   :  { %3868 = vmatprep.subr.mxu0 %v4621_v20 }
0x219f   :  { %3869 = vmatpush2.msra.mxu0 %v3793_v5  ;;  %v4020_v5 = vld [vmem:[%s5995_s21 + $0x8] sm:$0xff] }
0x21f0   :  { %v3530_v33 = vpop.f32.mrf.mxu0 }
0x21f2   :  { %v4253_v26 = vpop.f32.mrf.mxu0 }
0x21f4   :  { %v3603_v29 = vpop.f32.mrf.mxu1  ;;  %v3678_v18 = vpop.f32.mrf.mxu0 }
0x21f6   :  { %v4258_v39 = vpop.f32.mrf.mxu1  ;;  %v4263_v21 = vpop.f32.mrf.mxu0 }
0x21f7   :  { %v3451_v28 = vpop.permute.xlu1 %3450 }
0x21f8   :  { %v3460_v53 = vmul.f32 %v4117_v22, %v3451_v28  ;;  %v3751_v55 = vpop.f32.mrf.mxu1 }
0x21f9   :  { %v3446_v41 = vpop.permute.xlu0 %3445 }
0x21fa   :  { %v3608_v13 = vadd.f32 %v3603_v29, %v3460_v53  ;;  %v3459_v52 = vmul.f32 %v4117_v22, %v3446_v41  ;;  %v4268_v54 = vpop.f32.mrf.mxu1 }
0x21fb   :  { %v4040_v54 = vsel %vm4025_vm4, %v4020_v5, 0.0 }
0x21fc   :  { %3759 = vrot.lane.b32.xlu1 %v3608_v13, %s4638_s15  ;;  %v3607_v31 = vadd.f32 %v3530_v33, %v3459_v52 }
0x2200   :  { %3757 = vrot.lane.b32.xlu1 %v3607_v31, %s4638_s15  ;;  %s4065_s15 = sshll.u32 %s4640_s30, 4  ;;  %s4066_s15 = int_to_ptr.vmem [resolvable:$true] %s4065_s15 }
0x2201   :  { %s4598_s7 = scalar_lea.vmem %s4066_s15, 16  ;;  %s4602_s28 = scalar_lea.vmem %s4066_s15, 32 }
0x2202   :  { %p4599_p0 = scmp.ne.s32.totalorder %s4066_s15, %s4598_s7  ;;  %p4603_p1 = scmp.lt.s32.totalorder %s4066_s15, %s4066_s15 }
0x2203   :  { %p4604_p2 = scmp.lt.s32.totalorder %s4602_s28, %s4598_s7 }
0x2204   :  { %3765 = vrot.lane.b32.xlu1 %v3678_v18, %s4639_s16 }
0x2205   :  { %p4605_p3 = por %p4604_p2, %p4603_p1 }
0x2207   :  { %p4606_p4 = pnand %p4605_p3, %p4599_p0 }
0x2208   :  { %3767 = vrot.lane.b32.xlu1 %v3751_v55, %s4639_s16 }
0x226e   :  { %v3760_v38 = vpop.permute.xlu1 %3759 }
0x226f   :  { %v3773_v60 = vsel %vm3771_vm0, %v5822_v30, %v3760_v38  ;;  %v3884_v30 = vld [vmem:[%s5992_s18 + $0x8] sm:$0xff] }
0x2272   :  { %v3758_v49 = vpop.permute.xlu1 %3757 }
0x2273   :  { %v3772_v56 = vsel %vm3771_vm0, %v5797_v7, %v3758_v49  ;;  %v3885_v7 = vld [vmem:[%s5992_s18 + $0x10] sm:$0xff] }
0x2274   :  { %4275 = vmatprep.subr.mxu1 %v3885_v7 }
0x2275   :  { %4276 = vmatpush3.msra.mxu1 %v3885_v7 }
0x2276   :  { %v3766_v6 = vpop.permute.xlu1 %3765  ;;  %4277 = vmatprep.subr.mxu1 %v3884_v30 }
0x2277   :  { %v3775_v63 = vsel %vm3774_vm13, %v3772_v56, %v3766_v6  ;;  %4123 = vmatprep.mubr.msk.f32.mxu0 %vm398_vm11, %v3766_v6  ;;  %4278 = vmatpush3.msra.mxu1 %v3884_v30 }
0x2278   :  { %3871 = vmatmul.mubr.f32.vlgmr.msra.gmra.mxu0 %v3775_v63  ;;  %4279 = vmatprep.subr.mxu1 %v3883_v14 }
0x2279   :  { %4280 = vmatpush3.msra.mxu1 %v3883_v14 }
0x227a   :  { %v3768_v23 = vpop.permute.xlu1 %3767 }
0x227b   :  { %4124 = vmatprep.mubr.msk.f32.mxu0 %vm398_vm11, %v3768_v23  ;;  %v3776_v3 = vsel %vm3774_vm13, %v3773_v60, %v3768_v23 }
0x227c   :  { %3876 = vmatmul.mubr.f32.gmra.mxu0 %v3776_v3 }
0x2338   :  { %v3872_v25 = vpop.f32.mrf.mxu0 }
0x2339   :  { %v3873_v58 = vadd.f32 %v4122_v62, %v3872_v25 }
0x233a   :  { %v3874_v27 = vpop.f32.mrf.mxu0 }
0x233b   :  { %v3881_v8 = vmax.f32 %v3873_v58, 0.0 }
0x233c   :  { %v3877_v37 = vpop.f32.mrf.mxu0 }
0x233d   :  { %v3878_v47 = vadd.f32 %v4122_v62, %v3877_v37  ;;  %4281 = vmatprep.mubr.msk.f32.mxu1 %vm3771_vm0, %v3881_v8 }
0x233e   :  { %v3879_v12 = vpop.f32.mrf.mxu0 }
0x233f   :  { %v3882_v51 = vmax.f32 %v3878_v47, 0.0 }
0x2341   :  { %4282 = vmatmul.mubr.msk.f32.vlgmr.msra.gmra.mxu1 %vm3771_vm0, %v3882_v51 }
0x2401   :  { %v4283_v48 = vpop.f32.mrf.mxu1 }
0x2402   :  { %v3974_v57 = vadd.f32 %v4283_v48, %v4125_v9 }
0x2403   :  { %v3968_v45 = vpop.f32.mrf.mxu1 }
0x2404   :  { %v3969_v50 = vadd.f32 %v4125_v9, %v3968_v45  ;;  %3979 = vmax.xlane.f32.xlu0 %v3974_v57 }
0x2406   :  { %3977 = vmax.xlane.f32.xlu1 %v3969_v50 }
0x248d   :  { %v3980_v32 = vpop.xlane.xlu0 %3979 }
0x248e   :  { %v3982_v4 = vsub.f32 %v3974_v57, %v3980_v32 }
0x248f   :  { %v3978_v44 = vpop.xlane.xlu1 %3977 }
0x2490   :  { %v3985_v16 = vmul.f32 1.442695, %v3982_v4  ;;  %v3981_v2 = vsub.f32 %v3969_v50, %v3978_v44 }
0x2492   :  { %4573 = vpow2.f32 %v3985_v16  ;;  %v3983_v10 = vmul.f32 1.442695, %v3981_v2 }
0x2494   :  { %4575 = vpow2.f32 %v3983_v10 }
0x249f   :  { %v4574_v40 = vpop.eup %4573 }
0x24a0   :  { %3989 = vadd.xlane.f32.xlu0 %v4574_v40 }
0x24a1   :  { %v4576_v35 = vpop.eup %4575 }
0x24a2   :  { %3987 = vadd.xlane.f32.xlu1 %v4576_v35 }
0x24b3   :  { %4002 = vperm.xlu1 %4327, %v3999_v61  }
0x24b6   :  { %4005 = vperm.xlu0 %4328, %v4000_v11  }
0x2529   :  { %v3990_v46 = vpop.xlane.xlu0 %3989 }
0x252a   :  { %4577 = vlog2.f32 %v3990_v46 }
0x252b   :  { %v3988_v42 = vpop.xlane.xlu1 %3987 }
0x252c   :  { %4579 = vlog2.f32 %v3988_v42 }
0x252f   :  { %v4003_v24 = vpop.permute.xlu1 %4002 }
0x2530   :  { %vm4007_vm1 = vcmp.eq.s32.totalorder %v4809_v17, %v4003_v24 }
0x2531   :  { %v4006_v19 = vpop.permute.xlu0 %4005  ;;  %v4128_v22 = vsel %vm4007_vm1, 1.0, %v4621_v20 }
0x2532   :  { %vm4008_vm11 = vcmp.eq.s32.totalorder %v4809_v17, %v4006_v19  ;;  %v4019_v17 = vld [vmem:[%s5995_s21] sm:$0xff] }
0x2533   :  { %v4129_v0 = vsel %vm4008_vm11, 1.0, %v4621_v20  ;;  %v4039_v36 = vsel %vm4025_vm4, %v4019_v17, 0.0 }
0x2534   :  { %v4041_v49 = vadd.f32 %v4040_v54, %v4039_v36 }
0x2537   :  { %v4578_v59 = vpop.eup %4577 }
0x2538   :  { %v3994_v34 = vmul.f32 0.6931472, %v4578_v59 }
0x2539   :  { %v4580_v33 = vpop.eup %4579 }
0x253a   :  { %v3996_v26 = vadd.f32 %v3994_v34, %v3980_v32  ;;  %v3992_v15 = vmul.f32 0.6931472, %v4580_v33 }
0x253c   :  { %v3995_v29 = vadd.f32 %v3992_v15, %v3978_v44  ;;  %v3998_v18 = vsub.f32 %v3974_v57, %v3996_v26 }
0x253e   :  { %v4014_v39 = vmul.f32 %v4129_v0, %v3998_v18  ;;  %v3997_v21 = vsub.f32 %v3969_v50, %v3995_v29 }
0x2540   :  { %v4013_v28 = vmul.f32 %v4128_v22, %v3997_v21  ;;  %4017 = vadd.xlane.f32.xlu0 %v4014_v39 }
0x2542   :  { %4015 = vadd.xlane.f32.xlu1 %v4013_v28 }
0x25c9   :  { %v4018_v53 = vpop.xlane.xlu0 %4017 }
0x25ca   :  { %v4022_v55 = vsub.f32 0.0, %v4018_v53 }
0x25cb   :  { %v4016_v41 = vpop.xlane.xlu1 %4015 }
0x25cc   :  { %v4024_v13 = vmul.f32 %v4022_v55, %v4020_v5  ;;  %v4021_v52 = vsub.f32 0.0, %v4016_v41 }
0x25ce   :  { %v4023_v20 = vmul.f32 %v4021_v52, %v4019_v17  ;;  %v4027_v1 = vsel %vm4025_vm4, %v4024_v13, 0.0 }
0x25d0   :  { %v4026_v31 = vsel %vm4025_vm4, %v4023_v20, 0.0 }
0x25d1   :  { %v4028_v38 = vadd.f32 %v4027_v1, %v4026_v31 }
0x25d3   :  { %4029 = vadd.xlane.f32.xlu1 %v4028_v38 }
0x25d7   :  { %4042 = vadd.xlane.f32.xlu1 %v4041_v49 }
0x265c   :  { %v4030_v56 = vpop.xlane.xlu1 %4029 }
0x265d   :  { %v4031_v6 = vrot.slane %v4030_v56, 4 }
0x265f   :  { %v4032_v63 = vadd.f32 %v4031_v6, %v4030_v56 }
0x2660   :  { %v4043_v60 = vpop.xlane.xlu1 %4042 }
0x2661   :  { %v4033_v23 = vrot.slane %v4032_v63, 2  ;;  %v4044_v3 = vrot.slane %v4043_v60, 4 }
0x2663   :  { %v4045_v43 = vadd.f32 %v4044_v3, %v4043_v60  ;;  %v4034_v7 = vadd.f32 %v4033_v23, %v4032_v63 }
0x2665   :  { %v4046_v30 = vrot.slane %v4045_v43, 2  ;;  %v4035_v14 = vrot.slane %v4034_v7, 1 }
0x2667   :  { %v4047_v62 = vadd.f32 %v4046_v30, %v4045_v43  ;;  %v4036_v25 = vadd.f32 %v4035_v14, %v4034_v7 }
0x2669   :  { %4284 = vpush %v4036_v25  ;;  %v4048_v58 = vrot.slane %v4047_v62, 1 }
0x266b   :  { %v4049_v27 = vadd.f32 %v4048_v58, %v4047_v62 }
0x266d   :  { %4286 = vpush %v4049_v27 }
0x269a   :  { %s4285_s21 = spop %4284 }
0x269b   :  { %v4038_v9 = vstv %s4285_s21 }
0x269e   :  { %s4287_s11 = spop %4286 }
0x269f   :  { %v4051_v8 = vstv %s4287_s11 }
0x26a0   :  { %4581 = vrcp.f32 %v4051_v8 }
0x26ad   :  { %v4582_v37 = vpop.eup %4581 }
0x26ae   :  { %v4053_v47 = vmul.f32 %v4582_v37, %v4051_v8 }
0x26b0   :  { %v4054_v12 = vsub.f32 2.0, %v4053_v47 }
0x26b2   :  { %v4055_v51 = vmul.f32 %v4582_v37, %v4054_v12 }
0x26b4   :  { %v4056_v48 = vmul.f32 %v4055_v51, %v4038_v9 }
0x26b6   :  { %4058 = vst.msk [vmem:[#allocation2] sm:$0x1] %vm4057_vm5, %v4056_v48 }
0x26b7   :  { %4609 = shalt.err (!%p4606_p4)
}
0x26b8   :  { %4068 = dma.vmem_to_hbm [thread:$0]  %s4066_s15, 16, %s5996_s22, [#allocation3]  }
0x26b9   :  { %4618 = dma.done.wait [#allocation3], 16  }
0x26ba   :  { %4619 = vsyncadd [#allocation3], 4294967280 }
0x26bb   :  { %4072 = vsyncpa [#allocation3], 1 }

</bundles_post_ra>
